<compile_context>
chip_gen: v7x
topology: tpu7x:2x2x1
jax: 0.10.0
libtpu: 0.0.40
codegen_flags: <defaults>
</compile_context>

<pallas_src>
import jax
import jax.numpy as jnp
from jax import lax
from jax.experimental import pallas as pl
from jax.experimental.pallas import tpu as pltpu


def _round_up(x, m):
    return ((x + m - 1) // m) * m


def _row_chunk_rows(h, w, tc):
    """Largest divisor of h whose (rows, w, tc) f32 accumulator is <= ~8 vregs."""
    max_rows = max(1, 8192 // (w * tc))  # 8 vregs * 1024 f32 elements
    rc = 1
    for d in range(1, min(h, max_rows) + 1):
        if h % d == 0:
            rc = d
    return rc


def dwconv_kernel(x_ref, w_ref, b_ref, o_ref, xpad_ref):
    # x_ref:    (H, W, TC)    input block (batch dim squeezed), channels on lanes
    # w_ref:    (9, TC)       depthwise taps, row k = kh*3 + kw
    # b_ref:    (1, TC)       bias
    # o_ref:    (H, W, TC)    output block
    # xpad_ref: (H+2, Wq, TC) scratch; rows 0 / H+1 and columns [W, Wq) are zero
    H, W, TC = x_ref.shape
    Hp, Wq, _ = xpad_ref.shape
    dt = xpad_ref.dtype

    # --- halo: zero only the strips, then one sublane-aligned interior copy ---
    zrow = jnp.zeros((1, Wq, TC), dt)
    xpad_ref[0:1, :, :] = zrow
    xpad_ref[Hp - 1:Hp, :, :] = zrow
    xpad_ref[1:Hp - 1, W:Wq, :] = jnp.zeros((H, Wq - W, TC), dt)
    xpad_ref[1:Hp - 1, 0:W, :] = x_ref[...]            # offset-0 aligned store

    # --- weights / bias hoisted out of the tap loops ---------------------------
    w = w_ref[...].astype(jnp.float32)                  # (9, TC)
    bias = b_ref[...].astype(jnp.float32)               # (1, TC)

    rc = _row_chunk_rows(H, W, TC)
    num_chunks = H // rc
    acc_init = jnp.broadcast_to(bias.reshape(1, 1, TC), (rc, W, TC))  # hoisted

    # Sublane rotation per dw tap: rolled[:, w, :] = xpad[:, (w + dw - 1) % Wq, :].
    # The wrap (w == 0, dw == 0) and the overrun (w == W-1, dw == 2) both land in
    # the zero halo columns, so no boundary masking is needed.
    dw_shift = (1, 0, Wq - 1)

    def chunk_body(ci, carry):
        r0 = ci * rc                                    # first output row of chunk
        acc = acc_init
        for dh in range(3):                             # padded rows r0+dh ..
            slab = xpad_ref[pl.ds(r0 + dh, rc), :, :].astype(jnp.float32)
            for dw in range(3):
                s = dw_shift[dw]
                shifted = slab if s == 0 else pltpu.roll(slab, s, axis=1)
                acc = acc + shifted[:, 0:W, :] * w[dh * 3 + dw]
        o_ref[pl.ds(r0, rc), :, :] = acc.astype(o_ref.dtype)
        return carry

    lax.fori_loop(0, num_chunks, chunk_body, 0, unroll=True)


def _pick_channel_tile(c, height, width, itemsize):
    """Largest lane-dense channel tile (multiple of 128, divides C, <= 512) that
    keeps one grid step inside a conservative VMEM budget."""
    if c % 128 != 0:
        # TODO(synk): lane-fold W columns into channels here (see header).
        return c
    budget = 40 * 1024 * 1024
    wq = _round_up(width + 1, 8)
    best = 128
    for cand in range(128, min(c, 512) + 1, 128):
        if c % cand != 0:
            continue
        blk = height * width * cand * itemsize
        scratch = (height + 2) * wq * cand * itemsize
        if 4 * blk + scratch <= budget:
            best = cand
    return best


def dwconv_pallas(x, weight, bias, height, width):
    """x: (B, N, C), N == height*width. weight: (C, 1, 3, 3) (PyTorch). bias: (C,)."""
    B, N, C = x.shape
    assert N == height * width, "sequence length must equal height*width"

    # (B, N, C) -> (B, H, W, C): free reshape (N is row-major over (h, w)).
    x_nhwc = x.reshape(B, height, width, C)

    # PyTorch depthwise weight (C, 1, 3, 3) -> (9, C), row k = kh*3 + kw.
    # conv2d is cross-correlation, so no kernel flip.
    w_taps = jnp.transpose(weight[:, 0, :, :].reshape(C, 9), (1, 0))
    b_row = bias.reshape(1, C)

    itemsize = jnp.dtype(x.dtype).itemsize
    TC = _pick_channel_tile(C, height, width, itemsize)
    num_ct = C // TC
    Wq = _round_up(width + 1, 8)

    # VMEM budget: double-buffered in/out blocks + padded scratch, capped at
    # ~3/4 of physical VMEM (v7x: 64 MiB physical; v5e/v6e: 128 MiB).
    blk = height * width * TC * itemsize
    scratch_bytes = (height + 2) * Wq * TC * itemsize
    need = 4 * blk + scratch_bytes + (2 << 20)
    try:
        phys = int(pltpu.get_tpu_info().vmem_capacity_bytes)
    except Exception:
        phys = 64 * 1024 * 1024
    vmem_limit = int(min((3 * phys) // 4, max(16 * 1024 * 1024, need)))

    cost = pl.CostEstimate(
        flops=18 * B * height * width * C,        # 9 mul + 9 add per output elem
        transcendentals=0,
        bytes_accessed=(2 * B * height * width * C + 10 * C) * itemsize,
    )

    out_nhwc = pl.pallas_call(
        dwconv_kernel,
        out_shape=jax.ShapeDtypeStruct((B, height, width, C), x.dtype),
        grid_spec=pltpu.PrefetchScalarGridSpec(
            num_scalar_prefetch=0,
            grid=(B, num_ct),
            in_specs=[
                pl.BlockSpec((None, height, width, TC), lambda b, c: (b, 0, 0, c)),
                pl.BlockSpec((9, TC), lambda b, c: (0, c)),
                pl.BlockSpec((1, TC), lambda b, c: (0, c)),
            ],
            out_specs=pl.BlockSpec((None, height, width, TC),
                                   lambda b, c: (b, 0, 0, c)),
            scratch_shapes=[pltpu.VMEM((height + 2, Wq, TC), x.dtype)],
        ),
        compiler_params=pltpu.CompilerParams(
            dimension_semantics=("parallel", "parallel"),
            vmem_limit_bytes=vmem_limit,
        ),
        cost_estimate=cost,
    )(x_nhwc, w_taps, b_row)

    # (B, H, W, C) -> (B, N, C)
    return out_nhwc.reshape(B, N, C)


def reference_dwconv(x, weight, bias, height, width):
    """Pure-JAX reference mirroring the PyTorch NCHW depthwise conv."""
    B, N, C = x.shape
    x_nchw = jnp.transpose(x, (0, 2, 1)).reshape(B, C, height, width)
    out = jax.lax.conv_general_dilated(
        x_nchw, weight,
        window_strides=(1, 1), padding=((1, 1), (1, 1)),
        dimension_numbers=("NCHW", "OIHW", "NCHW"),
        feature_group_count=C,
    ) + bias.reshape(1, C, 1, 1)
    return jnp.transpose(out.reshape(B, C, N), (0, 2, 1))


if __name__ == "__main__":
    key = jax.random.PRNGKey(0)

    def check(B, C, H, W):
        N = H * W
        kx, kw, kb = jax.random.split(jax.random.fold_in(key, C), 3)
        x = jax.random.normal(kx, (B, N, C), dtype=jnp.float32)
        # nn.Conv2d(dim, dim, 3, groups=dim) -> weight (dim, 1, 3, 3), bias (dim,)
        weight = jax.random.normal(kw, (C, 1, 3, 3), dtype=jnp.float32) * 0.1
        bias = jax.random.normal(kb, (C,), dtype=jnp.float32) * 0.1

        out = jax.block_until_ready(dwconv_pallas(x, weight, bias, H, W))
        ref = reference_dwconv(x, weight, bias, H, W)
        assert out.shape == (B, N, C)
        assert jnp.allclose(out, ref, atol=1e-5, rtol=1e-5), \
            float(jnp.max(jnp.abs(out - ref)))

    # Main case: C multiple of 128 exercises the lane-dense channel-tile path.
    check(B=2, C=256, H=16, W=16)
    # SegFormer-like narrow-C case exercises the TC = C fallback path.
    check(B=1, C=64, H=8, W=8)

    print("KERNEL_OK")
</pallas_src>

<mosaic_0001>
module attributes {stable_mosaic.version = 11 : i64} {
  func.func @dwconv_kernel(%arg0: i32, %arg1: i32, %arg2: memref<1x16x16x256xf32, #tpu.memory_space<vmem>>, %arg3: memref<9x256xf32, #tpu.memory_space<vmem>>, %arg4: memref<1x256xf32, #tpu.memory_space<vmem>>, %arg5: memref<1x16x16x256xf32, #tpu.memory_space<vmem>>, %arg6: memref<18x24x256xf32, #tpu.memory_space<vmem>>) attributes {dimension_semantics = [#tpu.dimension_semantics<parallel>, #tpu.dimension_semantics<parallel>], iteration_bounds = array<i64: 2, 1>, scalar_prefetch = 0 : i64, scratch_operands = 1 : i64, tpu.core_type = #tpu.core_type<tc>, window_params = [{transform_indices = @transform_0, window_bounds = array<i64: 1, 16, 16, 256>}, {transform_indices = @transform_1, window_bounds = array<i64: 9, 256>}, {transform_indices = @transform_2, window_bounds = array<i64: 1, 256>}, {transform_indices = @transform_3, window_bounds = array<i64: 1, 16, 16, 256>}]} {
    %cst = arith.constant 0.000000e+00 : f32
    %0 = vector.broadcast %cst : f32 to vector<1x24x256xf32>
    %c0 = arith.constant 0 : index
    %c0_0 = arith.constant 0 : index
    %c0_1 = arith.constant 0 : index
    %1 = vector.load %arg6[%c0, %c0_0, %c0_1] : memref<18x24x256xf32, #tpu.memory_space<vmem>>, vector<1x24x256xf32>
    tpu.vector_store %arg6[%c0, %c0_0, %c0_1], %0 {strides = array<i32>} : memref<18x24x256xf32, #tpu.memory_space<vmem>>, vector<1x24x256xf32>,
    %c17 = arith.constant 17 : index
    %c0_2 = arith.constant 0 : index
    %c0_3 = arith.constant 0 : index
    %2 = vector.load %arg6[%c17, %c0_2, %c0_3] : memref<18x24x256xf32, #tpu.memory_space<vmem>>, vector<1x24x256xf32>
    tpu.vector_store %arg6[%c17, %c0_2, %c0_3], %0 {strides = array<i32>} : memref<18x24x256xf32, #tpu.memory_space<vmem>>, vector<1x24x256xf32>,
    %cst_4 = arith.constant 0.000000e+00 : f32
    %3 = vector.broadcast %cst_4 : f32 to vector<16x8x256xf32>
    %c1 = arith.constant 1 : index
    %c16 = arith.constant 16 : index
    %c0_5 = arith.constant 0 : index
    %4 = vector.load %arg6[%c1, %c16, %c0_5] : memref<18x24x256xf32, #tpu.memory_space<vmem>>, vector<16x8x256xf32>
    tpu.vector_store %arg6[%c1, %c16, %c0_5], %3 {strides = array<i32>} : memref<18x24x256xf32, #tpu.memory_space<vmem>>, vector<16x8x256xf32>,
    %c0_6 = arith.constant 0 : index
    %c0_7 = arith.constant 0 : index
    %c0_8 = arith.constant 0 : index
    %c0_9 = arith.constant 0 : index
    %5 = vector.load %arg2[%c0_6, %c0_7, %c0_8, %c0_9] : memref<1x16x16x256xf32, #tpu.memory_space<vmem>>, vector<1x16x16x256xf32>
    %6 = vector.shape_cast %5 : vector<1x16x16x256xf32> to vector<16x16x256xf32>
    %c1_10 = arith.constant 1 : index
    %c0_11 = arith.constant 0 : index
    %c0_12 = arith.constant 0 : index
    %7 = vector.load %arg6[%c1_10, %c0_11, %c0_12] : memref<18x24x256xf32, #tpu.memory_space<vmem>>, vector<16x16x256xf32>
    tpu.vector_store %arg6[%c1_10, %c0_11, %c0_12], %6 {strides = array<i32>} : memref<18x24x256xf32, #tpu.memory_space<vmem>>, vector<16x16x256xf32>,
    %c0_13 = arith.constant 0 : index
    %c0_14 = arith.constant 0 : index
    %8 = vector.load %arg3[%c0_13, %c0_14] : memref<9x256xf32, #tpu.memory_space<vmem>>, vector<9x256xf32>
    %c0_15 = arith.constant 0 : index
    %c0_16 = arith.constant 0 : index
    %9 = vector.load %arg4[%c0_15, %c0_16] : memref<1x256xf32, #tpu.memory_space<vmem>>, vector<1x256xf32>
    %10 = vector.shape_cast %9 : vector<1x256xf32> to vector<1x1x256xf32>
    %11 = vector.shape_cast %10 : vector<1x1x256xf32> to vector<1x1x256xf32>
    %12 = vector.broadcast %11 : vector<1x1x256xf32> to vector<2x16x256xf32>
    %c0_i32 = arith.constant 0 : i32
    %c2_i32 = arith.constant 2 : i32
    %13 = arith.muli %c0_i32, %c2_i32 : i32
    %c0_i32_17 = arith.constant 0 : i32
    %14 = arith.addi %13, %c0_i32_17 : i32
    %15 = arith.index_cast %14 : i32 to index
    %c0_18 = arith.constant 0 : index
    %c0_19 = arith.constant 0 : index
    %16 = vector.load %arg6[%15, %c0_18, %c0_19] : memref<18x24x256xf32, #tpu.memory_space<vmem>>, vector<2x24x256xf32>
    %c1_i32 = arith.constant 1 : i32
    %17 = tpu.dynamic_rotate %16 by %c1_i32 dim 1 : vector<2x24x256xf32>, i32 -> vector<2x24x256xf32>
    %18 = vector.extract_strided_slice %17 {offsets = [0, 0, 0], sizes = [2, 16, 256], strides = [1, 1, 1]} : vector<2x24x256xf32> to vector<2x16x256xf32>
    %19 = vector.extract_strided_slice %8 {offsets = [0, 0], sizes = [1, 256], strides = [1, 1]} : vector<9x256xf32> to vector<1x256xf32>
    %20 = vector.shape_cast %19 : vector<1x256xf32> to vector<256xf32>
    %21 = vector.shape_cast %20 : vector<256xf32> to vector<1x1x256xf32>
    %22 = vector.broadcast %21 : vector<1x1x256xf32> to vector<2x16x256xf32>
    %23 = arith.mulf %18, %22 : vector<2x16x256xf32>
    %24 = arith.addf %12, %23 : vector<2x16x256xf32>
    %25 = vector.extract_strided_slice %16 {offsets = [0, 0, 0], sizes = [2, 16, 256], strides = [1, 1, 1]} : vector<2x24x256xf32> to vector<2x16x256xf32>
    %26 = vector.extract_strided_slice %8 {offsets = [1, 0], sizes = [1, 256], strides = [1, 1]} : vector<9x256xf32> to vector<1x256xf32>
    %27 = vector.shape_cast %26 : vector<1x256xf32> to vector<256xf32>
    %28 = vector.shape_cast %27 : vector<256xf32> to vector<1x1x256xf32>
    %29 = vector.broadcast %28 : vector<1x1x256xf32> to vector<2x16x256xf32>
    %30 = arith.mulf %25, %29 : vector<2x16x256xf32>
    %31 = arith.addf %24, %30 : vector<2x16x256xf32>
    %c23_i32 = arith.constant 23 : i32
    %32 = tpu.dynamic_rotate %16 by %c23_i32 dim 1 : vector<2x24x256xf32>, i32 -> vector<2x24x256xf32>
    %33 = vector.extract_strided_slice %32 {offsets = [0, 0, 0], sizes = [2, 16, 256], strides = [1, 1, 1]} : vector<2x24x256xf32> to vector<2x16x256xf32>
    %34 = vector.extract_strided_slice %8 {offsets = [2, 0], sizes = [1, 256], strides = [1, 1]} : vector<9x256xf32> to vector<1x256xf32>
    %35 = vector.shape_cast %34 : vector<1x256xf32> to vector<256xf32>
    %36 = vector.shape_cast %35 : vector<256xf32> to vector<1x1x256xf32>
    %37 = vector.broadcast %36 : vector<1x1x256xf32> to vector<2x16x256xf32>
    %38 = arith.mulf %33, %37 : vector<2x16x256xf32>
    %39 = arith.addf %31, %38 : vector<2x16x256xf32>
    %c1_i32_20 = arith.constant 1 : i32
    %40 = arith.addi %13, %c1_i32_20 : i32
    %41 = arith.index_cast %40 : i32 to index
    %c0_21 = arith.constant 0 : index
    %c0_22 = arith.constant 0 : index
    %42 = vector.load %arg6[%41, %c0_21, %c0_22] : memref<18x24x256xf32, #tpu.memory_space<vmem>>, vector<2x24x256xf32>
    %c1_i32_23 = arith.constant 1 : i32
    %43 = tpu.dynamic_rotate %42 by %c1_i32_23 dim 1 : vector<2x24x256xf32>, i32 -> vector<2x24x256xf32>
    %44 = vector.extract_strided_slice %43 {offsets = [0, 0, 0], sizes = [2, 16, 256], strides = [1, 1, 1]} : vector<2x24x256xf32> to vector<2x16x256xf32>
    %45 = vector.extract_strided_slice %8 {offsets = [3, 0], sizes = [1, 256], strides = [1, 1]} : vector<9x256xf32> to vector<1x256xf32>
    %46 = vector.shape_cast %45 : vector<1x256xf32> to vector<256xf32>
    %47 = vector.shape_cast %46 : vector<256xf32> to vector<1x1x256xf32>
    %48 = vector.broadcast %47 : vector<1x1x256xf32> to vector<2x16x256xf32>
    %49 = arith.mulf %44, %48 : vector<2x16x256xf32>
    %50 = arith.addf %39, %49 : vector<2x16x256xf32>
    %51 = vector.extract_strided_slice %42 {offsets = [0, 0, 0], sizes = [2, 16, 256], strides = [1, 1, 1]} : vector<2x24x256xf32> to vector<2x16x256xf32>
    %52 = vector.extract_strided_slice %8 {offsets = [4, 0], sizes = [1, 256], strides = [1, 1]} : vector<9x256xf32> to vector<1x256xf32>
    %53 = vector.shape_cast %52 : vector<1x256xf32> to vector<256xf32>
    %54 = vector.shape_cast %53 : vector<256xf32> to vector<1x1x256xf32>
    %55 = vector.broadcast %54 : vector<1x1x256xf32> to vector<2x16x256xf32>
    %56 = arith.mulf %51, %55 : vector<2x16x256xf32>
    %57 = arith.addf %50, %56 : vector<2x16x256xf32>
    %c23_i32_24 = arith.constant 23 : i32
    %58 = tpu.dynamic_rotate %42 by %c23_i32_24 dim 1 : vector<2x24x256xf32>, i32 -> vector<2x24x256xf32>
    %59 = vector.extract_strided_slice %58 {offsets = [0, 0, 0], sizes = [2, 16, 256], strides = [1, 1, 1]} : vector<2x24x256xf32> to vector<2x16x256xf32>
    %60 = vector.extract_strided_slice %8 {offsets = [5, 0], sizes = [1, 256], strides = [1, 1]} : vector<9x256xf32> to vector<1x256xf32>
    %61 = vector.shape_cast %60 : vector<1x256xf32> to vector<256xf32>
    %62 = vector.shape_cast %61 : vector<256xf32> to vector<1x1x256xf32>
    %63 = vector.broadcast %62 : vector<1x1x256xf32> to vector<2x16x256xf32>
    %64 = arith.mulf %59, %63 : vector<2x16x256xf32>
    %65 = arith.addf %57, %64 : vector<2x16x256xf32>
    %c2_i32_25 = arith.constant 2 : i32
    %66 = arith.addi %13, %c2_i32_25 : i32
    %67 = arith.index_cast %66 : i32 to index
    %c0_26 = arith.constant 0 : index
    %c0_27 = arith.constant 0 : index
    %68 = vector.load %arg6[%67, %c0_26, %c0_27] : memref<18x24x256xf32, #tpu.memory_space<vmem>>, vector<2x24x256xf32>
    %c1_i32_28 = arith.constant 1 : i32
    %69 = tpu.dynamic_rotate %68 by %c1_i32_28 dim 1 : vector<2x24x256xf32>, i32 -> vector<2x24x256xf32>
    %70 = vector.extract_strided_slice %69 {offsets = [0, 0, 0], sizes = [2, 16, 256], strides = [1, 1, 1]} : vector<2x24x256xf32> to vector<2x16x256xf32>
    %71 = vector.extract_strided_slice %8 {offsets = [6, 0], sizes = [1, 256], strides = [1, 1]} : vector<9x256xf32> to vector<1x256xf32>
    %72 = vector.shape_cast %71 : vector<1x256xf32> to vector<256xf32>
    %73 = vector.shape_cast %72 : vector<256xf32> to vector<1x1x256xf32>
    %74 = vector.broadcast %73 : vector<1x1x256xf32> to vector<2x16x256xf32>
    %75 = arith.mulf %70, %74 : vector<2x16x256xf32>
    %76 = arith.addf %65, %75 : vector<2x16x256xf32>
    %77 = vector.extract_strided_slice %68 {offsets = [0, 0, 0], sizes = [2, 16, 256], strides = [1, 1, 1]} : vector<2x24x256xf32> to vector<2x16x256xf32>
    %78 = vector.extract_strided_slice %8 {offsets = [7, 0], sizes = [1, 256], strides = [1, 1]} : vector<9x256xf32> to vector<1x256xf32>
    %79 = vector.shape_cast %78 : vector<1x256xf32> to vector<256xf32>
    %80 = vector.shape_cast %79 : vector<256xf32> to vector<1x1x256xf32>
    %81 = vector.broadcast %80 : vector<1x1x256xf32> to vector<2x16x256xf32>
    %82 = arith.mulf %77, %81 : vector<2x16x256xf32>
    %83 = arith.addf %76, %82 : vector<2x16x256xf32>
    %c23_i32_29 = arith.constant 23 : i32
    %84 = tpu.dynamic_rotate %68 by %c23_i32_29 dim 1 : vector<2x24x256xf32>, i32 -> vector<2x24x256xf32>
    %85 = vector.extract_strided_slice %84 {offsets = [0, 0, 0], sizes = [2, 16, 256], strides = [1, 1, 1]} : vector<2x24x256xf32> to vector<2x16x256xf32>
    %86 = vector.extract_strided_slice %8 {offsets = [8, 0], sizes = [1, 256], strides = [1, 1]} : vector<9x256xf32> to vector<1x256xf32>
    %87 = vector.shape_cast %86 : vector<1x256xf32> to vector<256xf32>
    %88 = vector.shape_cast %87 : vector<256xf32> to vector<1x1x256xf32>
    %89 = vector.broadcast %88 : vector<1x1x256xf32> to vector<2x16x256xf32>
    %90 = arith.mulf %85, %89 : vector<2x16x256xf32>
    %91 = arith.addf %83, %90 : vector<2x16x256xf32>
    %c0_30 = arith.constant 0 : index
    %92 = arith.index_cast %13 : i32 to index
    %c0_31 = arith.constant 0 : index
    %c0_32 = arith.constant 0 : index
    %93 = vector.load %arg5[%c0_30, %92, %c0_31, %c0_32] : memref<1x16x16x256xf32, #tpu.memory_space<vmem>>, vector<1x2x16x256xf32>
    %94 = vector.shape_cast %93 : vector<1x2x16x256xf32> to vector<2x16x256xf32>
    %95 = vector.shape_cast %91 : vector<2x16x256xf32> to vector<1x2x16x256xf32>
    tpu.vector_store %arg5[%c0_30, %92, %c0_31, %c0_32], %95 {strides = array<i32>} : memref<1x16x16x256xf32, #tpu.memory_space<vmem>>, vector<1x2x16x256xf32>,
    %c1_i32_33 = arith.constant 1 : i32
    %c2_i32_34 = arith.constant 2 : i32
    %96 = arith.muli %c1_i32_33, %c2_i32_34 : i32
    %c0_i32_35 = arith.constant 0 : i32
    %97 = arith.addi %96, %c0_i32_35 : i32
    %98 = arith.index_cast %97 : i32 to index
    %c0_36 = arith.constant 0 : index
    %c0_37 = arith.constant 0 : index
    %99 = vector.load %arg6[%98, %c0_36, %c0_37] : memref<18x24x256xf32, #tpu.memory_space<vmem>>, vector<2x24x256xf32>
    %c1_i32_38 = arith.constant 1 : i32
    %100 = tpu.dynamic_rotate %99 by %c1_i32_38 dim 1 : vector<2x24x256xf32>, i32 -> vector<2x24x256xf32>
    %101 = vector.extract_strided_slice %100 {offsets = [0, 0, 0], sizes = [2, 16, 256], strides = [1, 1, 1]} : vector<2x24x256xf32> to vector<2x16x256xf32>
    %102 = vector.extract_strided_slice %8 {offsets = [0, 0], sizes = [1, 256], strides = [1, 1]} : vector<9x256xf32> to vector<1x256xf32>
    %103 = vector.shape_cast %102 : vector<1x256xf32> to vector<256xf32>
    %104 = vector.shape_cast %103 : vector<256xf32> to vector<1x1x256xf32>
    %105 = vector.broadcast %104 : vector<1x1x256xf32> to vector<2x16x256xf32>
    %106 = arith.mulf %101, %105 : vector<2x16x256xf32>
    %107 = arith.addf %12, %106 : vector<2x16x256xf32>
    %108 = vector.extract_strided_slice %99 {offsets = [0, 0, 0], sizes = [2, 16, 256], strides = [1, 1, 1]} : vector<2x24x256xf32> to vector<2x16x256xf32>
    %109 = vector.extract_strided_slice %8 {offsets = [1, 0], sizes = [1, 256], strides = [1, 1]} : vector<9x256xf32> to vector<1x256xf32>
    %110 = vector.shape_cast %109 : vector<1x256xf32> to vector<256xf32>
    %111 = vector.shape_cast %110 : vector<256xf32> to vector<1x1x256xf32>
    %112 = vector.broadcast %111 : vector<1x1x256xf32> to vector<2x16x256xf32>
    %113 = arith.mulf %108, %112 : vector<2x16x256xf32>
    %114 = arith.addf %107, %113 : vector<2x16x256xf32>
    %c23_i32_39 = arith.constant 23 : i32
    %115 = tpu.dynamic_rotate %99 by %c23_i32_39 dim 1 : vector<2x24x256xf32>, i32 -> vector<2x24x256xf32>
    %116 = vector.extract_strided_slice %115 {offsets = [0, 0, 0], sizes = [2, 16, 256], strides = [1, 1, 1]} : vector<2x24x256xf32> to vector<2x16x256xf32>
    %117 = vector.extract_strided_slice %8 {offsets = [2, 0], sizes = [1, 256], strides = [1, 1]} : vector<9x256xf32> to vector<1x256xf32>
    %118 = vector.shape_cast %117 : vector<1x256xf32> to vector<256xf32>
    %119 = vector.shape_cast %118 : vector<256xf32> to vector<1x1x256xf32>
    %120 = vector.broadcast %119 : vector<1x1x256xf32> to vector<2x16x256xf32>
    %121 = arith.mulf %116, %120 : vector<2x16x256xf32>
    %122 = arith.addf %114, %121 : vector<2x16x256xf32>
    %c1_i32_40 = arith.constant 1 : i32
    %123 = arith.addi %96, %c1_i32_40 : i32
    %124 = arith.index_cast %123 : i32 to index
    %c0_41 = arith.constant 0 : index
    %c0_42 = arith.constant 0 : index
    %125 = vector.load %arg6[%124, %c0_41, %c0_42] : memref<18x24x256xf32, #tpu.memory_space<vmem>>, vector<2x24x256xf32>
    %c1_i32_43 = arith.constant 1 : i32
    %126 = tpu.dynamic_rotate %125 by %c1_i32_43 dim 1 : vector<2x24x256xf32>, i32 -> vector<2x24x256xf32>
    %127 = vector.extract_strided_slice %126 {offsets = [0, 0, 0], sizes = [2, 16, 256], strides = [1, 1, 1]} : vector<2x24x256xf32> to vector<2x16x256xf32>
    %128 = vector.extract_strided_slice %8 {offsets = [3, 0], sizes = [1, 256], strides = [1, 1]} : vector<9x256xf32> to vector<1x256xf32>
    %129 = vector.shape_cast %128 : vector<1x256xf32> to vector<256xf32>
    %130 = vector.shape_cast %129 : vector<256xf32> to vector<1x1x256xf32>
    %131 = vector.broadcast %130 : vector<1x1x256xf32> to vector<2x16x256xf32>
    %132 = arith.mulf %127, %131 : vector<2x16x256xf32>
    %133 = arith.addf %122, %132 : vector<2x16x256xf32>
    %134 = vector.extract_strided_slice %125 {offsets = [0, 0, 0], sizes = [2, 16, 256], strides = [1, 1, 1]} : vector<2x24x256xf32> to vector<2x16x256xf32>
    %135 = vector.extract_strided_slice %8 {offsets = [4, 0], sizes = [1, 256], strides = [1, 1]} : vector<9x256xf32> to vector<1x256xf32>
    %136 = vector.shape_cast %135 : vector<1x256xf32> to vector<256xf32>
    %137 = vector.shape_cast %136 : vector<256xf32> to vector<1x1x256xf32>
    %138 = vector.broadcast %137 : vector<1x1x256xf32> to vector<2x16x256xf32>
    %139 = arith.mulf %134, %138 : vector<2x16x256xf32>
    %140 = arith.addf %133, %139 : vector<2x16x256xf32>
    %c23_i32_44 = arith.constant 23 : i32
    %141 = tpu.dynamic_rotate %125 by %c23_i32_44 dim 1 : vector<2x24x256xf32>, i32 -> vector<2x24x256xf32>
    %142 = vector.extract_strided_slice %141 {offsets = [0, 0, 0], sizes = [2, 16, 256], strides = [1, 1, 1]} : vector<2x24x256xf32> to vector<2x16x256xf32>
    %143 = vector.extract_strided_slice %8 {offsets = [5, 0], sizes = [1, 256], strides = [1, 1]} : vector<9x256xf32> to vector<1x256xf32>
    %144 = vector.shape_cast %143 : vector<1x256xf32> to vector<256xf32>
    %145 = vector.shape_cast %144 : vector<256xf32> to vector<1x1x256xf32>
    %146 = vector.broadcast %145 : vector<1x1x256xf32> to vector<2x16x256xf32>
    %147 = arith.mulf %142, %146 : vector<2x16x256xf32>
    %148 = arith.addf %140, %147 : vector<2x16x256xf32>
    %c2_i32_45 = arith.constant 2 : i32
    %149 = arith.addi %96, %c2_i32_45 : i32
    %150 = arith.index_cast %149 : i32 to index
    %c0_46 = arith.constant 0 : index
    %c0_47 = arith.constant 0 : index
    %151 = vector.load %arg6[%150, %c0_46, %c0_47] : memref<18x24x256xf32, #tpu.memory_space<vmem>>, vector<2x24x256xf32>
    %c1_i32_48 = arith.constant 1 : i32
    %152 = tpu.dynamic_rotate %151 by %c1_i32_48 dim 1 : vector<2x24x256xf32>, i32 -> vector<2x24x256xf32>
    %153 = vector.extract_strided_slice %152 {offsets = [0, 0, 0], sizes = [2, 16, 256], strides = [1, 1, 1]} : vector<2x24x256xf32> to vector<2x16x256xf32>
    %154 = vector.extract_strided_slice %8 {offsets = [6, 0], sizes = [1, 256], strides = [1, 1]} : vector<9x256xf32> to vector<1x256xf32>
    %155 = vector.shape_cast %154 : vector<1x256xf32> to vector<256xf32>
    %156 = vector.shape_cast %155 : vector<256xf32> to vector<1x1x256xf32>
    %157 = vector.broadcast %156 : vector<1x1x256xf32> to vector<2x16x256xf32>
    %158 = arith.mulf %153, %157 : vector<2x16x256xf32>
    %159 = arith.addf %148, %158 : vector<2x16x256xf32>
    %160 = vector.extract_strided_slice %151 {offsets = [0, 0, 0], sizes = [2, 16, 256], strides = [1, 1, 1]} : vector<2x24x256xf32> to vector<2x16x256xf32>
    %161 = vector.extract_strided_slice %8 {offsets = [7, 0], sizes = [1, 256], strides = [1, 1]} : vector<9x256xf32> to vector<1x256xf32>
    %162 = vector.shape_cast %161 : vector<1x256xf32> to vector<256xf32>
    %163 = vector.shape_cast %162 : vector<256xf32> to vector<1x1x256xf32>
    %164 = vector.broadcast %163 : vector<1x1x256xf32> to vector<2x16x256xf32>
    %165 = arith.mulf %160, %164 : vector<2x16x256xf32>
    %166 = arith.addf %159, %165 : vector<2x16x256xf32>
    %c23_i32_49 = arith.constant 23 : i32
    %167 = tpu.dynamic_rotate %151 by %c23_i32_49 dim 1 : vector<2x24x256xf32>, i32 -> vector<2x24x256xf32>
    %168 = vector.extract_strided_slice %167 {offsets = [0, 0, 0], sizes = [2, 16, 256], strides = [1, 1, 1]} : vector<2x24x256xf32> to vector<2x16x256xf32>
    %169 = vector.extract_strided_slice %8 {offsets = [8, 0], sizes = [1, 256], strides = [1, 1]} : vector<9x256xf32> to vector<1x256xf32>
    %170 = vector.shape_cast %169 : vector<1x256xf32> to vector<256xf32>
    %171 = vector.shape_cast %170 : vector<256xf32> to vector<1x1x256xf32>
    %172 = vector.broadcast %171 : vector<1x1x256xf32> to vector<2x16x256xf32>
    %173 = arith.mulf %168, %172 : vector<2x16x256xf32>
    %174 = arith.addf %166, %173 : vector<2x16x256xf32>
    %c0_50 = arith.constant 0 : index
    %175 = arith.index_cast %96 : i32 to index
    %c0_51 = arith.constant 0 : index
    %c0_52 = arith.constant 0 : index
    %176 = vector.load %arg5[%c0_50, %175, %c0_51, %c0_52] : memref<1x16x16x256xf32, #tpu.memory_space<vmem>>, vector<1x2x16x256xf32>
    %177 = vector.shape_cast %176 : vector<1x2x16x256xf32> to vector<2x16x256xf32>
    %178 = vector.shape_cast %174 : vector<2x16x256xf32> to vector<1x2x16x256xf32>
    tpu.vector_store %arg5[%c0_50, %175, %c0_51, %c0_52], %178 {strides = array<i32>} : memref<1x16x16x256xf32, #tpu.memory_space<vmem>>, vector<1x2x16x256xf32>,
    %c2_i32_53 = arith.constant 2 : i32
    %c2_i32_54 = arith.constant 2 : i32
    %179 = arith.muli %c2_i32_53, %c2_i32_54 : i32
    %c0_i32_55 = arith.constant 0 : i32
    %180 = arith.addi %179, %c0_i32_55 : i32
    %181 = arith.index_cast %180 : i32 to index
    %c0_56 = arith.constant 0 : index
    %c0_57 = arith.constant 0 : index
    %182 = vector.load %arg6[%181, %c0_56, %c0_57] : memref<18x24x256xf32, #tpu.memory_space<vmem>>, vector<2x24x256xf32>
    %c1_i32_58 = arith.constant 1 : i32
    %183 = tpu.dynamic_rotate %182 by %c1_i32_58 dim 1 : vector<2x24x256xf32>, i32 -> vector<2x24x256xf32>
    %184 = vector.extract_strided_slice %183 {offsets = [0, 0, 0], sizes = [2, 16, 256], strides = [1, 1, 1]} : vector<2x24x256xf32> to vector<2x16x256xf32>
    %185 = vector.extract_strided_slice %8 {offsets = [0, 0], sizes = [1, 256], strides = [1, 1]} : vector<9x256xf32> to vector<1x256xf32>
    %186 = vector.shape_cast %185 : vector<1x256xf32> to vector<256xf32>
    %187 = vector.shape_cast %186 : vector<256xf32> to vector<1x1x256xf32>
    %188 = vector.broadcast %187 : vector<1x1x256xf32> to vector<2x16x256xf32>
    %189 = arith.mulf %184, %188 : vector<2x16x256xf32>
    %190 = arith.addf %12, %189 : vector<2x16x256xf32>
    %191 = vector.extract_strided_slice %182 {offsets = [0, 0, 0], sizes = [2, 16, 256], strides = [1, 1, 1]} : vector<2x24x256xf32> to vector<2x16x256xf32>
    %192 = vector.extract_strided_slice %8 {offsets = [1, 0], sizes = [1, 256], strides = [1, 1]} : vector<9x256xf32> to vector<1x256xf32>
    %193 = vector.shape_cast %192 : vector<1x256xf32> to vector<256xf32>
    %194 = vector.shape_cast %193 : vector<256xf32> to vector<1x1x256xf32>
    %195 = vector.broadcast %194 : vector<1x1x256xf32> to vector<2x16x256xf32>
    %196 = arith.mulf %191, %195 : vector<2x16x256xf32>
    %197 = arith.addf %190, %196 : vector<2x16x256xf32>
    %c23_i32_59 = arith.constant 23 : i32
    %198 = tpu.dynamic_rotate %182 by %c23_i32_59 dim 1 : vector<2x24x256xf32>, i32 -> vector<2x24x256xf32>
    %199 = vector.extract_strided_slice %198 {offsets = [0, 0, 0], sizes = [2, 16, 256], strides = [1, 1, 1]} : vector<2x24x256xf32> to vector<2x16x256xf32>
    %200 = vector.extract_strided_slice %8 {offsets = [2, 0], sizes = [1, 256], strides = [1, 1]} : vector<9x256xf32> to vector<1x256xf32>
    %201 = vector.shape_cast %200 : vector<1x256xf32> to vector<256xf32>
    %202 = vector.shape_cast %201 : vector<256xf32> to vector<1x1x256xf32>
    %203 = vector.broadcast %202 : vector<1x1x256xf32> to vector<2x16x256xf32>
    %204 = arith.mulf %199, %203 : vector<2x16x256xf32>
    %205 = arith.addf %197, %204 : vector<2x16x256xf32>
    %c1_i32_60 = arith.constant 1 : i32
    %206 = arith.addi %179, %c1_i32_60 : i32
    %207 = arith.index_cast %206 : i32 to index
    %c0_61 = arith.constant 0 : index
    %c0_62 = arith.constant 0 : index
    %208 = vector.load %arg6[%207, %c0_61, %c0_62] : memref<18x24x256xf32, #tpu.memory_space<vmem>>, vector<2x24x256xf32>
    %c1_i32_63 = arith.constant 1 : i32
    %209 = tpu.dynamic_rotate %208 by %c1_i32_63 dim 1 : vector<2x24x256xf32>, i32 -> vector<2x24x256xf32>
    %210 = vector.extract_strided_slice %209 {offsets = [0, 0, 0], sizes = [2, 16, 256], strides = [1, 1, 1]} : vector<2x24x256xf32> to vector<2x16x256xf32>
    %211 = vector.extract_strided_slice %8 {offsets = [3, 0], sizes = [1, 256], strides = [1, 1]} : vector<9x256xf32> to vector<1x256xf32>
    %212 = vector.shape_cast %211 : vector<1x256xf32> to vector<256xf32>
    %213 = vector.shape_cast %212 : vector<256xf32> to vector<1x1x256xf32>
    %214 = vector.broadcast %213 : vector<1x1x256xf32> to vector<2x16x256xf32>
    %215 = arith.mulf %210, %214 : vector<2x16x256xf32>
    %216 = arith.addf %205, %215 : vector<2x16x256xf32>
    %217 = vector.extract_strided_slice %208 {offsets = [0, 0, 0], sizes = [2, 16, 256], strides = [1, 1, 1]} : vector<2x24x256xf32> to vector<2x16x256xf32>
    %218 = vector.extract_strided_slice %8 {offsets = [4, 0], sizes = [1, 256], strides = [1, 1]} : vector<9x256xf32> to vector<1x256xf32>
    %219 = vector.shape_cast %218 : vector<1x256xf32> to vector<256xf32>
    %220 = vector.shape_cast %219 : vector<256xf32> to vector<1x1x256xf32>
    %221 = vector.broadcast %220 : vector<1x1x256xf32> to vector<2x16x256xf32>
    %222 = arith.mulf %217, %221 : vector<2x16x256xf32>
    %223 = arith.addf %216, %222 : vector<2x16x256xf32>
    %c23_i32_64 = arith.constant 23 : i32
    %224 = tpu.dynamic_rotate %208 by %c23_i32_64 dim 1 : vector<2x24x256xf32>, i32 -> vector<2x24x256xf32>
    %225 = vector.extract_strided_slice %224 {offsets = [0, 0, 0], sizes = [2, 16, 256], strides = [1, 1, 1]} : vector<2x24x256xf32> to vector<2x16x256xf32>
    %226 = vector.extract_strided_slice %8 {offsets = [5, 0], sizes = [1, 256], strides = [1, 1]} : vector<9x256xf32> to vector<1x256xf32>
    %227 = vector.shape_cast %226 : vector<1x256xf32> to vector<256xf32>
    %228 = vector.shape_cast %227 : vector<256xf32> to vector<1x1x256xf32>
    %229 = vector.broadcast %228 : vector<1x1x256xf32> to vector<2x16x256xf32>
    %230 = arith.mulf %225, %229 : vector<2x16x256xf32>
    %231 = arith.addf %223, %230 : vector<2x16x256xf32>
    %c2_i32_65 = arith.constant 2 : i32
    %232 = arith.addi %179, %c2_i32_65 : i32
    %233 = arith.index_cast %232 : i32 to index
    %c0_66 = arith.constant 0 : index
    %c0_67 = arith.constant 0 : index
    %234 = vector.load %arg6[%233, %c0_66, %c0_67] : memref<18x24x256xf32, #tpu.memory_space<vmem>>, vector<2x24x256xf32>
    %c1_i32_68 = arith.constant 1 : i32
    %235 = tpu.dynamic_rotate %234 by %c1_i32_68 dim 1 : vector<2x24x256xf32>, i32 -> vector<2x24x256xf32>
    %236 = vector.extract_strided_slice %235 {offsets = [0, 0, 0], sizes = [2, 16, 256], strides = [1, 1, 1]} : vector<2x24x256xf32> to vector<2x16x256xf32>
    %237 = vector.extract_strided_slice %8 {offsets = [6, 0], sizes = [1, 256], strides = [1, 1]} : vector<9x256xf32> to vector<1x256xf32>
    %238 = vector.shape_cast %237 : vector<1x256xf32> to vector<256xf32>
    %239 = vector.shape_cast %238 : vector<256xf32> to vector<1x1x256xf32>
    %240 = vector.broadcast %239 : vector<1x1x256xf32> to vector<2x16x256xf32>
    %241 = arith.mulf %236, %240 : vector<2x16x256xf32>
    %242 = arith.addf %231, %241 : vector<2x16x256xf32>
    %243 = vector.extract_strided_slice %234 {offsets = [0, 0, 0], sizes = [2, 16, 256], strides = [1, 1, 1]} : vector<2x24x256xf32> to vector<2x16x256xf32>
    %244 = vector.extract_strided_slice %8 {offsets = [7, 0], sizes = [1, 256], strides = [1, 1]} : vector<9x256xf32> to vector<1x256xf32>
    %245 = vector.shape_cast %244 : vector<1x256xf32> to vector<256xf32>
    %246 = vector.shape_cast %245 : vector<256xf32> to vector<1x1x256xf32>
    %247 = vector.broadcast %246 : vector<1x1x256xf32> to vector<2x16x256xf32>
    %248 = arith.mulf %243, %247 : vector<2x16x256xf32>
    %249 = arith.addf %242, %248 : vector<2x16x256xf32>
    %c23_i32_69 = arith.constant 23 : i32
    %250 = tpu.dynamic_rotate %234 by %c23_i32_69 dim 1 : vector<2x24x256xf32>, i32 -> vector<2x24x256xf32>
    %251 = vector.extract_strided_slice %250 {offsets = [0, 0, 0], sizes = [2, 16, 256], strides = [1, 1, 1]} : vector<2x24x256xf32> to vector<2x16x256xf32>
    %252 = vector.extract_strided_slice %8 {offsets = [8, 0], sizes = [1, 256], strides = [1, 1]} : vector<9x256xf32> to vector<1x256xf32>
    %253 = vector.shape_cast %252 : vector<1x256xf32> to vector<256xf32>
    %254 = vector.shape_cast %253 : vector<256xf32> to vector<1x1x256xf32>
    %255 = vector.broadcast %254 : vector<1x1x256xf32> to vector<2x16x256xf32>
    %256 = arith.mulf %251, %255 : vector<2x16x256xf32>
    %257 = arith.addf %249, %256 : vector<2x16x256xf32>
    %c0_70 = arith.constant 0 : index
    %258 = arith.index_cast %179 : i32 to index
    %c0_71 = arith.constant 0 : index
    %c0_72 = arith.constant 0 : index
    %259 = vector.load %arg5[%c0_70, %258, %c0_71, %c0_72] : memref<1x16x16x256xf32, #tpu.memory_space<vmem>>, vector<1x2x16x256xf32>
    %260 = vector.shape_cast %259 : vector<1x2x16x256xf32> to vector<2x16x256xf32>
    %261 = vector.shape_cast %257 : vector<2x16x256xf32> to vector<1x2x16x256xf32>
    tpu.vector_store %arg5[%c0_70, %258, %c0_71, %c0_72], %261 {strides = array<i32>} : memref<1x16x16x256xf32, #tpu.memory_space<vmem>>, vector<1x2x16x256xf32>,
    %c3_i32 = arith.constant 3 : i32
    %c2_i32_73 = arith.constant 2 : i32
    %262 = arith.muli %c3_i32, %c2_i32_73 : i32
    %c0_i32_74 = arith.constant 0 : i32
    %263 = arith.addi %262, %c0_i32_74 : i32
    %264 = arith.index_cast %263 : i32 to index
    %c0_75 = arith.constant 0 : index
    %c0_76 = arith.constant 0 : index
    %265 = vector.load %arg6[%264, %c0_75, %c0_76] : memref<18x24x256xf32, #tpu.memory_space<vmem>>, vector<2x24x256xf32>
    %c1_i32_77 = arith.constant 1 : i32
    %266 = tpu.dynamic_rotate %265 by %c1_i32_77 dim 1 : vector<2x24x256xf32>, i32 -> vector<2x24x256xf32>
    %267 = vector.extract_strided_slice %266 {offsets = [0, 0, 0], sizes = [2, 16, 256], strides = [1, 1, 1]} : vector<2x24x256xf32> to vector<2x16x256xf32>
    %268 = vector.extract_strided_slice %8 {offsets = [0, 0], sizes = [1, 256], strides = [1, 1]} : vector<9x256xf32> to vector<1x256xf32>
    %269 = vector.shape_cast %268 : vector<1x256xf32> to vector<256xf32>
    %270 = vector.shape_cast %269 : vector<256xf32> to vector<1x1x256xf32>
    %271 = vector.broadcast %270 : vector<1x1x256xf32> to vector<2x16x256xf32>
    %272 = arith.mulf %267, %271 : vector<2x16x256xf32>
    %273 = arith.addf %12, %272 : vector<2x16x256xf32>
    %274 = vector.extract_strided_slice %265 {offsets = [0, 0, 0], sizes = [2, 16, 256], strides = [1, 1, 1]} : vector<2x24x256xf32> to vector<2x16x256xf32>
    %275 = vector.extract_strided_slice %8 {offsets = [1, 0], sizes = [1, 256], strides = [1, 1]} : vector<9x256xf32> to vector<1x256xf32>
    %276 = vector.shape_cast %275 : vector<1x256xf32> to vector<256xf32>
    %277 = vector.shape_cast %276 : vector<256xf32> to vector<1x1x256xf32>
    %278 = vector.broadcast %277 : vector<1x1x256xf32> to vector<2x16x256xf32>
    %279 = arith.mulf %274, %278 : vector<2x16x256xf32>
    %280 = arith.addf %273, %279 : vector<2x16x256xf32>
    %c23_i32_78 = arith.constant 23 : i32
    %281 = tpu.dynamic_rotate %265 by %c23_i32_78 dim 1 : vector<2x24x256xf32>, i32 -> vector<2x24x256xf32>
    %282 = vector.extract_strided_slice %281 {offsets = [0, 0, 0], sizes = [2, 16, 256], strides = [1, 1, 1]} : vector<2x24x256xf32> to vector<2x16x256xf32>
    %283 = vector.extract_strided_slice %8 {offsets = [2, 0], sizes = [1, 256], strides = [1, 1]} : vector<9x256xf32> to vector<1x256xf32>
    %284 = vector.shape_cast %283 : vector<1x256xf32> to vector<256xf32>
    %285 = vector.shape_cast %284 : vector<256xf32> to vector<1x1x256xf32>
    %286 = vector.broadcast %285 : vector<1x1x256xf32> to vector<2x16x256xf32>
    %287 = arith.mulf %282, %286 : vector<2x16x256xf32>
    %288 = arith.addf %280, %287 : vector<2x16x256xf32>
    %c1_i32_79 = arith.constant 1 : i32
    %289 = arith.addi %262, %c1_i32_79 : i32
    %290 = arith.index_cast %289 : i32 to index
    %c0_80 = arith.constant 0 : index
    %c0_81 = arith.constant 0 : index
    %291 = vector.load %arg6[%290, %c0_80, %c0_81] : memref<18x24x256xf32, #tpu.memory_space<vmem>>, vector<2x24x256xf32>
    %c1_i32_82 = arith.constant 1 : i32
    %292 = tpu.dynamic_rotate %291 by %c1_i32_82 dim 1 : vector<2x24x256xf32>, i32 -> vector<2x24x256xf32>
    %293 = vector.extract_strided_slice %292 {offsets = [0, 0, 0], sizes = [2, 16, 256], strides = [1, 1, 1]} : vector<2x24x256xf32> to vector<2x16x256xf32>
    %294 = vector.extract_strided_slice %8 {offsets = [3, 0], sizes = [1, 256], strides = [1, 1]} : vector<9x256xf32> to vector<1x256xf32>
    %295 = vector.shape_cast %294 : vector<1x256xf32> to vector<256xf32>
    %296 = vector.shape_cast %295 : vector<256xf32> to vector<1x1x256xf32>
    %297 = vector.broadcast %296 : vector<1x1x256xf32> to vector<2x16x256xf32>
    %298 = arith.mulf %293, %297 : vector<2x16x256xf32>
    %299 = arith.addf %288, %298 : vector<2x16x256xf32>
    %300 = vector.extract_strided_slice %291 {offsets = [0, 0, 0], sizes = [2, 16, 256], strides = [1, 1, 1]} : vector<2x24x256xf32> to vector<2x16x256xf32>
    %301 = vector.extract_strided_slice %8 {offsets = [4, 0], sizes = [1, 256], strides = [1, 1]} : vector<9x256xf32> to vector<1x256xf32>
    %302 = vector.shape_cast %301 : vector<1x256xf32> to vector<256xf32>
    %303 = vector.shape_cast %302 : vector<256xf32> to vector<1x1x256xf32>
    %304 = vector.broadcast %303 : vector<1x1x256xf32> to vector<2x16x256xf32>
    %305 = arith.mulf %300, %304 : vector<2x16x256xf32>
    %306 = arith.addf %299, %305 : vector<2x16x256xf32>
    %c23_i32_83 = arith.constant 23 : i32
    %307 = tpu.dynamic_rotate %291 by %c23_i32_83 dim 1 : vector<2x24x256xf32>, i32 -> vector<2x24x256xf32>
    %308 = vector.extract_strided_slice %307 {offsets = [0, 0, 0], sizes = [2, 16, 256], strides = [1, 1, 1]} : vector<2x24x256xf32> to vector<2x16x256xf32>
    %309 = vector.extract_strided_slice %8 {offsets = [5, 0], sizes = [1, 256], strides = [1, 1]} : vector<9x256xf32> to vector<1x256xf32>
    %310 = vector.shape_cast %309 : vector<1x256xf32> to vector<256xf32>
    %311 = vector.shape_cast %310 : vector<256xf32> to vector<1x1x256xf32>
    %312 = vector.broadcast %311 : vector<1x1x256xf32> to vector<2x16x256xf32>
    %313 = arith.mulf %308, %312 : vector<2x16x256xf32>
    %314 = arith.addf %306, %313 : vector<2x16x256xf32>
    %c2_i32_84 = arith.constant 2 : i32
    %315 = arith.addi %262, %c2_i32_84 : i32
    %316 = arith.index_cast %315 : i32 to index
    %c0_85 = arith.constant 0 : index
    %c0_86 = arith.constant 0 : index
    %317 = vector.load %arg6[%316, %c0_85, %c0_86] : memref<18x24x256xf32, #tpu.memory_space<vmem>>, vector<2x24x256xf32>
    %c1_i32_87 = arith.constant 1 : i32
    %318 = tpu.dynamic_rotate %317 by %c1_i32_87 dim 1 : vector<2x24x256xf32>, i32 -> vector<2x24x256xf32>
    %319 = vector.extract_strided_slice %318 {offsets = [0, 0, 0], sizes = [2, 16, 256], strides = [1, 1, 1]} : vector<2x24x256xf32> to vector<2x16x256xf32>
    %320 = vector.extract_strided_slice %8 {offsets = [6, 0], sizes = [1, 256], strides = [1, 1]} : vector<9x256xf32> to vector<1x256xf32>
    %321 = vector.shape_cast %320 : vector<1x256xf32> to vector<256xf32>
    %322 = vector.shape_cast %321 : vector<256xf32> to vector<1x1x256xf32>
    %323 = vector.broadcast %322 : vector<1x1x256xf32> to vector<2x16x256xf32>
    %324 = arith.mulf %319, %323 : vector<2x16x256xf32>
    %325 = arith.addf %314, %324 : vector<2x16x256xf32>
    %326 = vector.extract_strided_slice %317 {offsets = [0, 0, 0], sizes = [2, 16, 256], strides = [1, 1, 1]} : vector<2x24x256xf32> to vector<2x16x256xf32>
    %327 = vector.extract_strided_slice %8 {offsets = [7, 0], sizes = [1, 256], strides = [1, 1]} : vector<9x256xf32> to vector<1x256xf32>
    %328 = vector.shape_cast %327 : vector<1x256xf32> to vector<256xf32>
    %329 = vector.shape_cast %328 : vector<256xf32> to vector<1x1x256xf32>
    %330 = vector.broadcast %329 : vector<1x1x256xf32> to vector<2x16x256xf32>
    %331 = arith.mulf %326, %330 : vector<2x16x256xf32>
    %332 = arith.addf %325, %331 : vector<2x16x256xf32>
    %c23_i32_88 = arith.constant 23 : i32
    %333 = tpu.dynamic_rotate %317 by %c23_i32_88 dim 1 : vector<2x24x256xf32>, i32 -> vector<2x24x256xf32>
    %334 = vector.extract_strided_slice %333 {offsets = [0, 0, 0], sizes = [2, 16, 256], strides = [1, 1, 1]} : vector<2x24x256xf32> to vector<2x16x256xf32>
    %335 = vector.extract_strided_slice %8 {offsets = [8, 0], sizes = [1, 256], strides = [1, 1]} : vector<9x256xf32> to vector<1x256xf32>
    %336 = vector.shape_cast %335 : vector<1x256xf32> to vector<256xf32>
    %337 = vector.shape_cast %336 : vector<256xf32> to vector<1x1x256xf32>
    %338 = vector.broadcast %337 : vector<1x1x256xf32> to vector<2x16x256xf32>
    %339 = arith.mulf %334, %338 : vector<2x16x256xf32>
    %340 = arith.addf %332, %339 : vector<2x16x256xf32>
    %c0_89 = arith.constant 0 : index
    %341 = arith.index_cast %262 : i32 to index
    %c0_90 = arith.constant 0 : index
    %c0_91 = arith.constant 0 : index
    %342 = vector.load %arg5[%c0_89, %341, %c0_90, %c0_91] : memref<1x16x16x256xf32, #tpu.memory_space<vmem>>, vector<1x2x16x256xf32>
    %343 = vector.shape_cast %342 : vector<1x2x16x256xf32> to vector<2x16x256xf32>
    %344 = vector.shape_cast %340 : vector<2x16x256xf32> to vector<1x2x16x256xf32>
    tpu.vector_store %arg5[%c0_89, %341, %c0_90, %c0_91], %344 {strides = array<i32>} : memref<1x16x16x256xf32, #tpu.memory_space<vmem>>, vector<1x2x16x256xf32>,
    %c4_i32 = arith.constant 4 : i32
    %c2_i32_92 = arith.constant 2 : i32
    %345 = arith.muli %c4_i32, %c2_i32_92 : i32
    %c0_i32_93 = arith.constant 0 : i32
    %346 = arith.addi %345, %c0_i32_93 : i32
    %347 = arith.index_cast %346 : i32 to index
    %c0_94 = arith.constant 0 : index
    %c0_95 = arith.constant 0 : index
    %348 = vector.load %arg6[%347, %c0_94, %c0_95] : memref<18x24x256xf32, #tpu.memory_space<vmem>>, vector<2x24x256xf32>
    %c1_i32_96 = arith.constant 1 : i32
    %349 = tpu.dynamic_rotate %348 by %c1_i32_96 dim 1 : vector<2x24x256xf32>, i32 -> vector<2x24x256xf32>
    %350 = vector.extract_strided_slice %349 {offsets = [0, 0, 0], sizes = [2, 16, 256], strides = [1, 1, 1]} : vector<2x24x256xf32> to vector<2x16x256xf32>
    %351 = vector.extract_strided_slice %8 {offsets = [0, 0], sizes = [1, 256], strides = [1, 1]} : vector<9x256xf32> to vector<1x256xf32>
    %352 = vector.shape_cast %351 : vector<1x256xf32> to vector<256xf32>
    %353 = vector.shape_cast %352 : vector<256xf32> to vector<1x1x256xf32>
    %354 = vector.broadcast %353 : vector<1x1x256xf32> to vector<2x16x256xf32>
    %355 = arith.mulf %350, %354 : vector<2x16x256xf32>
    %356 = arith.addf %12, %355 : vector<2x16x256xf32>
    %357 = vector.extract_strided_slice %348 {offsets = [0, 0, 0], sizes = [2, 16, 256], strides = [1, 1, 1]} : vector<2x24x256xf32> to vector<2x16x256xf32>
    %358 = vector.extract_strided_slice %8 {offsets = [1, 0], sizes = [1, 256], strides = [1, 1]} : vector<9x256xf32> to vector<1x256xf32>
    %359 = vector.shape_cast %358 : vector<1x256xf32> to vector<256xf32>
    %360 = vector.shape_cast %359 : vector<256xf32> to vector<1x1x256xf32>
    %361 = vector.broadcast %360 : vector<1x1x256xf32> to vector<2x16x256xf32>
    %362 = arith.mulf %357, %361 : vector<2x16x256xf32>
    %363 = arith.addf %356, %362 : vector<2x16x256xf32>
    %c23_i32_97 = arith.constant 23 : i32
    %364 = tpu.dynamic_rotate %348 by %c23_i32_97 dim 1 : vector<2x24x256xf32>, i32 -> vector<2x24x256xf32>
    %365 = vector.extract_strided_slice %364 {offsets = [0, 0, 0], sizes = [2, 16, 256], strides = [1, 1, 1]} : vector<2x24x256xf32> to vector<2x16x256xf32>
    %366 = vector.extract_strided_slice %8 {offsets = [2, 0], sizes = [1, 256], strides = [1, 1]} : vector<9x256xf32> to vector<1x256xf32>
    %367 = vector.shape_cast %366 : vector<1x256xf32> to vector<256xf32>
    %368 = vector.shape_cast %367 : vector<256xf32> to vector<1x1x256xf32>
    %369 = vector.broadcast %368 : vector<1x1x256xf32> to vector<2x16x256xf32>
    %370 = arith.mulf %365, %369 : vector<2x16x256xf32>
    %371 = arith.addf %363, %370 : vector<2x16x256xf32>
    %c1_i32_98 = arith.constant 1 : i32
    %372 = arith.addi %345, %c1_i32_98 : i32
    %373 = arith.index_cast %372 : i32 to index
    %c0_99 = arith.constant 0 : index
    %c0_100 = arith.constant 0 : index
    %374 = vector.load %arg6[%373, %c0_99, %c0_100] : memref<18x24x256xf32, #tpu.memory_space<vmem>>, vector<2x24x256xf32>
    %c1_i32_101 = arith.constant 1 : i32
    %375 = tpu.dynamic_rotate %374 by %c1_i32_101 dim 1 : vector<2x24x256xf32>, i32 -> vector<2x24x256xf32>
    %376 = vector.extract_strided_slice %375 {offsets = [0, 0, 0], sizes = [2, 16, 256], strides = [1, 1, 1]} : vector<2x24x256xf32> to vector<2x16x256xf32>
    %377 = vector.extract_strided_slice %8 {offsets = [3, 0], sizes = [1, 256], strides = [1, 1]} : vector<9x256xf32> to vector<1x256xf32>
    %378 = vector.shape_cast %377 : vector<1x256xf32> to vector<256xf32>
    %379 = vector.shape_cast %378 : vector<256xf32> to vector<1x1x256xf32>
    %380 = vector.broadcast %379 : vector<1x1x256xf32> to vector<2x16x256xf32>
    %381 = arith.mulf %376, %380 : vector<2x16x256xf32>
    %382 = arith.addf %371, %381 : vector<2x16x256xf32>
    %383 = vector.extract_strided_slice %374 {offsets = [0, 0, 0], sizes = [2, 16, 256], strides = [1, 1, 1]} : vector<2x24x256xf32> to vector<2x16x256xf32>
    %384 = vector.extract_strided_slice %8 {offsets = [4, 0], sizes = [1, 256], strides = [1, 1]} : vector<9x256xf32> to vector<1x256xf32>
    %385 = vector.shape_cast %384 : vector<1x256xf32> to vector<256xf32>
    %386 = vector.shape_cast %385 : vector<256xf32> to vector<1x1x256xf32>
    %387 = vector.broadcast %386 : vector<1x1x256xf32> to vector<2x16x256xf32>
    %388 = arith.mulf %383, %387 : vector<2x16x256xf32>
    %389 = arith.addf %382, %388 : vector<2x16x256xf32>
    %c23_i32_102 = arith.constant 23 : i32
    %390 = tpu.dynamic_rotate %374 by %c23_i32_102 dim 1 : vector<2x24x256xf32>, i32 -> vector<2x24x256xf32>
    %391 = vector.extract_strided_slice %390 {offsets = [0, 0, 0], sizes = [2, 16, 256], strides = [1, 1, 1]} : vector<2x24x256xf32> to vector<2x16x256xf32>
    %392 = vector.extract_strided_slice %8 {offsets = [5, 0], sizes = [1, 256], strides = [1, 1]} : vector<9x256xf32> to vector<1x256xf32>
    %393 = vector.shape_cast %392 : vector<1x256xf32> to vector<256xf32>
    %394 = vector.shape_cast %393 : vector<256xf32> to vector<1x1x256xf32>
    %395 = vector.broadcast %394 : vector<1x1x256xf32> to vector<2x16x256xf32>
    %396 = arith.mulf %391, %395 : vector<2x16x256xf32>
    %397 = arith.addf %389, %396 : vector<2x16x256xf32>
    %c2_i32_103 = arith.constant 2 : i32
    %398 = arith.addi %345, %c2_i32_103 : i32
    %399 = arith.index_cast %398 : i32 to index
    %c0_104 = arith.constant 0 : index
    %c0_105 = arith.constant 0 : index
    %400 = vector.load %arg6[%399, %c0_104, %c0_105] : memref<18x24x256xf32, #tpu.memory_space<vmem>>, vector<2x24x256xf32>
    %c1_i32_106 = arith.constant 1 : i32
    %401 = tpu.dynamic_rotate %400 by %c1_i32_106 dim 1 : vector<2x24x256xf32>, i32 -> vector<2x24x256xf32>
    %402 = vector.extract_strided_slice %401 {offsets = [0, 0, 0], sizes = [2, 16, 256], strides = [1, 1, 1]} : vector<2x24x256xf32> to vector<2x16x256xf32>
    %403 = vector.extract_strided_slice %8 {offsets = [6, 0], sizes = [1, 256], strides = [1, 1]} : vector<9x256xf32> to vector<1x256xf32>
    %404 = vector.shape_cast %403 : vector<1x256xf32> to vector<256xf32>
    %405 = vector.shape_cast %404 : vector<256xf32> to vector<1x1x256xf32>
    %406 = vector.broadcast %405 : vector<1x1x256xf32> to vector<2x16x256xf32>
    %407 = arith.mulf %402, %406 : vector<2x16x256xf32>
    %408 = arith.addf %397, %407 : vector<2x16x256xf32>
    %409 = vector.extract_strided_slice %400 {offsets = [0, 0, 0], sizes = [2, 16, 256], strides = [1, 1, 1]} : vector<2x24x256xf32> to vector<2x16x256xf32>
    %410 = vector.extract_strided_slice %8 {offsets = [7, 0], sizes = [1, 256], strides = [1, 1]} : vector<9x256xf32> to vector<1x256xf32>
    %411 = vector.shape_cast %410 : vector<1x256xf32> to vector<256xf32>
    %412 = vector.shape_cast %411 : vector<256xf32> to vector<1x1x256xf32>
    %413 = vector.broadcast %412 : vector<1x1x256xf32> to vector<2x16x256xf32>
    %414 = arith.mulf %409, %413 : vector<2x16x256xf32>
    %415 = arith.addf %408, %414 : vector<2x16x256xf32>
    %c23_i32_107 = arith.constant 23 : i32
    %416 = tpu.dynamic_rotate %400 by %c23_i32_107 dim 1 : vector<2x24x256xf32>, i32 -> vector<2x24x256xf32>
    %417 = vector.extract_strided_slice %416 {offsets = [0, 0, 0], sizes = [2, 16, 256], strides = [1, 1, 1]} : vector<2x24x256xf32> to vector<2x16x256xf32>
    %418 = vector.extract_strided_slice %8 {offsets = [8, 0], sizes = [1, 256], strides = [1, 1]} : vector<9x256xf32> to vector<1x256xf32>
    %419 = vector.shape_cast %418 : vector<1x256xf32> to vector<256xf32>
    %420 = vector.shape_cast %419 : vector<256xf32> to vector<1x1x256xf32>
    %421 = vector.broadcast %420 : vector<1x1x256xf32> to vector<2x16x256xf32>
    %422 = arith.mulf %417, %421 : vector<2x16x256xf32>
    %423 = arith.addf %415, %422 : vector<2x16x256xf32>
    %c0_108 = arith.constant 0 : index
    %424 = arith.index_cast %345 : i32 to index
    %c0_109 = arith.constant 0 : index
    %c0_110 = arith.constant 0 : index
    %425 = vector.load %arg5[%c0_108, %424, %c0_109, %c0_110] : memref<1x16x16x256xf32, #tpu.memory_space<vmem>>, vector<1x2x16x256xf32>
    %426 = vector.shape_cast %425 : vector<1x2x16x256xf32> to vector<2x16x256xf32>
    %427 = vector.shape_cast %423 : vector<2x16x256xf32> to vector<1x2x16x256xf32>
    tpu.vector_store %arg5[%c0_108, %424, %c0_109, %c0_110], %427 {strides = array<i32>} : memref<1x16x16x256xf32, #tpu.memory_space<vmem>>, vector<1x2x16x256xf32>,
    %c5_i32 = arith.constant 5 : i32
    %c2_i32_111 = arith.constant 2 : i32
    %428 = arith.muli %c5_i32, %c2_i32_111 : i32
    %c0_i32_112 = arith.constant 0 : i32
    %429 = arith.addi %428, %c0_i32_112 : i32
    %430 = arith.index_cast %429 : i32 to index
    %c0_113 = arith.constant 0 : index
    %c0_114 = arith.constant 0 : index
    %431 = vector.load %arg6[%430, %c0_113, %c0_114] : memref<18x24x256xf32, #tpu.memory_space<vmem>>, vector<2x24x256xf32>
    %c1_i32_115 = arith.constant 1 : i32
    %432 = tpu.dynamic_rotate %431 by %c1_i32_115 dim 1 : vector<2x24x256xf32>, i32 -> vector<2x24x256xf32>
    %433 = vector.extract_strided_slice %432 {offsets = [0, 0, 0], sizes = [2, 16, 256], strides = [1, 1, 1]} : vector<2x24x256xf32> to vector<2x16x256xf32>
    %434 = vector.extract_strided_slice %8 {offsets = [0, 0], sizes = [1, 256], strides = [1, 1]} : vector<9x256xf32> to vector<1x256xf32>
    %435 = vector.shape_cast %434 : vector<1x256xf32> to vector<256xf32>
    %436 = vector.shape_cast %435 : vector<256xf32> to vector<1x1x256xf32>
    %437 = vector.broadcast %436 : vector<1x1x256xf32> to vector<2x16x256xf32>
    %438 = arith.mulf %433, %437 : vector<2x16x256xf32>
    %439 = arith.addf %12, %438 : vector<2x16x256xf32>
    %440 = vector.extract_strided_slice %431 {offsets = [0, 0, 0], sizes = [2, 16, 256], strides = [1, 1, 1]} : vector<2x24x256xf32> to vector<2x16x256xf32>
    %441 = vector.extract_strided_slice %8 {offsets = [1, 0], sizes = [1, 256], strides = [1, 1]} : vector<9x256xf32> to vector<1x256xf32>
    %442 = vector.shape_cast %441 : vector<1x256xf32> to vector<256xf32>
    %443 = vector.shape_cast %442 : vector<256xf32> to vector<1x1x256xf32>
    %444 = vector.broadcast %443 : vector<1x1x256xf32> to vector<2x16x256xf32>
    %445 = arith.mulf %440, %444 : vector<2x16x256xf32>
    %446 = arith.addf %439, %445 : vector<2x16x256xf32>
    %c23_i32_116 = arith.constant 23 : i32
    %447 = tpu.dynamic_rotate %431 by %c23_i32_116 dim 1 : vector<2x24x256xf32>, i32 -> vector<2x24x256xf32>
    %448 = vector.extract_strided_slice %447 {offsets = [0, 0, 0], sizes = [2, 16, 256], strides = [1, 1, 1]} : vector<2x24x256xf32> to vector<2x16x256xf32>
    %449 = vector.extract_strided_slice %8 {offsets = [2, 0], sizes = [1, 256], strides = [1, 1]} : vector<9x256xf32> to vector<1x256xf32>
    %450 = vector.shape_cast %449 : vector<1x256xf32> to vector<256xf32>
    %451 = vector.shape_cast %450 : vector<256xf32> to vector<1x1x256xf32>
    %452 = vector.broadcast %451 : vector<1x1x256xf32> to vector<2x16x256xf32>
    %453 = arith.mulf %448, %452 : vector<2x16x256xf32>
    %454 = arith.addf %446, %453 : vector<2x16x256xf32>
    %c1_i32_117 = arith.constant 1 : i32
    %455 = arith.addi %428, %c1_i32_117 : i32
    %456 = arith.index_cast %455 : i32 to index
    %c0_118 = arith.constant 0 : index
    %c0_119 = arith.constant 0 : index
    %457 = vector.load %arg6[%456, %c0_118, %c0_119] : memref<18x24x256xf32, #tpu.memory_space<vmem>>, vector<2x24x256xf32>
    %c1_i32_120 = arith.constant 1 : i32
    %458 = tpu.dynamic_rotate %457 by %c1_i32_120 dim 1 : vector<2x24x256xf32>, i32 -> vector<2x24x256xf32>
    %459 = vector.extract_strided_slice %458 {offsets = [0, 0, 0], sizes = [2, 16, 256], strides = [1, 1, 1]} : vector<2x24x256xf32> to vector<2x16x256xf32>
    %460 = vector.extract_strided_slice %8 {offsets = [3, 0], sizes = [1, 256], strides = [1, 1]} : vector<9x256xf32> to vector<1x256xf32>
    %461 = vector.shape_cast %460 : vector<1x256xf32> to vector<256xf32>
    %462 = vector.shape_cast %461 : vector<256xf32> to vector<1x1x256xf32>
    %463 = vector.broadcast %462 : vector<1x1x256xf32> to vector<2x16x256xf32>
    %464 = arith.mulf %459, %463 : vector<2x16x256xf32>
    %465 = arith.addf %454, %464 : vector<2x16x256xf32>
    %466 = vector.extract_strided_slice %457 {offsets = [0, 0, 0], sizes = [2, 16, 256], strides = [1, 1, 1]} : vector<2x24x256xf32> to vector<2x16x256xf32>
    %467 = vector.extract_strided_slice %8 {offsets = [4, 0], sizes = [1, 256], strides = [1, 1]} : vector<9x256xf32> to vector<1x256xf32>
    %468 = vector.shape_cast %467 : vector<1x256xf32> to vector<256xf32>
    %469 = vector.shape_cast %468 : vector<256xf32> to vector<1x1x256xf32>
    %470 = vector.broadcast %469 : vector<1x1x256xf32> to vector<2x16x256xf32>
    %471 = arith.mulf %466, %470 : vector<2x16x256xf32>
    %472 = arith.addf %465, %471 : vector<2x16x256xf32>
    %c23_i32_121 = arith.constant 23 : i32
    %473 = tpu.dynamic_rotate %457 by %c23_i32_121 dim 1 : vector<2x24x256xf32>, i32 -> vector<2x24x256xf32>
    %474 = vector.extract_strided_slice %473 {offsets = [0, 0, 0], sizes = [2, 16, 256], strides = [1, 1, 1]} : vector<2x24x256xf32> to vector<2x16x256xf32>
    %475 = vector.extract_strided_slice %8 {offsets = [5, 0], sizes = [1, 256], strides = [1, 1]} : vector<9x256xf32> to vector<1x256xf32>
    %476 = vector.shape_cast %475 : vector<1x256xf32> to vector<256xf32>
    %477 = vector.shape_cast %476 : vector<256xf32> to vector<1x1x256xf32>
    %478 = vector.broadcast %477 : vector<1x1x256xf32> to vector<2x16x256xf32>
    %479 = arith.mulf %474, %478 : vector<2x16x256xf32>
    %480 = arith.addf %472, %479 : vector<2x16x256xf32>
    %c2_i32_122 = arith.constant 2 : i32
    %481 = arith.addi %428, %c2_i32_122 : i32
    %482 = arith.index_cast %481 : i32 to index
    %c0_123 = arith.constant 0 : index
    %c0_124 = arith.constant 0 : index
    %483 = vector.load %arg6[%482, %c0_123, %c0_124] : memref<18x24x256xf32, #tpu.memory_space<vmem>>, vector<2x24x256xf32>
    %c1_i32_125 = arith.constant 1 : i32
    %484 = tpu.dynamic_rotate %483 by %c1_i32_125 dim 1 : vector<2x24x256xf32>, i32 -> vector<2x24x256xf32>
    %485 = vector.extract_strided_slice %484 {offsets = [0, 0, 0], sizes = [2, 16, 256], strides = [1, 1, 1]} : vector<2x24x256xf32> to vector<2x16x256xf32>
    %486 = vector.extract_strided_slice %8 {offsets = [6, 0], sizes = [1, 256], strides = [1, 1]} : vector<9x256xf32> to vector<1x256xf32>
    %487 = vector.shape_cast %486 : vector<1x256xf32> to vector<256xf32>
    %488 = vector.shape_cast %487 : vector<256xf32> to vector<1x1x256xf32>
    %489 = vector.broadcast %488 : vector<1x1x256xf32> to vector<2x16x256xf32>
    %490 = arith.mulf %485, %489 : vector<2x16x256xf32>
    %491 = arith.addf %480, %490 : vector<2x16x256xf32>
    %492 = vector.extract_strided_slice %483 {offsets = [0, 0, 0], sizes = [2, 16, 256], strides = [1, 1, 1]} : vector<2x24x256xf32> to vector<2x16x256xf32>
    %493 = vector.extract_strided_slice %8 {offsets = [7, 0], sizes = [1, 256], strides = [1, 1]} : vector<9x256xf32> to vector<1x256xf32>
    %494 = vector.shape_cast %493 : vector<1x256xf32> to vector<256xf32>
    %495 = vector.shape_cast %494 : vector<256xf32> to vector<1x1x256xf32>
    %496 = vector.broadcast %495 : vector<1x1x256xf32> to vector<2x16x256xf32>
    %497 = arith.mulf %492, %496 : vector<2x16x256xf32>
    %498 = arith.addf %491, %497 : vector<2x16x256xf32>
    %c23_i32_126 = arith.constant 23 : i32
    %499 = tpu.dynamic_rotate %483 by %c23_i32_126 dim 1 : vector<2x24x256xf32>, i32 -> vector<2x24x256xf32>
    %500 = vector.extract_strided_slice %499 {offsets = [0, 0, 0], sizes = [2, 16, 256], strides = [1, 1, 1]} : vector<2x24x256xf32> to vector<2x16x256xf32>
    %501 = vector.extract_strided_slice %8 {offsets = [8, 0], sizes = [1, 256], strides = [1, 1]} : vector<9x256xf32> to vector<1x256xf32>
    %502 = vector.shape_cast %501 : vector<1x256xf32> to vector<256xf32>
    %503 = vector.shape_cast %502 : vector<256xf32> to vector<1x1x256xf32>
    %504 = vector.broadcast %503 : vector<1x1x256xf32> to vector<2x16x256xf32>
    %505 = arith.mulf %500, %504 : vector<2x16x256xf32>
    %506 = arith.addf %498, %505 : vector<2x16x256xf32>
    %c0_127 = arith.constant 0 : index
    %507 = arith.index_cast %428 : i32 to index
    %c0_128 = arith.constant 0 : index
    %c0_129 = arith.constant 0 : index
    %508 = vector.load %arg5[%c0_127, %507, %c0_128, %c0_129] : memref<1x16x16x256xf32, #tpu.memory_space<vmem>>, vector<1x2x16x256xf32>
    %509 = vector.shape_cast %508 : vector<1x2x16x256xf32> to vector<2x16x256xf32>
    %510 = vector.shape_cast %506 : vector<2x16x256xf32> to vector<1x2x16x256xf32>
    tpu.vector_store %arg5[%c0_127, %507, %c0_128, %c0_129], %510 {strides = array<i32>} : memref<1x16x16x256xf32, #tpu.memory_space<vmem>>, vector<1x2x16x256xf32>,
    %c6_i32 = arith.constant 6 : i32
    %c2_i32_130 = arith.constant 2 : i32
    %511 = arith.muli %c6_i32, %c2_i32_130 : i32
    %c0_i32_131 = arith.constant 0 : i32
    %512 = arith.addi %511, %c0_i32_131 : i32
    %513 = arith.index_cast %512 : i32 to index
    %c0_132 = arith.constant 0 : index
    %c0_133 = arith.constant 0 : index
    %514 = vector.load %arg6[%513, %c0_132, %c0_133] : memref<18x24x256xf32, #tpu.memory_space<vmem>>, vector<2x24x256xf32>
    %c1_i32_134 = arith.constant 1 : i32
    %515 = tpu.dynamic_rotate %514 by %c1_i32_134 dim 1 : vector<2x24x256xf32>, i32 -> vector<2x24x256xf32>
    %516 = vector.extract_strided_slice %515 {offsets = [0, 0, 0], sizes = [2, 16, 256], strides = [1, 1, 1]} : vector<2x24x256xf32> to vector<2x16x256xf32>
    %517 = vector.extract_strided_slice %8 {offsets = [0, 0], sizes = [1, 256], strides = [1, 1]} : vector<9x256xf32> to vector<1x256xf32>
    %518 = vector.shape_cast %517 : vector<1x256xf32> to vector<256xf32>
    %519 = vector.shape_cast %518 : vector<256xf32> to vector<1x1x256xf32>
    %520 = vector.broadcast %519 : vector<1x1x256xf32> to vector<2x16x256xf32>
    %521 = arith.mulf %516, %520 : vector<2x16x256xf32>
    %522 = arith.addf %12, %521 : vector<2x16x256xf32>
    %523 = vector.extract_strided_slice %514 {offsets = [0, 0, 0], sizes = [2, 16, 256], strides = [1, 1, 1]} : vector<2x24x256xf32> to vector<2x16x256xf32>
    %524 = vector.extract_strided_slice %8 {offsets = [1, 0], sizes = [1, 256], strides = [1, 1]} : vector<9x256xf32> to vector<1x256xf32>
    %525 = vector.shape_cast %524 : vector<1x256xf32> to vector<256xf32>
    %526 = vector.shape_cast %525 : vector<256xf32> to vector<1x1x256xf32>
    %527 = vector.broadcast %526 : vector<1x1x256xf32> to vector<2x16x256xf32>
    %528 = arith.mulf %523, %527 : vector<2x16x256xf32>
    %529 = arith.addf %522, %528 : vector<2x16x256xf32>
    %c23_i32_135 = arith.constant 23 : i32
    %530 = tpu.dynamic_rotate %514 by %c23_i32_135 dim 1 : vector<2x24x256xf32>, i32 -> vector<2x24x256xf32>
    %531 = vector.extract_strided_slice %530 {offsets = [0, 0, 0], sizes = [2, 16, 256], strides = [1, 1, 1]} : vector<2x24x256xf32> to vector<2x16x256xf32>
    %532 = vector.extract_strided_slice %8 {offsets = [2, 0], sizes = [1, 256], strides = [1, 1]} : vector<9x256xf32> to vector<1x256xf32>
    %533 = vector.shape_cast %532 : vector<1x256xf32> to vector<256xf32>
    %534 = vector.shape_cast %533 : vector<256xf32> to vector<1x1x256xf32>
    %535 = vector.broadcast %534 : vector<1x1x256xf32> to vector<2x16x256xf32>
    %536 = arith.mulf %531, %535 : vector<2x16x256xf32>
    %537 = arith.addf %529, %536 : vector<2x16x256xf32>
    %c1_i32_136 = arith.constant 1 : i32
    %538 = arith.addi %511, %c1_i32_136 : i32
    %539 = arith.index_cast %538 : i32 to index
    %c0_137 = arith.constant 0 : index
    %c0_138 = arith.constant 0 : index
    %540 = vector.load %arg6[%539, %c0_137, %c0_138] : memref<18x24x256xf32, #tpu.memory_space<vmem>>, vector<2x24x256xf32>
    %c1_i32_139 = arith.constant 1 : i32
    %541 = tpu.dynamic_rotate %540 by %c1_i32_139 dim 1 : vector<2x24x256xf32>, i32 -> vector<2x24x256xf32>
    %542 = vector.extract_strided_slice %541 {offsets = [0, 0, 0], sizes = [2, 16, 256], strides = [1, 1, 1]} : vector<2x24x256xf32> to vector<2x16x256xf32>
    %543 = vector.extract_strided_slice %8 {offsets = [3, 0], sizes = [1, 256], strides = [1, 1]} : vector<9x256xf32> to vector<1x256xf32>
    %544 = vector.shape_cast %543 : vector<1x256xf32> to vector<256xf32>
    %545 = vector.shape_cast %544 : vector<256xf32> to vector<1x1x256xf32>
    %546 = vector.broadcast %545 : vector<1x1x256xf32> to vector<2x16x256xf32>
    %547 = arith.mulf %542, %546 : vector<2x16x256xf32>
    %548 = arith.addf %537, %547 : vector<2x16x256xf32>
    %549 = vector.extract_strided_slice %540 {offsets = [0, 0, 0], sizes = [2, 16, 256], strides = [1, 1, 1]} : vector<2x24x256xf32> to vector<2x16x256xf32>
    %550 = vector.extract_strided_slice %8 {offsets = [4, 0], sizes = [1, 256], strides = [1, 1]} : vector<9x256xf32> to vector<1x256xf32>
    %551 = vector.shape_cast %550 : vector<1x256xf32> to vector<256xf32>
    %552 = vector.shape_cast %551 : vector<256xf32> to vector<1x1x256xf32>
    %553 = vector.broadcast %552 : vector<1x1x256xf32> to vector<2x16x256xf32>
    %554 = arith.mulf %549, %553 : vector<2x16x256xf32>
    %555 = arith.addf %548, %554 : vector<2x16x256xf32>
    %c23_i32_140 = arith.constant 23 : i32
    %556 = tpu.dynamic_rotate %540 by %c23_i32_140 dim 1 : vector<2x24x256xf32>, i32 -> vector<2x24x256xf32>
    %557 = vector.extract_strided_slice %556 {offsets = [0, 0, 0], sizes = [2, 16, 256], strides = [1, 1, 1]} : vector<2x24x256xf32> to vector<2x16x256xf32>
    %558 = vector.extract_strided_slice %8 {offsets = [5, 0], sizes = [1, 256], strides = [1, 1]} : vector<9x256xf32> to vector<1x256xf32>
    %559 = vector.shape_cast %558 : vector<1x256xf32> to vector<256xf32>
    %560 = vector.shape_cast %559 : vector<256xf32> to vector<1x1x256xf32>
    %561 = vector.broadcast %560 : vector<1x1x256xf32> to vector<2x16x256xf32>
    %562 = arith.mulf %557, %561 : vector<2x16x256xf32>
    %563 = arith.addf %555, %562 : vector<2x16x256xf32>
    %c2_i32_141 = arith.constant 2 : i32
    %564 = arith.addi %511, %c2_i32_141 : i32
    %565 = arith.index_cast %564 : i32 to index
    %c0_142 = arith.constant 0 : index
    %c0_143 = arith.constant 0 : index
    %566 = vector.load %arg6[%565, %c0_142, %c0_143] : memref<18x24x256xf32, #tpu.memory_space<vmem>>, vector<2x24x256xf32>
    %c1_i32_144 = arith.constant 1 : i32
    %567 = tpu.dynamic_rotate %566 by %c1_i32_144 dim 1 : vector<2x24x256xf32>, i32 -> vector<2x24x256xf32>
    %568 = vector.extract_strided_slice %567 {offsets = [0, 0, 0], sizes = [2, 16, 256], strides = [1, 1, 1]} : vector<2x24x256xf32> to vector<2x16x256xf32>
    %569 = vector.extract_strided_slice %8 {offsets = [6, 0], sizes = [1, 256], strides = [1, 1]} : vector<9x256xf32> to vector<1x256xf32>
    %570 = vector.shape_cast %569 : vector<1x256xf32> to vector<256xf32>
    %571 = vector.shape_cast %570 : vector<256xf32> to vector<1x1x256xf32>
    %572 = vector.broadcast %571 : vector<1x1x256xf32> to vector<2x16x256xf32>
    %573 = arith.mulf %568, %572 : vector<2x16x256xf32>
    %574 = arith.addf %563, %573 : vector<2x16x256xf32>
    %575 = vector.extract_strided_slice %566 {offsets = [0, 0, 0], sizes = [2, 16, 256], strides = [1, 1, 1]} : vector<2x24x256xf32> to vector<2x16x256xf32>
    %576 = vector.extract_strided_slice %8 {offsets = [7, 0], sizes = [1, 256], strides = [1, 1]} : vector<9x256xf32> to vector<1x256xf32>
    %577 = vector.shape_cast %576 : vector<1x256xf32> to vector<256xf32>
    %578 = vector.shape_cast %577 : vector<256xf32> to vector<1x1x256xf32>
    %579 = vector.broadcast %578 : vector<1x1x256xf32> to vector<2x16x256xf32>
    %580 = arith.mulf %575, %579 : vector<2x16x256xf32>
    %581 = arith.addf %574, %580 : vector<2x16x256xf32>
    %c23_i32_145 = arith.constant 23 : i32
    %582 = tpu.dynamic_rotate %566 by %c23_i32_145 dim 1 : vector<2x24x256xf32>, i32 -> vector<2x24x256xf32>
    %583 = vector.extract_strided_slice %582 {offsets = [0, 0, 0], sizes = [2, 16, 256], strides = [1, 1, 1]} : vector<2x24x256xf32> to vector<2x16x256xf32>
    %584 = vector.extract_strided_slice %8 {offsets = [8, 0], sizes = [1, 256], strides = [1, 1]} : vector<9x256xf32> to vector<1x256xf32>
    %585 = vector.shape_cast %584 : vector<1x256xf32> to vector<256xf32>
    %586 = vector.shape_cast %585 : vector<256xf32> to vector<1x1x256xf32>
    %587 = vector.broadcast %586 : vector<1x1x256xf32> to vector<2x16x256xf32>
    %588 = arith.mulf %583, %587 : vector<2x16x256xf32>
    %589 = arith.addf %581, %588 : vector<2x16x256xf32>
    %c0_146 = arith.constant 0 : index
    %590 = arith.index_cast %511 : i32 to index
    %c0_147 = arith.constant 0 : index
    %c0_148 = arith.constant 0 : index
    %591 = vector.load %arg5[%c0_146, %590, %c0_147, %c0_148] : memref<1x16x16x256xf32, #tpu.memory_space<vmem>>, vector<1x2x16x256xf32>
    %592 = vector.shape_cast %591 : vector<1x2x16x256xf32> to vector<2x16x256xf32>
    %593 = vector.shape_cast %589 : vector<2x16x256xf32> to vector<1x2x16x256xf32>
    tpu.vector_store %arg5[%c0_146, %590, %c0_147, %c0_148], %593 {strides = array<i32>} : memref<1x16x16x256xf32, #tpu.memory_space<vmem>>, vector<1x2x16x256xf32>,
    %c7_i32 = arith.constant 7 : i32
    %c2_i32_149 = arith.constant 2 : i32
    %594 = arith.muli %c7_i32, %c2_i32_149 : i32
    %c0_i32_150 = arith.constant 0 : i32
    %595 = arith.addi %594, %c0_i32_150 : i32
    %596 = arith.index_cast %595 : i32 to index
    %c0_151 = arith.constant 0 : index
    %c0_152 = arith.constant 0 : index
    %597 = vector.load %arg6[%596, %c0_151, %c0_152] : memref<18x24x256xf32, #tpu.memory_space<vmem>>, vector<2x24x256xf32>
    %c1_i32_153 = arith.constant 1 : i32
    %598 = tpu.dynamic_rotate %597 by %c1_i32_153 dim 1 : vector<2x24x256xf32>, i32 -> vector<2x24x256xf32>
    %599 = vector.extract_strided_slice %598 {offsets = [0, 0, 0], sizes = [2, 16, 256], strides = [1, 1, 1]} : vector<2x24x256xf32> to vector<2x16x256xf32>
    %600 = vector.extract_strided_slice %8 {offsets = [0, 0], sizes = [1, 256], strides = [1, 1]} : vector<9x256xf32> to vector<1x256xf32>
    %601 = vector.shape_cast %600 : vector<1x256xf32> to vector<256xf32>
    %602 = vector.shape_cast %601 : vector<256xf32> to vector<1x1x256xf32>
    %603 = vector.broadcast %602 : vector<1x1x256xf32> to vector<2x16x256xf32>
    %604 = arith.mulf %599, %603 : vector<2x16x256xf32>
    %605 = arith.addf %12, %604 : vector<2x16x256xf32>
    %606 = vector.extract_strided_slice %597 {offsets = [0, 0, 0], sizes = [2, 16, 256], strides = [1, 1, 1]} : vector<2x24x256xf32> to vector<2x16x256xf32>
    %607 = vector.extract_strided_slice %8 {offsets = [1, 0], sizes = [1, 256], strides = [1, 1]} : vector<9x256xf32> to vector<1x256xf32>
    %608 = vector.shape_cast %607 : vector<1x256xf32> to vector<256xf32>
    %609 = vector.shape_cast %608 : vector<256xf32> to vector<1x1x256xf32>
    %610 = vector.broadcast %609 : vector<1x1x256xf32> to vector<2x16x256xf32>
    %611 = arith.mulf %606, %610 : vector<2x16x256xf32>
    %612 = arith.addf %605, %611 : vector<2x16x256xf32>
    %c23_i32_154 = arith.constant 23 : i32
    %613 = tpu.dynamic_rotate %597 by %c23_i32_154 dim 1 : vector<2x24x256xf32>, i32 -> vector<2x24x256xf32>
    %614 = vector.extract_strided_slice %613 {offsets = [0, 0, 0], sizes = [2, 16, 256], strides = [1, 1, 1]} : vector<2x24x256xf32> to vector<2x16x256xf32>
    %615 = vector.extract_strided_slice %8 {offsets = [2, 0], sizes = [1, 256], strides = [1, 1]} : vector<9x256xf32> to vector<1x256xf32>
    %616 = vector.shape_cast %615 : vector<1x256xf32> to vector<256xf32>
    %617 = vector.shape_cast %616 : vector<256xf32> to vector<1x1x256xf32>
    %618 = vector.broadcast %617 : vector<1x1x256xf32> to vector<2x16x256xf32>
    %619 = arith.mulf %614, %618 : vector<2x16x256xf32>
    %620 = arith.addf %612, %619 : vector<2x16x256xf32>
    %c1_i32_155 = arith.constant 1 : i32
    %621 = arith.addi %594, %c1_i32_155 : i32
    %622 = arith.index_cast %621 : i32 to index
    %c0_156 = arith.constant 0 : index
    %c0_157 = arith.constant 0 : index
    %623 = vector.load %arg6[%622, %c0_156, %c0_157] : memref<18x24x256xf32, #tpu.memory_space<vmem>>, vector<2x24x256xf32>
    %c1_i32_158 = arith.constant 1 : i32
    %624 = tpu.dynamic_rotate %623 by %c1_i32_158 dim 1 : vector<2x24x256xf32>, i32 -> vector<2x24x256xf32>
    %625 = vector.extract_strided_slice %624 {offsets = [0, 0, 0], sizes = [2, 16, 256], strides = [1, 1, 1]} : vector<2x24x256xf32> to vector<2x16x256xf32>
    %626 = vector.extract_strided_slice %8 {offsets = [3, 0], sizes = [1, 256], strides = [1, 1]} : vector<9x256xf32> to vector<1x256xf32>
    %627 = vector.shape_cast %626 : vector<1x256xf32> to vector<256xf32>
    %628 = vector.shape_cast %627 : vector<256xf32> to vector<1x1x256xf32>
    %629 = vector.broadcast %628 : vector<1x1x256xf32> to vector<2x16x256xf32>
    %630 = arith.mulf %625, %629 : vector<2x16x256xf32>
    %631 = arith.addf %620, %630 : vector<2x16x256xf32>
    %632 = vector.extract_strided_slice %623 {offsets = [0, 0, 0], sizes = [2, 16, 256], strides = [1, 1, 1]} : vector<2x24x256xf32> to vector<2x16x256xf32>
    %633 = vector.extract_strided_slice %8 {offsets = [4, 0], sizes = [1, 256], strides = [1, 1]} : vector<9x256xf32> to vector<1x256xf32>
    %634 = vector.shape_cast %633 : vector<1x256xf32> to vector<256xf32>
    %635 = vector.shape_cast %634 : vector<256xf32> to vector<1x1x256xf32>
    %636 = vector.broadcast %635 : vector<1x1x256xf32> to vector<2x16x256xf32>
    %637 = arith.mulf %632, %636 : vector<2x16x256xf32>
    %638 = arith.addf %631, %637 : vector<2x16x256xf32>
    %c23_i32_159 = arith.constant 23 : i32
    %639 = tpu.dynamic_rotate %623 by %c23_i32_159 dim 1 : vector<2x24x256xf32>, i32 -> vector<2x24x256xf32>
    %640 = vector.extract_strided_slice %639 {offsets = [0, 0, 0], sizes = [2, 16, 256], strides = [1, 1, 1]} : vector<2x24x256xf32> to vector<2x16x256xf32>
    %641 = vector.extract_strided_slice %8 {offsets = [5, 0], sizes = [1, 256], strides = [1, 1]} : vector<9x256xf32> to vector<1x256xf32>
    %642 = vector.shape_cast %641 : vector<1x256xf32> to vector<256xf32>
    %643 = vector.shape_cast %642 : vector<256xf32> to vector<1x1x256xf32>
    %644 = vector.broadcast %643 : vector<1x1x256xf32> to vector<2x16x256xf32>
    %645 = arith.mulf %640, %644 : vector<2x16x256xf32>
    %646 = arith.addf %638, %645 : vector<2x16x256xf32>
    %c2_i32_160 = arith.constant 2 : i32
    %647 = arith.addi %594, %c2_i32_160 : i32
    %648 = arith.index_cast %647 : i32 to index
    %c0_161 = arith.constant 0 : index
    %c0_162 = arith.constant 0 : index
    %649 = vector.load %arg6[%648, %c0_161, %c0_162] : memref<18x24x256xf32, #tpu.memory_space<vmem>>, vector<2x24x256xf32>
    %c1_i32_163 = arith.constant 1 : i32
    %650 = tpu.dynamic_rotate %649 by %c1_i32_163 dim 1 : vector<2x24x256xf32>, i32 -> vector<2x24x256xf32>
    %651 = vector.extract_strided_slice %650 {offsets = [0, 0, 0], sizes = [2, 16, 256], strides = [1, 1, 1]} : vector<2x24x256xf32> to vector<2x16x256xf32>
    %652 = vector.extract_strided_slice %8 {offsets = [6, 0], sizes = [1, 256], strides = [1, 1]} : vector<9x256xf32> to vector<1x256xf32>
    %653 = vector.shape_cast %652 : vector<1x256xf32> to vector<256xf32>
    %654 = vector.shape_cast %653 : vector<256xf32> to vector<1x1x256xf32>
    %655 = vector.broadcast %654 : vector<1x1x256xf32> to vector<2x16x256xf32>
    %656 = arith.mulf %651, %655 : vector<2x16x256xf32>
    %657 = arith.addf %646, %656 : vector<2x16x256xf32>
    %658 = vector.extract_strided_slice %649 {offsets = [0, 0, 0], sizes = [2, 16, 256], strides = [1, 1, 1]} : vector<2x24x256xf32> to vector<2x16x256xf32>
    %659 = vector.extract_strided_slice %8 {offsets = [7, 0], sizes = [1, 256], strides = [1, 1]} : vector<9x256xf32> to vector<1x256xf32>
    %660 = vector.shape_cast %659 : vector<1x256xf32> to vector<256xf32>
    %661 = vector.shape_cast %660 : vector<256xf32> to vector<1x1x256xf32>
    %662 = vector.broadcast %661 : vector<1x1x256xf32> to vector<2x16x256xf32>
    %663 = arith.mulf %658, %662 : vector<2x16x256xf32>
    %664 = arith.addf %657, %663 : vector<2x16x256xf32>
    %c23_i32_164 = arith.constant 23 : i32
    %665 = tpu.dynamic_rotate %649 by %c23_i32_164 dim 1 : vector<2x24x256xf32>, i32 -> vector<2x24x256xf32>
    %666 = vector.extract_strided_slice %665 {offsets = [0, 0, 0], sizes = [2, 16, 256], strides = [1, 1, 1]} : vector<2x24x256xf32> to vector<2x16x256xf32>
    %667 = vector.extract_strided_slice %8 {offsets = [8, 0], sizes = [1, 256], strides = [1, 1]} : vector<9x256xf32> to vector<1x256xf32>
    %668 = vector.shape_cast %667 : vector<1x256xf32> to vector<256xf32>
    %669 = vector.shape_cast %668 : vector<256xf32> to vector<1x1x256xf32>
    %670 = vector.broadcast %669 : vector<1x1x256xf32> to vector<2x16x256xf32>
    %671 = arith.mulf %666, %670 : vector<2x16x256xf32>
    %672 = arith.addf %664, %671 : vector<2x16x256xf32>
    %c0_165 = arith.constant 0 : index
    %673 = arith.index_cast %594 : i32 to index
    %c0_166 = arith.constant 0 : index
    %c0_167 = arith.constant 0 : index
    %674 = vector.load %arg5[%c0_165, %673, %c0_166, %c0_167] : memref<1x16x16x256xf32, #tpu.memory_space<vmem>>, vector<1x2x16x256xf32>
    %675 = vector.shape_cast %674 : vector<1x2x16x256xf32> to vector<2x16x256xf32>
    %676 = vector.shape_cast %672 : vector<2x16x256xf32> to vector<1x2x16x256xf32>
    tpu.vector_store %arg5[%c0_165, %673, %c0_166, %c0_167], %676 {strides = array<i32>} : memref<1x16x16x256xf32, #tpu.memory_space<vmem>>, vector<1x2x16x256xf32>,
    %c8_i32 = arith.constant 8 : i32
    return
  }
  func.func @transform_0(%arg0: i32, %arg1: i32) -> (i32, i32, i32, i32) {
    %c0_i32 = arith.constant 0 : i32
    %c0_i32_0 = arith.constant 0 : i32
    %c0_i32_1 = arith.constant 0 : i32
    return %arg0, %c0_i32, %c0_i32_0, %arg1 : i32, i32, i32, i32
  }
  func.func @transform_1(%arg0: i32, %arg1: i32) -> (i32, i32) {
    %c0_i32 = arith.constant 0 : i32
    %c0_i32_0 = arith.constant 0 : i32
    return %c0_i32, %arg1 : i32, i32
  }
  func.func @transform_2(%arg0: i32, %arg1: i32) -> (i32, i32) {
    %c0_i32 = arith.constant 0 : i32
    %c0_i32_0 = arith.constant 0 : i32
    return %c0_i32, %arg1 : i32, i32
  }
  func.func @transform_3(%arg0: i32, %arg1: i32) -> (i32, i32, i32, i32) {
    %c0_i32 = arith.constant 0 : i32
    %c0_i32_0 = arith.constant 0 : i32
    %c0_i32_1 = arith.constant 0 : i32
    return %arg0, %c0_i32, %c0_i32_0, %arg1 : i32, i32, i32, i32
  }
}

</mosaic_0001>

<bundles_post_ra>
// kernel: tpu_custom_call.1
= control target key start
LH: loop header
LB: loop body
LE: loop exit
PB: predicated region body
PF: predicated region fallthrough
CT: control target
= control target key end

     0   :  { %8 = vsyncpa [#allocation4], 0  ;;  %s5834_s0 = inlined_call_operand.hbm [shape: f32[2,16,16,256], index: 0, kind: input, shape index: {}]   ;;  %s5835_s1 = inlined_call_operand.hbm [shape: f32[9,256], index: 1, kind: input, shape index: {}]   ;;  %s5836_s2 = inlined_call_operand.vmem [shape: f32[1,256], index: 2, kind: input, shape index: {}]   ;;  %s5837_s3 = inlined_call_operand.hbm [shape: f32[2,16,16,256], index: 3, kind: output, shape index: {}]  }
   0x1   :  { %10 = vsyncpa [#allocation4 + $0x1], 0 }
   0x2   :  { %11 = vsyncpa [#allocation7], 0 }
   0x3   :  { %12 = vsyncpa [#allocation5], 0 }
   0x4   :  { %14 = vsyncpa [#allocation5 + $0x1], 0  ;;  %s3465_s12 = smov 0   ;;  %s3467_s13 = smov 0  }
   0x5   :  { %s3469_s14 = smov 0   ;;  %s3471_s15 = smov 0  }
   0x6   :  { %s3473_s16 = smov 0   ;;  %s3475_s17 = smov 0  }
   0x7 LB: > { %s3131_s18 = sadd.s32 4294967295, %s3435_s17   ;;  %s3132_s19 = sadd.s32 4294967294, %s3435_s17   ;;  %s3435_s17 = sphi %s3475_s17, %s20_s17   ;;  %s3431_s16 = sphi %s3473_s16, %s5913_s16   ;;  %s3427_s15 = sphi %s3471_s15, %s5912_s15   ;;  %s3423_s14 = sphi %s3469_s14, %s5911_s14   ;;  %s3419_s13 = sphi %s3467_s13, %s5910_s13   ;;  %s3415_s12 = sphi %s3465_s12, %s5909_s12  }
   0x8   : > { %p54_p0 = scmp.ne.s32.totalorder %s3419_s13, %s3415_s12  ;;  %p3499_p1 = scmp.eq.s32.totalorder %s3131_s18, 0 }
   0x9   : > { %p3503_p2 = scmp.eq.s32.totalorder %s3131_s18, 1  ;;  %p138_p3 = scmp.eq.s32.totalorder %s3132_s19, 1 }
   0xa   : > { %s5849_s20 = scalar_select %p3499_p1, 1, 0 }
   0xb   : > { %s5850_s21 = scalar_select %p3503_p2, 1, 0 }
   0xc   : > { %p3509_p4 = por %p3499_p1, %p54_p0  ;;  %p3133_p5 = scmp.ge.s32.totalorder %s3435_s17, 1 }
   0xd   : > { %p3514_p6 = por %p138_p3, %p54_p0  ;;  %p145_p7 = scmp.lt.s32.totalorder %s3435_s17, 3 }
   0xe   : > { %s5851_s22 = scalar_select %p3509_p4, 1, 0 }
   0xf   : > { %s5852_s23 = scalar_select %p3514_p6, 1, 0 }
  0x10   : > { %p3519_p8 = pnand %p3133_p5, %p145_p7  ;;  %s3437_s25 = smov [#allocation6]  }
  0x11   : > { %s160_s26 = sshll.u32 %s3437_s25, 4  ;;  %s32_s28 = sadd.s32 1, %s3431_s16  ;;  %s161_s26 = int_to_ptr.vmem [resolvable:$true] %s160_s26 }
  0x12   : > { %s5853_s24 = scalar_select %p3519_p8, 1, 0 }
  0x13   : > { %p3217_p9 = pneg %p3519_p8  ;;  %s3291_s4 = scalar_lea.hbm %s5835_s1, 512 }
  0x14   : > { %p3292_p12 = scmp.ne.s32.totalorder %s5835_s1, %s3291_s4  ;;  %p3298_p5 = scmp.lt.u32.totalorder %s3291_s4, %s5835_s1 }
  0x15   : > { %p3528_p11 = pnand %p3217_p9, %p3499_p1 }
  0x17   : > { %p3293_p13 = pneg %p3528_p11 }
  0x19   : > { %p3294_p0 = pnand %p3293_p13, %p3292_p12 }
  0x1b   : > { %p3295_p3 = pneg %p3294_p0 }
  0x1d   : > { %p3300_p7 = pnand %p3298_p5, %p3295_p3 }
  0x1f   : > { %3303 = shalt.err (!%p3300_p7)
}
  0x20   : > { %s3304_s9 = scalar_lea.vmem %s161_s26, 512  ;;  %p3312_p1 = scmp.lt.s32.totalorder %s161_s26, %s161_s26 }
  0x21   : > { %p3305_p9 = scmp.ne.s32.totalorder %s161_s26, %s3304_s9  ;;  %p3313_p4 = scmp.lt.s32.totalorder %s3304_s9, %s3304_s9 }
  0x23   : > { %p3307_p10 = pnand %p3305_p9, %p3293_p13  ;;  %p3314_p8 = por %p3313_p4, %p3312_p1 }
  0x25   : > { %p3308_p6 = pneg %p3307_p10 }
  0x27   : > { %p3315_p2 = pnand %p3314_p8, %p3308_p6 }
  0x29   : > { %3318 = shalt.err (!%p3315_p2)
}
  0x2a   : > { %s3438_s10 = smov 256   ;;  %s3439_s11 = smov 16  }
  0x2b   : > { %3220 = dma.hbm_to_vmem [thread:$0]  (!%p3528_p11), %s5835_s1, 512, %s161_s26, [#allocation7], %s3438_s10, %s3438_s10, %s3439_s11  }
  0x2c   : > { %p34_p1 = scmp.ge.s32.totalorder %s32_s28, 2  ;;  %s41_s25 = sadd.s32 1, %s3423_s14 }
  0x2d   : > { %p48_p2 = scmp.ne.s32.totalorder %s3423_s14, %s3419_s13  ;;  %p49_p4 = scmp.eq.s32.totalorder %s3435_s17, 0 }
  0x2e   : > { %s5915_s28 = smov (%p34_p1, %s32_s28), 0  ;;  %p5856_p8 = scmp.ne.s32.totalorder %s5850_s21, 0 }
  0x2f   : > { %p3558_p6 = por %p49_p4, %p48_p2  ;;  %s36_s30 = ssub.s32 %s3431_s16, %s5915_s28 }
  0x30   : > { %p3564_p10 = por %p5856_p8, %p48_p2  ;;  %p3230_p12 = scmp.lt.s32.totalorder %s3435_s17, 2 }
  0x31   : > { %p39_p11 = scmp.eq.s32.totalorder %s36_s30, 0  ;;  %s182_s26 = sand.u32 1, %s3423_s14  }
  0x32   : > { %s3137_s4 = sshll.u32 %s182_s26, 9  ;;  %s3207_s6 = sshll.u32 %s3431_s16, 13 }
  0x33   : > { %s3573_s5 = scalar_select %p39_p11, %s3423_s14, %s41_s25  }
  0x34   : > { %s3579_s9 = scalar_lea.hbm %s5834_s0, %s3207_s6  ;;  %s186_s21 = scalar_lea.vmem [#allocation3], %s3137_s4 }
  0x35   : > { %s195_s18 = sshll.u32 %s186_s21, 4  ;;  %p3585_p13 = pnand %p3230_p12, %p3558_p6  ;;  %s3581_s18 = int_to_ptr.vmem [resolvable:$true] %s195_s18 }
  0x36   : > { %s3589_s25 = scalar_lea.sflag [#allocation4], %s182_s26  ;;  %s3319_s30 = scalar_lea.hbm %s3579_s9, 8192 }
  0x37   : > { %p3320_p0 = scmp.ne.s32.totalorder %s3579_s9, %s3319_s30  ;;  %p3321_p3 = pneg %p3585_p13 }
  0x38   : > { %s3324_s29 = scalar_lea.hbm %s5834_s0, 16384  ;;  %p3325_p9 = scmp.lt.u32.totalorder %s3579_s9, %s5834_s0 }
  0x39   : > { %p3322_p5 = pnand %p3321_p3, %p3320_p0  ;;  %p3326_p1 = scmp.lt.u32.totalorder %s3324_s29, %s3319_s30 }
  0x3a   : > { %p3328_p4 = scmp.lt.u32.totalorder %s3319_s30, %s3579_s9 }
  0x3b   : > { %p3323_p7 = pneg %p3322_p5  ;;  %p3327_p2 = por %p3326_p1, %p3325_p9 }
  0x3d   : > { %p3329_p6 = por %p3328_p4, %p3327_p2 }
  0x3f   : > { %p3330_p8 = pnand %p3329_p6, %p3323_p7 }
  0x41   : > { %3333 = shalt.err (!%p3330_p8)
}
  0x42   : > { %s3334_s26 = scalar_lea.vmem %s3581_s18, 8192  ;;  %s3440_s21 = smov [#allocation3]  }
  0x43   : > { %p3335_p12 = scmp.ne.s32.totalorder %s3581_s18, %s3334_s26  ;;  %s3339_s4 = sshll.u32 %s3440_s21, 4  ;;  %s3340_s4 = int_to_ptr.vmem [resolvable:$false] %s3339_s4 }
  0x44   : > { %s3341_s6 = scalar_lea.vmem %s3340_s4, 16384  ;;  %p3342_p5 = scmp.lt.s32.totalorder %s3581_s18, %s3340_s4 }
  0x45   : > { %p3337_p11 = pnand %p3335_p12, %p3321_p3  ;;  %p3343_p9 = scmp.lt.s32.totalorder %s3341_s6, %s3334_s26 }
  0x47   : > { %p3338_p0 = pneg %p3337_p11  ;;  %p3344_p1 = por %p3343_p9, %p3342_p5 }
  0x49   : > { %p3345_p2 = pnand %p3344_p1, %p3338_p0 }
  0x4b   : > { %3348 = shalt.err (!%p3345_p2)
}
  0x4c   : > { %3224 = dma.hbm_to_vmem [thread:$0]  (!%p3585_p13), %s3579_s9, 8192, %s3581_s18, %s3589_s25, %s3438_s10, %s3438_s10, %s3439_s11  }
  0x4d   : > { %p5859_p3 = scmp.ne.s32.totalorder %s5853_s24, 0 }
  0x4f   : > { %207 = sbr.rel (%p5859_p3) target bundleno = 473 (0x1d9), region = 32 }
  0x56   : > { %s3623_s30 = sand.u32 1, %s3419_s13   ;;  %p5860_p7 = scmp.ne.s32.totalorder %s5851_s22, 0 }
  0x57   : > { %s3141_s29 = sshll.u32 %s3623_s30, 9  ;;  %s210_s7 = scalar_lea.sflag [#allocation4], %s3623_s30 }
  0x58   : > { %s3629_s19 = scalar_lea.vmem [#allocation3], %s3141_s29 }
  0x59   : > { %3402 = dma.done.wait (%p5860_p7), %s210_s7, 8192  }
  0x5a   : > { %3404 = vsyncadd (%p5860_p7), %s210_s7, 4294959104  ;;  %p5861_p13 = scmp.ne.s32.totalorder %s5849_s20, 0 }
  0x5c   : > { %3406 = dma.done.wait (%p5861_p13), [#allocation7], 512  }
  0x5d   : > { %3408 = vsyncadd (%p5861_p13), [#allocation7], 4294966784  ;;  %v432_v0 = vlaneseq  ;;  %v3441_v5 = vmov 0.0   ;;  %v3651_v8 = vld [vmem:[%s3629_s19] sm:$0xff]  ;;  %v3661_v12 = vld [vmem:[%s3629_s19 + $0x10] sm:$0xff]  ;;  %s3871_s24 = scalar_lea.vmem [#allocation8], %s3141_s29 }
  0x5e   : > { %v3646_v6 = vrot.slane %v3441_v5, 7  ;;  %v3648_v7 = vrot.slane %v3441_v5, 1  ;;  %v3654_v9 = vld [vmem:[%s3629_s19 + $0x20] sm:$0xff]  ;;  %v456_v14 = vrot.slane %v3651_v8, 7  ;;  %v527_v15 = vrot.slane %v3651_v8, 1  ;;  %v3709_v33 = vld [vmem:[%s3629_s19 + $0x30] sm:$0xff] }
  0x5f   : > { %v3639_v1 = vshrl.u32 %v432_v0, 7  ;;  %v426_v13 = vld [vmem:[#allocation6] sm:$0xff]  ;;  %v531_v21 = vrot.slane %v3661_v12, 1  ;;  %v584_v25 = vrot.slane %v3654_v9, 7  ;;  %v652_v37 = vrot.slane %v3654_v9, 1  ;;  %v3738_v46 = vld [vmem:[%s3629_s19 + $0x8] sm:$0xff] }
  0x60   : > { %v430_v18 = vld [vmem:[%s5836_s2] sm:$0x3]  ;;  %v656_v38 = vrot.slane %v3709_v33, 1  ;;  %v427_v47 = vld [vmem:[#allocation6 + $0x8] sm:$0xff]  ;;  %v3751_v52 = vld [vmem:[#allocation6 + $0x10] ss:$0 sm:$0xff] }
  0x61   : > { %v434_v2 = vsub.s32 0, %v3639_v1  ;;  %v3643_v3 = vsub.s32 1, %v3639_v1  ;;  %v548_v4 = vsub.s32 2, %v3639_v1  ;;  %vm468_vm0 = vcmp.lt.s32.totalorder %v3639_v1, 1  ;;  %v3771_v63 = vld [vmem:[%s3629_s19 + $0x18] sm:$0xff]  ;;  %v3774_v0 = vld [vmem:[%s3629_s19 + $0x28] sm:$0xff] }
  0x62   : > { %vm537_vm1 = vcmp.lt.s32.totalorder %v3639_v1, 7  ;;  %v604_v10 = vsub.s32 3, %v3639_v1  ;;  %v628_v11 = vsub.s32 4, %v3639_v1  ;;  %v672_v16 = vsub.s32 5, %v3639_v1  ;;  %s3208_s10 = sshll.u32 %s3427_s15, 13  ;;  %s3020_s11 = sshll.u32 %s3871_s24, 4  ;;  %s5783_s11 = int_to_ptr.vmem [resolvable:$true] %s3020_s11 }
  0x63   : > { %v729_v17 = vsub.s32 6, %v3639_v1  ;;  %v3670_v19 = vrot.slane %v426_v13, %v434_v2  ;;  %v3673_v20 = vrot.slane %v426_v13, %v3643_v3  ;;  %v3678_v22 = vrot.slane %v426_v13, %v548_v4  ;;  %s5781_s25 = scalar_lea.hbm %s5837_s3, %s3208_s10  ;;  %s3005_s15 = scalar_lea.sflag [#allocation5], %s3623_s30 }
  0x64   : > { %v3680_v23 = vrot.slane %v430_v18, %v434_v2  ;;  %v475_v24 = vsel %vm468_vm0, %v3646_v6, %v456_v14  ;;  %v753_v26 = vsub.s32 7, %v3639_v1  ;;  %v3694_v29 = vrot.slane %v426_v13, %v604_v10  ;;  %s3349_s8 = scalar_lea.vmem %s5783_s11, 8192  ;;  %s3442_s26 = smov [#allocation8]  }
  0x65   : > { %v485_v27 = vmul.f32 %v3670_v19, %v3646_v6  ;;  %v509_v28 = vmul.f32 0.0, %v3673_v20  ;;  %v3697_v30 = vmul.f32 %v3670_v19, %v475_v24  ;;  %v544_v31 = vsel %vm537_vm1, %v527_v15, %v531_v21  ;;  %p3350_p4 = scmp.ne.s32.totalorder %s5783_s11, %s3349_s8  ;;  %s3353_s21 = sshll.u32 %s3442_s26, 4  ;;  %s3354_s21 = int_to_ptr.vmem [resolvable:$false] %s3353_s21 }
  0x66   : > { %v600_v32 = vsel %vm468_vm0, %v3646_v6, %v584_v25  ;;  %v554_v35 = vmul.f32 %v3678_v22, %v3648_v7  ;;  %v3716_v36 = vrot.slane %v426_v13, %v628_v11  ;;  %v3722_v39 = vrot.slane %v426_v13, %v672_v16  ;;  %s3355_s4 = scalar_lea.vmem %s3354_s21, 16384  ;;  %p3356_p12 = scmp.lt.s32.totalorder %s5783_s11, %s3354_s21 }
  0x67   : > { %v493_v34 = vadd.f32 %v485_v27, %v3680_v23  ;;  %v3726_v40 = vrot.slane %v426_v13, %v729_v17  ;;  %v3730_v41 = vrot.slane %v426_v13, %v753_v26  ;;  %v3733_v43 = vmul.f32 %v3678_v22, %v544_v31  ;;  %p3351_p6 = pnand %p3350_p4, %p3564_p10  ;;  %p3357_p11 = scmp.lt.s32.totalorder %s3355_s4, %s3349_s8 }
  0x68   : > { %v610_v44 = vmul.f32 %v3694_v29, %v475_v24  ;;  %v859_v45 = vmul.f32 %v600_v32, %v3670_v19  ;;  %v3741_v48 = vmul.f32 %v3694_v29, %v600_v32  ;;  %v634_v49 = vmul.f32 %v3716_v36, %v3651_v8 }
  0x69   : > { %v517_v42 = vadd.f32 %v509_v28, %v493_v34  ;;  %v668_v50 = vsel %vm537_vm1, %v652_v37, %v656_v38  ;;  %v875_v51 = vmul.f32 %v3673_v20, %v3654_v9  ;;  %v678_v54 = vmul.f32 %v3722_v39, %v544_v31  ;;  %p3352_p8 = pneg %p3351_p6  ;;  %p3358_p0 = por %p3357_p11, %p3356_p12 }
  0x6a   : > { %v735_v55 = vmul.f32 %v3726_v40, %v600_v32  ;;  %v867_v56 = vadd.f32 %v859_v45, %v3680_v23  ;;  %v759_v57 = vmul.f32 %v3730_v41, %v3654_v9  ;;  %v3761_v58 = vrot.slane %v430_v18, %v3643_v3 }
  0x6b   : > { %v3753_v53 = vadd.f32 %v554_v35, %v517_v42  ;;  %v5844_v59 = vrot.slane %v3738_v46, 7  ;;  %v3764_v60 = vrot.slane %v427_v47, %v434_v2  ;;  %v3768_v62 = vmul.f32 %v3722_v39, %v668_v50  ;;  %v3800_v42 = vld [vmem:[%s3629_s19 + $0x38] sm:$0xff]  ;;  %p3359_p5 = pnand %p3358_p0, %p3352_p8 }
  0x6c   : > { %v3777_v5 = vrot.slane %v427_v47, %v3643_v3  ;;  %v528_v13 = vrot.slane %v3738_v46, 1  ;;  %v803_v15 = vmul.f32 %v3751_v52, %v668_v50  ;;  %v5845_v18 = vrot.slane %v3771_v63, 1 }
  0x6d   : > { %v618_v61 = vadd.f32 %v610_v44, %v3753_v53  ;;  %v486_v2 = vmul.f32 %v3764_v60, %v3646_v6  ;;  %v3786_v24 = vrot.slane %v427_v47, %v548_v4  ;;  %v883_v28 = vadd.f32 %v875_v51, %v867_v56 }
  0x6e   : > { %v911_v31 = vmul.f32 %v668_v50, %v3678_v22  ;;  %v510_v3 = vmul.f32 0.0, %v3777_v5  ;;  %v476_v32 = vsel %vm468_vm0, %v3646_v6, %v5844_v59  ;;  %v5843_v4 = vrot.slane %v3774_v0, 7 }
  0x6f   : > { %v642_v27 = vadd.f32 %v634_v49, %v618_v61  ;;  %v494_v34 = vadd.f32 %v486_v2, %v3761_v58  ;;  %v555_v35 = vmul.f32 %v3786_v24, %v3648_v7  ;;  %v545_v44 = vsel %vm537_vm1, %v528_v13, %v5845_v18 }
  0x70   : > { %v3808_v45 = vrot.slane %v427_v47, %v604_v10  ;;  %v3812_v49 = vrot.slane %v427_v47, %v628_v11  ;;  %v601_v51 = vsel %vm468_vm0, %v3646_v6, %v5843_v4  ;;  %v5842_v56 = vrot.slane %v3800_v42, 1 }
  0x71   : > { %v686_v37 = vadd.f32 %v678_v54, %v642_v27  ;;  %v518_v50 = vadd.f32 %v510_v3, %v494_v34  ;;  %v653_v54 = vrot.slane %v3774_v0, 1  ;;  %v3821_v13 = vadd.f32 %v911_v31, %v883_v28 }
  0x72   : > { %v3824_v10 = vmul.f32 %v3764_v60, %v476_v32  ;;  %v611_v11 = vmul.f32 %v3808_v45, %v476_v32  ;;  %v635_v27 = vmul.f32 %v3812_v49, %v3738_v46  ;;  %v3833_v3 = vrot.slane %v427_v47, %v672_v16 }
  0x73   : > { %v743_v61 = vadd.f32 %v735_v55, %v686_v37  ;;  %5862 = vst [vmem:[#allocation12_spill] sm:$0xff] %v3821_v13  ;;  %v3827_v2 = vadd.f32 %v555_v35, %v518_v50  ;;  %v3837_v34 = vrot.slane %v427_v47, %v729_v17  ;;  %v3840_v28 = vmul.f32 %v3786_v24, %v545_v44  ;;  %v3847_v35 = vld [vmem:[#allocation6 + $0x18] ss:$0 sm:$0xff] }
  0x74   : > { %v669_v31 = vsel %vm537_vm1, %v653_v54, %v5842_v56  ;;  %v860_v32 = vmul.f32 %v601_v51, %v3764_v60  ;;  %v3850_v16 = vmul.f32 %v3808_v45, %v601_v51  ;;  %v3856_v37 = vrot.slane %v427_v47, %v753_v26 }
  0x75   : > { %v767_v55 = vadd.f32 %v759_v57, %v743_v61  ;;  %v619_v17 = vadd.f32 %v611_v11, %v3827_v2  ;;  %v679_v57 = vmul.f32 %v3833_v3, %v545_v44  ;;  %v736_v61 = vmul.f32 %v3837_v34, %v601_v51 }
  0x76   : > { %v868_v54 = vadd.f32 %v860_v32, %v3761_v58  ;;  %v876_v56 = vmul.f32 %v3777_v5, %v3774_v0  ;;  %v912_v59 = vmul.f32 %v669_v31, %v3786_v24  ;;  %v460_v18 = vrot.slane %v3661_v12, 7 }
  0x77   : > { %v811_v50 = vadd.f32 %v803_v15, %v767_v55  ;;  %v643_v4 = vadd.f32 %v635_v27, %v619_v17  ;;  %v540_v26 = vsel %vm537_vm1, %v531_v21, %v3648_v7  ;;  %v3875_v47 = vmul.f32 %v3833_v3, %v669_v31 }
  0x78   : > { %v804_v15 = vmul.f32 %v3847_v35, %v669_v31  ;;  %v884_v44 = vadd.f32 %v876_v56, %v868_v54  ;;  %v588_v51 = vrot.slane %v3709_v33, 7  ;;  %v760_v27 = vmul.f32 %v3856_v37, %v3774_v0 }
  0x79   : > { %819 = vst [vmem:[%s3871_s24] sm:$0xff] %v811_v50  ;;  %v687_v11 = vadd.f32 %v679_v57, %v643_v4  ;;  %v471_v21 = vsel %vm468_vm0, %v456_v14, %v460_v18  ;;  %v3886_v55 = vmul.f32 %v3678_v22, %v540_v26  ;;  %v636_v4 = vmul.f32 %v3716_v36, %v3661_v12 }
  0x7a   : > { %v596_v31 = vsel %vm468_vm0, %v584_v25, %v588_v51  ;;  %v612_v56 = vmul.f32 %v3694_v29, %v471_v21  ;;  %v664_v32 = vsel %vm537_vm1, %v656_v38, %v3648_v7  ;;  %v3900_v18 = vadd.f32 %v912_v59, %v884_v44 }
  0x7b   : > { %v744_v14 = vadd.f32 %v736_v61, %v687_v11  ;;  %v3903_v17 = vmul.f32 %v3670_v19, %v471_v21  ;;  %v680_v57 = vmul.f32 %v3722_v39, %v540_v26  ;;  %v3907_v25 = vmul.f32 %v3694_v29, %v596_v31 }
  0x7c   : > { %5863 = vst [vmem:[#allocation13_spill] sm:$0xff] %v3900_v18  ;;  %v620_v50 = vadd.f32 %v612_v56, %v3753_v53  ;;  %v3911_v54 = vmul.f32 %v3722_v39, %v664_v32  ;;  %v861_v51 = vmul.f32 %v596_v31, %v3670_v19  ;;  %v737_v38 = vmul.f32 %v3726_v40, %v596_v31 }
  0x7d   : > { %5864 = vst [vmem:[#allocation14_spill] sm:$0xff] %v3907_v25  ;;  %v768_v13 = vadd.f32 %v760_v27, %v744_v14  ;;  %v877_v59 = vmul.f32 %v3673_v20, %v3709_v33  ;;  %v461_v61 = vrot.slane %v3771_v63, 7  ;;  %v5866_v53 = vrot.slane %v3771_v63, 1 }
  0x7e   : > { %5865 = vst [vmem:[#allocation15_spill] sm:$0xff] %v3911_v54  ;;  %v644_v26 = vadd.f32 %v636_v4, %v620_v50  ;;  %v869_v44 = vadd.f32 %v861_v51, %v3680_v23  ;;  %v589_v21 = vrot.slane %v3800_v42, 7  ;;  %v761_v31 = vmul.f32 %v3730_v41, %v3709_v33 }
  0x7f   : > { %v541_v11 = vsel %vm537_vm1, %v5866_v53, %v3648_v7  ;;  %v812_v27 = vadd.f32 %v804_v15, %v768_v13  ;;  %v913_v56 = vmul.f32 %v664_v32, %v3678_v22  ;;  %v5867_v14 = vrot.slane %v3738_v46, 7 }
  0x80   : > { %v688_v50 = vadd.f32 %v680_v57, %v644_v26  ;;  %v805_v51 = vmul.f32 %v3751_v52, %v664_v32  ;;  %v885_v18 = vadd.f32 %v877_v59, %v869_v44  ;;  %v5868_v53 = vrot.slane %v3774_v0, 7 }
  0x81   : > { %v472_v4 = vsel %vm468_vm0, %v5867_v14, %v461_v61  ;;  %820 = vst [vmem:[%s3871_s24 + $0x8] sm:$0xff] %v812_v27  ;;  %v3942_v54 = vmul.f32 %v3786_v24, %v541_v11  ;;  %v637_v57 = vmul.f32 %v3812_v49, %v3771_v63  ;;  %v5870_v61 = vrot.slane %v3800_v42, 1 }
  0x82   : > { %v597_v13 = vsel %vm468_vm0, %v5868_v53, %v589_v21  ;;  %v3939_v15 = vmul.f32 %v3764_v60, %v472_v4  ;;  %v613_v25 = vmul.f32 %v3808_v45, %v472_v4  ;;  %v745_v32 = vadd.f32 %v737_v38, %v688_v50  ;;  %v3964_v4 = vld [vmem:[%s3629_s19 + $0x40] sm:$0xff] }
  0x83   : > { %v3948_v59 = vmul.f32 %v3808_v45, %v597_v13  ;;  %v665_v26 = vsel %vm537_vm1, %v5870_v61, %v3648_v7  ;;  %v681_v44 = vmul.f32 %v3833_v3, %v541_v11  ;;  %v3956_v21 = vadd.f32 %v913_v56, %v885_v18 }
  0x84   : > { %v621_v27 = vadd.f32 %v613_v25, %v3827_v2  ;;  %v3960_v14 = vmul.f32 %v3833_v3, %v665_v26  ;;  %v862_v38 = vmul.f32 %v597_v13, %v3764_v60  ;;  %v769_v50 = vadd.f32 %v761_v31, %v745_v32 }
  0x85   : > { %5869 = vst [vmem:[#allocation16_spill] sm:$0xff] %v3948_v59  ;;  %5871 = vst [vmem:[#allocation17_spill] sm:$0xff] %v3956_v21  ;;  %v738_v53 = vmul.f32 %v3837_v34, %v597_v13  ;;  %v878_v61 = vmul.f32 %v3777_v5, %v3800_v42  ;;  %v497_v18 = vadd.f32 %v3697_v30, %v3680_v23  ;;  %v3978_v13 = vld [vmem:[%s3629_s19 + $0x50] sm:$0xff]  ;;  %v5847_v32 = vrot.slane %v3964_v4, 7 }
  0x86   : > { %5872 = vst [vmem:[#allocation18_spill] sm:$0xff] %v3960_v14  ;;  %v645_v11 = vadd.f32 %v637_v57, %v621_v27  ;;  %v762_v2 = vmul.f32 %v3856_v37, %v3800_v42  ;;  %v870_v25 = vadd.f32 %v862_v38, %v3761_v58  ;;  %v513_v56 = vmul.f32 %v3673_v20, %v3651_v8 }
  0x87   : > { %v813_v21 = vadd.f32 %v805_v51, %v769_v50  ;;  %v914_v31 = vmul.f32 %v665_v26, %v3786_v24  ;;  %v777_v14 = vrot.slane %v3964_v4, 1  ;;  %v5846_v27 = vrot.slane %v3978_v13, 1 }
  0x88   : > { %v689_v59 = vadd.f32 %v681_v44, %v645_v11  ;;  %v886_v30 = vadd.f32 %v878_v61, %v870_v25  ;;  %v521_v57 = vadd.f32 %v513_v56, %v497_v18  ;;  %v806_v38 = vmul.f32 %v3847_v35, %v665_v26 }
  0x89   : > { %821 = vst [vmem:[%s3871_s24 + $0x10] sm:$0xff] %v813_v21  ;;  %v725_v8 = vsel %vm468_vm0, %v3646_v6, %v5847_v32  ;;  %v498_v51 = vadd.f32 %v3824_v10, %v3761_v58  ;;  %v514_v44 = vmul.f32 %v3777_v5, %v3738_v46  ;;  %v638_v21 = vmul.f32 %v3716_v36, %v3654_v9 }
  0x8a   : > { %v746_v50 = vadd.f32 %v738_v53, %v689_v59  ;;  %v566_v61 = vadd.f32 %v3733_v43, %v521_v57  ;;  %v763_v26 = vmul.f32 %v3730_v41, %v3964_v4  ;;  %v793_v18 = vsel %vm537_vm1, %v777_v14, %v5846_v27  ;;  %v4007_v59 = vld [vmem:[%s3629_s19 + $0x48] sm:$0xff] }
  0x8b   : > { %v863_v10 = vmul.f32 %v725_v8, %v3670_v19  ;;  %v879_v46 = vmul.f32 %v3673_v20, %v3964_v4  ;;  %v522_v43 = vadd.f32 %v514_v44, %v498_v51  ;;  %v4009_v11 = vadd.f32 %v914_v31, %v886_v30  ;;  %v4022_v31 = vld [vmem:[%s3629_s19 + $0x58] sm:$0xff] }
  0x8c   : > { %v770_v53 = vadd.f32 %v762_v2, %v746_v50  ;;  %v622_v9 = vadd.f32 %v3741_v48, %v566_v61  ;;  %v739_v25 = vmul.f32 %v3726_v40, %v725_v8  ;;  %v4015_v14 = vmul.f32 %v725_v8, %v3694_v29 }
  0x8d   : > { %v871_v56 = vadd.f32 %v863_v10, %v3680_v23  ;;  %v567_v57 = vadd.f32 %v3840_v28, %v522_v43  ;;  %v639_v27 = vmul.f32 %v3812_v49, %v3774_v0  ;;  %v915_v2 = vmul.f32 %v793_v18, %v3678_v22 }
  0x8e   : > { %v814_v32 = vadd.f32 %v806_v38, %v770_v53  ;;  %v646_v51 = vadd.f32 %v638_v21, %v622_v9  ;;  %v710_v48 = vrot.slane %v4007_v59, 7  ;;  %v778_v50 = vrot.slane %v4007_v59, 1 }
  0x8f   : > { %v887_v30 = vadd.f32 %v879_v46, %v871_v56  ;;  %v623_v44 = vadd.f32 %v3850_v16, %v567_v57  ;;  %v782_v8 = vrot.slane %v4022_v31, 1  ;;  %v807_v0 = vmul.f32 %v3751_v52, %v793_v18 }
  0x90   : > { %822 = vst [vmem:[%s3871_s24 + $0x18] sm:$0xff] %v814_v32  ;;  %v690_v28 = vadd.f32 %v3768_v62, %v646_v51  ;;  %v4032_v38 = vmul.f32 %v793_v18, %v3722_v39  ;;  %v726_v61 = vsel %vm468_vm0, %v3646_v6, %v710_v48  ;;  %v499_v32 = vadd.f32 %v3903_v17, %v3680_v23 }
  0x91   : > { %v647_v21 = vadd.f32 %v639_v27, %v623_v44  ;;  %v740_v10 = vmul.f32 %v3837_v34, %v726_v61  ;;  %v794_v16 = vsel %vm537_vm1, %v778_v50, %v782_v8  ;;  %v764_v62 = vmul.f32 %v3856_v37, %v4007_v59 }
  0x92   : > { %v747_v46 = vadd.f32 %v739_v25, %v690_v28  ;;  %v864_v18 = vmul.f32 %v726_v61, %v3764_v60  ;;  %v880_v43 = vmul.f32 %v3777_v5, %v4007_v59  ;;  %v4047_v53 = vadd.f32 %v915_v2, %v887_v30 }
  0x93   : > { %v691_v27 = vadd.f32 %v3875_v47, %v647_v21  ;;  %v808_v9 = vmul.f32 %v3847_v35, %v794_v16  ;;  %v515_v56 = vmul.f32 %v3673_v20, %v3661_v12  ;;  %v916_v25 = vmul.f32 %v794_v16, %v3786_v24 }
  0x94   : > { %v771_v57 = vadd.f32 %v763_v26, %v747_v46  ;;  %v872_v17 = vadd.f32 %v864_v18, %v3761_v58  ;;  %v713_v51 = vrot.slane %v3978_v13, 7  ;;  %v4057_v50 = vmul.f32 %v726_v61, %v3808_v45 }
  0x95   : > { %v748_v44 = vadd.f32 %v740_v10, %v691_v27  ;;  %v4060_v2 = vmul.f32 %v794_v16, %v3833_v3  ;;  %v523_v47 = vadd.f32 %v515_v56, %v499_v32  ;;  %v640_v12 = vmul.f32 %v3716_v36, %v3709_v33  ;;  %v5876_v27 = vld [vmem:[#allocation14_spill] sm:$0xff] }
  0x96   : > { %v815_v30 = vadd.f32 %v807_v0, %v771_v57  ;;  %v888_v28 = vadd.f32 %v880_v43, %v872_v17  ;;  %v5873_v26 = vrot.slane %v3964_v4, 7  ;;  %v5874_v61 = vrot.slane %v3978_v13, 1 }
  0x97   : > { %v772_v46 = vadd.f32 %v764_v62, %v748_v44  ;;  %v568_v10 = vadd.f32 %v3886_v55, %v523_v47  ;;  %v765_v32 = vmul.f32 %v3730_v41, %v3978_v13  ;;  %v881_v55 = vmul.f32 %v3673_v20, %v3978_v13 }
  0x98   : > { %v721_v21 = vsel %vm468_vm0, %v5873_v26, %v713_v51  ;;  %v789_v16 = vsel %vm537_vm1, %v5874_v61, %v3648_v7  ;;  %823 = vst [vmem:[%s3871_s24 + $0x20] sm:$0xff] %v815_v30  ;;  %v4082_v43 = vadd.f32 %v916_v25, %v888_v28  ;;  %v500_v51 = vadd.f32 %v3939_v15, %v3761_v58 }
  0x99   : > { %v865_v0 = vmul.f32 %v721_v21, %v3670_v19  ;;  %v741_v33 = vmul.f32 %v3726_v40, %v721_v21  ;;  %v809_v18 = vmul.f32 %v3751_v52, %v789_v16  ;;  %v816_v62 = vadd.f32 %v808_v9, %v772_v46 }
  0x9a   : > { %5875 = vst [vmem:[#allocation19_spill] sm:$0xff] %v4082_v43  ;;  %v624_v56 = vadd.f32 %v5876_v27, %v568_v10  ;;  %v917_v17 = vmul.f32 %v789_v16, %v3678_v22  ;;  %v516_v44 = vmul.f32 %v3777_v5, %v3771_v63  ;;  %v714_v47 = vrot.slane %v4022_v31, 7  ;;  %v5877_v10 = vld [vmem:[#allocation15_spill] sm:$0xff] }
  0x9b   : > { %v873_v57 = vadd.f32 %v865_v0, %v3680_v23  ;;  %824 = vst [vmem:[%s3871_s24 + $0x28] sm:$0xff] %v816_v62  ;;  %v4094_v25 = vmul.f32 %v721_v21, %v3694_v29  ;;  %v4097_v28 = vmul.f32 %v789_v16, %v3722_v39  ;;  %v641_v46 = vmul.f32 %v3812_v49, %v3800_v42 }
  0x9c   : > { %v648_v30 = vadd.f32 %v640_v12, %v624_v56  ;;  %v524_v26 = vadd.f32 %v516_v44, %v500_v51  ;;  %v722_v15 = vsel %vm468_vm0, %v710_v48, %v714_v47  ;;  %v790_v63 = vsel %vm537_vm1, %v782_v8, %v3648_v7  ;;  %v4107_v12 = vld [vmem:[%s3629_s19 + $0x60] sm:$0xff]  ;;  %v4122_v56 = vld [vmem:[%s3629_s19 + $0x70] sm:$0xff] }
  0x9d   : > { %v889_v9 = vadd.f32 %v881_v55, %v873_v57  ;;  %v766_v61 = vmul.f32 %v3856_v37, %v4022_v31  ;;  %v810_v16 = vmul.f32 %v3847_v35, %v790_v63  ;;  %v866_v0 = vmul.f32 %v722_v15, %v3764_v60  ;;  %v5879_v51 = vld [vmem:[#allocation12_spill] sm:$0xff] }
  0x9e   : > { %v692_v21 = vadd.f32 %v5877_v10, %v648_v30  ;;  %v569_v42 = vadd.f32 %v3942_v54, %v524_v26  ;;  %v742_v48 = vmul.f32 %v3837_v34, %v722_v15  ;;  %v882_v8 = vmul.f32 %v3777_v5, %v4022_v31 }
  0x9f   : > { %v4114_v55 = vadd.f32 %v917_v17, %v889_v9  ;;  %v874_v27 = vadd.f32 %v866_v0, %v3761_v58  ;;  %v5848_v57 = vrot.slane %v4107_v12, 7  ;;  %v968_v44 = vadd.f32 %v4015_v14, %v5879_v51  ;;  %v5880_v17 = vld [vmem:[#allocation16_spill] sm:$0xff]  ;;  %v4145_v51 = vld [vmem:[%s3629_s19 + $0x68] sm:$0xff] }
  0xa0   : > { %v749_v62 = vadd.f32 %v741_v33, %v692_v21  ;;  %v625_v47 = vadd.f32 %v5880_v17, %v569_v42  ;;  %v976_v54 = vmul.f32 %v3716_v36, %v3964_v4  ;;  %v994_v30 = vrot.slane %v4107_v12, 1 }
  0xa1   : > { %5878 = vst [vmem:[#allocation14_spill] sm:$0xff] %v4114_v55  ;;  %v998_v9 = vrot.slane %v4122_v56, 1  ;;  %v918_v26 = vmul.f32 %v790_v63, %v3786_v24  ;;  %v4134_v10 = vmul.f32 %v722_v15, %v3808_v45  ;;  %v958_v14 = vsel %vm468_vm0, %v3646_v6, %v5848_v57  ;;  %v5881_v55 = vld [vmem:[#allocation18_spill] sm:$0xff] }
  0xa2   : > { %v773_v33 = vadd.f32 %v765_v32, %v749_v62  ;;  %v649_v21 = vadd.f32 %v641_v46, %v625_v47  ;;  %v890_v0 = vadd.f32 %v882_v8, %v874_v27  ;;  %v4142_v4 = vmul.f32 %v790_v63, %v3833_v3  ;;  %v5882_v47 = vld [vmem:[#allocation13_spill] sm:$0xff] }
  0xa3   : > { %v984_v42 = vadd.f32 %v976_v54, %v968_v44  ;;  %v4148_v62 = vmul.f32 %v958_v14, %v3694_v29  ;;  %v1061_v15 = vmul.f32 %v958_v14, %v3726_v40  ;;  %v1077_v17 = vmul.f32 %v3730_v41, %v4107_v12 }
  0xa4   : > { %v817_v32 = vadd.f32 %v809_v18, %v773_v33  ;;  %v693_v57 = vadd.f32 %v5881_v55, %v649_v21  ;;  %v1010_v46 = vsel %vm537_vm1, %v994_v30, %v998_v9  ;;  %v1170_v8 = vmul.f32 %v958_v14, %v3670_v19  ;;  %v4167_v30 = vld [vmem:[%s3629_s19 + $0x78] sm:$0xff] }
  0xa5   : > { %v1020_v63 = vadd.f32 %v4032_v38, %v984_v42  ;;  %v1113_v18 = vmul.f32 %v3751_v52, %v1010_v46  ;;  %v1186_v27 = vmul.f32 %v3673_v20, %v4107_v12  ;;  %v943_v44 = vrot.slane %v4145_v51, 7 }
  0xa6   : > { %825 = vst [vmem:[%s3871_s24 + $0x30] sm:$0xff] %v817_v32  ;;  %v969_v54 = vadd.f32 %v4057_v50, %v5882_v47  ;;  %v750_v33 = vadd.f32 %v742_v48, %v693_v57  ;;  %v1178_v21 = vadd.f32 %v1170_v8, %v3680_v23  ;;  %v977_v38 = vmul.f32 %v3812_v49, %v4007_v59 }
  0xa7   : > { %v1069_v55 = vadd.f32 %v1061_v15, %v1020_v63  ;;  %v4171_v14 = vadd.f32 %v918_v26, %v890_v0  ;;  %v959_v42 = vsel %vm468_vm0, %v3646_v6, %v943_v44  ;;  %v995_v32 = vrot.slane %v4145_v51, 1 }
  0xa8   : > { %v999_v43 = vrot.slane %v4167_v30, 1  ;;  %v774_v50 = vadd.f32 %v766_v61, %v750_v33  ;;  %v1194_v57 = vadd.f32 %v1186_v27, %v1178_v21  ;;  %v1222_v15 = vmul.f32 %v1010_v46, %v3678_v22 }
  0xa9   : > { %5883 = vst [vmem:[#allocation15_spill] sm:$0xff] %v4171_v14  ;;  %v1085_v48 = vadd.f32 %v1077_v17, %v1069_v55  ;;  %v985_v63 = vadd.f32 %v977_v38, %v969_v54  ;;  %v1062_v26 = vmul.f32 %v959_v42, %v3837_v34  ;;  %v1171_v0 = vmul.f32 %v959_v42, %v3764_v60 }
  0xaa   : > { %v1011_v59 = vsel %vm537_vm1, %v995_v32, %v999_v43  ;;  %v818_v8 = vadd.f32 %v810_v16, %v774_v50  ;;  %v4184_v47 = vmul.f32 %v1010_v46, %v3722_v39  ;;  %v1078_v61 = vmul.f32 %v3856_v37, %v4145_v51 }
  0xab   : > { %v1121_v14 = vadd.f32 %v1113_v18, %v1085_v48  ;;  %v4189_v17 = vmul.f32 %v959_v42, %v3808_v45  ;;  %v1021_v27 = vadd.f32 %v4060_v2, %v985_v63  ;;  %v1179_v54 = vadd.f32 %v1171_v0, %v3761_v58  ;;  %v5884_v18 = vld [vmem:[#allocation17_spill] sm:$0xff] }
  0xac   : > { %v1187_v33 = vmul.f32 %v3777_v5, %v4145_v51  ;;  %826 = vst [vmem:[%s3871_s24 + $0x38] sm:$0xff] %v818_v8  ;;  %v1223_v16 = vmul.f32 %v1011_v59, %v3786_v24  ;;  %v946_v46 = vrot.slane %v4122_v56, 7  ;;  %v970_v55 = vadd.f32 %v4094_v25, %v5884_v18 }
  0xad   : > { %3146 = vst [vmem:[%s3871_s24 + $0x40] sm:$0xff] %v1121_v14  ;;  %v978_v21 = vmul.f32 %v3716_v36, %v3978_v13  ;;  %v4203_v38 = vadd.f32 %v1222_v15, %v1194_v57  ;;  %v1070_v2 = vadd.f32 %v1062_v26, %v1021_v27  ;;  %v1114_v42 = vmul.f32 %v3847_v35, %v1011_v59 }
  0xae   : > { %v1195_v32 = vadd.f32 %v1187_v33, %v1179_v54  ;;  %v4207_v50 = vmul.f32 %v1011_v59, %v3833_v3  ;;  %v5885_v14 = vrot.slane %v4107_v12, 7  ;;  %v1006_v25 = vsel %vm537_vm1, %v998_v9, %v3648_v7 }
  0xaf   : > { %v986_v63 = vadd.f32 %v978_v21, %v970_v55  ;;  %v1086_v13 = vadd.f32 %v1078_v61, %v1070_v2  ;;  %v4217_v57 = vmul.f32 %v1006_v25, %v3722_v39  ;;  %v1079_v59 = vmul.f32 %v3730_v41, %v4122_v56 }
  0xb0   : > { %v954_v48 = vsel %vm468_vm0, %v5885_v14, %v946_v46  ;;  %v4222_v26 = vadd.f32 %v1223_v16, %v1195_v32  ;;  %v1115_v8 = vmul.f32 %v3751_v52, %v1006_v25  ;;  %v947_v9 = vrot.slane %v4167_v30, 7  ;;  %v4250_v14 = vld [vmem:[%s3629_s19 + $0x80] sm:$0xff] }
  0xb1   : > { %v1063_v15 = vmul.f32 %v954_v48, %v3726_v40  ;;  %v1022_v0 = vadd.f32 %v4097_v28, %v986_v63  ;;  %v1172_v27 = vmul.f32 %v954_v48, %v3670_v19  ;;  %v1122_v54 = vadd.f32 %v1114_v42, %v1086_v13 }
  0xb2   : > { %v971_v61 = vadd.f32 %v4134_v10, %v4009_v11  ;;  %v979_v33 = vmul.f32 %v3812_v49, %v4022_v31  ;;  %v966_v46 = vmul.f32 %v954_v48, %v3694_v29  ;;  %v1188_v28 = vmul.f32 %v3673_v20, %v4122_v56 }
  0xb3   : > { %v1071_v16 = vadd.f32 %v1063_v15, %v1022_v0  ;;  %v1180_v18 = vadd.f32 %v1172_v27, %v3680_v23  ;;  %3147 = vst [vmem:[%s3871_s24 + $0x48] sm:$0xff] %v1122_v54  ;;  %v1224_v55 = vmul.f32 %v1006_v25, %v3678_v22  ;;  %v955_v21 = vsel %vm468_vm0, %v943_v44, %v947_v9  ;;  %v4264_v54 = vld [vmem:[%s3629_s19 + $0x90] sm:$0xff] }
  0xb4   : > { %v987_v2 = vadd.f32 %v979_v33, %v971_v61  ;;  %v1007_v11 = vsel %vm537_vm1, %v999_v43, %v3648_v7  ;;  %v1064_v42 = vmul.f32 %v955_v21, %v3837_v34  ;;  %v1080_v32 = vmul.f32 %v3856_v37, %v4167_v30 }
  0xb5   : > { %v1087_v31 = vadd.f32 %v1079_v59, %v1071_v16  ;;  %v4244_v10 = vmul.f32 %v1007_v11, %v3833_v3  ;;  %v1116_v48 = vmul.f32 %v3847_v35, %v1007_v11  ;;  %v1173_v63 = vmul.f32 %v955_v21, %v3764_v60 }
  0xb6   : > { %v1023_v44 = vadd.f32 %v4142_v4, %v987_v2  ;;  %v1189_v43 = vmul.f32 %v3777_v5, %v4167_v30  ;;  %v1196_v13 = vadd.f32 %v1188_v28, %v1180_v18  ;;  %v972_v15 = vadd.f32 %v4148_v62, %v4047_v53 }
  0xb7   : > { %v1123_v25 = vadd.f32 %v1115_v8, %v1087_v31  ;;  %v980_v59 = vmul.f32 %v3716_v36, %v4107_v12  ;;  %v1181_v27 = vadd.f32 %v1173_v63, %v3761_v58  ;;  %v1225_v4 = vmul.f32 %v1007_v11, %v3786_v24 }
  0xb8   : > { %v1072_v0 = vadd.f32 %v1064_v42, %v1023_v44  ;;  %v1043_v9 = vrot.slane %v4250_v14, 7  ;;  %v1081_v8 = vmul.f32 %v3730_v41, %v4250_v14  ;;  %v1095_v53 = vrot.slane %v4250_v14, 1  ;;  %v4283_v42 = vld [vmem:[%s3629_s19 + $0x88] sm:$0xff] }
  0xb9   : > { %3148 = vst [vmem:[%s3871_s24 + $0x50] sm:$0xff] %v1123_v25  ;;  %v988_v61 = vadd.f32 %v980_v59, %v972_v15  ;;  %v1099_v62 = vrot.slane %v4264_v54, 1  ;;  %v1197_v33 = vadd.f32 %v1189_v43, %v1181_v27  ;;  %v1190_v18 = vmul.f32 %v3673_v20, %v4250_v14  ;;  %v5886_v43 = vld [vmem:[#allocation19_spill] sm:$0xff] }
  0xba   : > { %v1088_v12 = vadd.f32 %v1080_v32, %v1072_v0  ;;  %v1059_v16 = vsel %vm468_vm0, %v3646_v6, %v1043_v9  ;;  %v4285_v32 = vadd.f32 %v1224_v55, %v1196_v13  ;;  %v967_v44 = vmul.f32 %v955_v21, %v3808_v45 }
  0xbb   : > { %v1024_v28 = vadd.f32 %v4184_v47, %v988_v61  ;;  %v1065_v2 = vmul.f32 %v1059_v16, %v3726_v40  ;;  %v1111_v11 = vsel %vm537_vm1, %v1095_v53, %v1099_v62  ;;  %v1174_v31 = vmul.f32 %v1059_v16, %v3670_v19  ;;  %v4297_v61 = vld [vmem:[%s3629_s19 + $0x98] sm:$0xff] }
  0xbc   : > { %v1124_v63 = vadd.f32 %v1116_v48, %v1088_v12  ;;  %v973_v25 = vadd.f32 %v4189_v17, %v5886_v43  ;;  %v4290_v15 = vadd.f32 %v1225_v4, %v1197_v33  ;;  %v1117_v59 = vmul.f32 %v3751_v52, %v1111_v11 }
  0xbd   : > { %v1073_v47 = vadd.f32 %v1065_v2, %v1024_v28  ;;  %v1182_v0 = vadd.f32 %v1174_v31, %v3680_v23  ;;  %v1226_v27 = vmul.f32 %v1111_v11, %v3678_v22  ;;  %v981_v55 = vmul.f32 %v3812_v49, %v4145_v51  ;;  %v5887_v28 = vld [vmem:[#allocation14_spill] sm:$0xff] }
  0xbe   : > { %3149 = vst [vmem:[%s3871_s24 + $0x58] sm:$0xff] %v1124_v63  ;;  %v1044_v21 = vrot.slane %v4283_v42, 7  ;;  %v1096_v48 = vrot.slane %v4283_v42, 1  ;;  %v1271_v4 = vmul.f32 %v1059_v16, %v3694_v29  ;;  %v1100_v53 = vrot.slane %v4297_v61, 1 }
  0xbf   : > { %v1089_v17 = vadd.f32 %v1081_v8, %v1073_v47  ;;  %v1198_v13 = vadd.f32 %v1190_v18, %v1182_v0  ;;  %v989_v12 = vadd.f32 %v981_v55, %v973_v25  ;;  %v974_v2 = vadd.f32 %v966_v46, %v5887_v28 }
  0xc0   : > { %v1060_v33 = vsel %vm468_vm0, %v3646_v6, %v1044_v21  ;;  %v982_v51 = vmul.f32 %v3716_v36, %v4122_v56  ;;  %v4312_v63 = vmul.f32 %v1111_v11, %v3722_v39  ;;  %v1112_v16 = vsel %vm537_vm1, %v1096_v48, %v1100_v53 }
  0xc1   : > { %v1125_v31 = vadd.f32 %v1117_v59, %v1089_v17  ;;  %v1066_v8 = vmul.f32 %v1060_v33, %v3837_v34  ;;  %v1025_v18 = vadd.f32 %v4207_v50, %v989_v12  ;;  %v1082_v43 = vmul.f32 %v3856_v37, %v4283_v42 }
  0xc2   : > { %v1175_v25 = vmul.f32 %v1060_v33, %v3764_v60  ;;  %v1191_v46 = vmul.f32 %v3777_v5, %v4283_v42  ;;  %v4324_v56 = vadd.f32 %v1226_v27, %v1198_v13  ;;  %v1118_v11 = vmul.f32 %v3847_v35, %v1112_v16 }
  0xc3   : > { %3150 = vst [vmem:[%s3871_s24 + $0x60] sm:$0xff] %v1125_v31  ;;  %v990_v47 = vadd.f32 %v982_v51, %v974_v2  ;;  %v1047_v59 = vrot.slane %v4264_v54, 7  ;;  %v1074_v0 = vadd.f32 %v1066_v8, %v1025_v18  ;;  %v1227_v50 = vmul.f32 %v1112_v16, %v3786_v24  ;;  %v5888_v8 = vld [vmem:[#allocation15_spill] sm:$0xff] }
  0xc4   : > { %v1183_v55 = vadd.f32 %v1175_v25, %v3761_v58  ;;  %v4331_v48 = vmul.f32 %v1060_v33, %v3808_v45  ;;  %v1083_v27 = vmul.f32 %v3730_v41, %v4264_v54  ;;  %v1107_v13 = vsel %vm537_vm1, %v1099_v62, %v3648_v7 }
  0xc5   : > { %v1026_v17 = vadd.f32 %v4217_v57, %v990_v47  ;;  %v1055_v12 = vsel %vm468_vm0, %v1043_v9, %v1047_v59  ;;  %v1090_v28 = vadd.f32 %v1082_v43, %v1074_v0  ;;  %v4344_v31 = vmul.f32 %v1112_v16, %v3833_v3 }
  0xc6   : > { %v1199_v2 = vadd.f32 %v1191_v46, %v1183_v55  ;;  %v1067_v51 = vmul.f32 %v1055_v12, %v3726_v40  ;;  %v1176_v33 = vmul.f32 %v1055_v12, %v3670_v19  ;;  %v1119_v57 = vmul.f32 %v3751_v52, %v1107_v13 }
  0xc7   : > { %v1192_v9 = vmul.f32 %v3673_v20, %v4264_v54  ;;  %v975_v18 = vadd.f32 %v967_v44, %v5888_v8  ;;  %v1126_v25 = vadd.f32 %v1118_v11, %v1090_v28  ;;  %v1228_v46 = vmul.f32 %v1107_v13, %v3678_v22 }
  0xc8   : > { %v1075_v62 = vadd.f32 %v1067_v51, %v1026_v17  ;;  %v1184_v43 = vadd.f32 %v1176_v33, %v3680_v23  ;;  %v4353_v47 = vmul.f32 %v1055_v12, %v3694_v29  ;;  %v4356_v16 = vmul.f32 %v1107_v13, %v3722_v39  ;;  %v4370_v12 = vld [vmem:[%s3629_s19 + $0xa0] sm:$0xff] }
  0xc9   : > { %v983_v59 = vmul.f32 %v3812_v49, %v4167_v30  ;;  %v1048_v0 = vrot.slane %v4297_v61, 7  ;;  %3151 = vst [vmem:[%s3871_s24 + $0x68] sm:$0xff] %v1126_v25  ;;  %v4362_v44 = vadd.f32 %v1227_v50, %v1199_v2  ;;  %v1084_v55 = vmul.f32 %v3856_v37, %v4297_v61  ;;  %v4382_v25 = vld [vmem:[%s3629_s19 + $0xb0] sm:$0xff] }
  0xca   : > { %v1091_v11 = vadd.f32 %v1083_v27, %v1075_v62  ;;  %v1108_v17 = vsel %vm537_vm1, %v1100_v53, %v3648_v7  ;;  %v1200_v13 = vadd.f32 %v1192_v9, %v1184_v43  ;;  %v1193_v33 = vmul.f32 %v3777_v5, %v4297_v61 }
  0xcb   : > { %v991_v28 = vadd.f32 %v983_v59, %v975_v18  ;;  %v1056_v30 = vsel %vm468_vm0, %v1044_v21, %v1048_v0  ;;  %v1120_v51 = vmul.f32 %v3847_v35, %v1108_v17  ;;  %v1229_v53 = vmul.f32 %v1108_v17, %v3786_v24 }
  0xcc   : > { %v1127_v50 = vadd.f32 %v1119_v57, %v1091_v11  ;;  %v1068_v27 = vmul.f32 %v1056_v30, %v3837_v34  ;;  %v1177_v2 = vmul.f32 %v1056_v30, %v3764_v60  ;;  %v1253_v9 = vrot.slane %v4370_v12, 7 }
  0xcd   : > { %v1027_v8 = vadd.f32 %v4244_v10, %v991_v28  ;;  %v1279_v21 = vadd.f32 %v1271_v4, %v4203_v38  ;;  %v1287_v18 = vmul.f32 %v3716_v36, %v4250_v14  ;;  %v1305_v62 = vrot.slane %v4370_v12, 1 }
  0xce   : > { %3152 = vst [vmem:[%s3871_s24 + $0x70] sm:$0xff] %v1127_v50  ;;  %v1185_v57 = vadd.f32 %v1177_v2, %v3761_v58  ;;  %v1309_v43 = vrot.slane %v4382_v25, 1  ;;  %v4392_v10 = vadd.f32 %v1228_v46, %v1200_v13  ;;  %v4395_v0 = vmul.f32 %v1108_v17, %v3833_v3  ;;  %v4406_v46 = vld [vmem:[%s3629_s19 + $0xa8] sm:$0xff] }
  0xcf   : > { %v1076_v59 = vadd.f32 %v1068_v27, %v1027_v8  ;;  %v1269_v38 = vsel %vm468_vm0, %v3646_v6, %v1253_v9  ;;  %v1274_v4 = vmul.f32 %v1056_v30, %v3808_v45  ;;  %v1295_v11 = vadd.f32 %v1287_v18, %v1279_v21 }
  0xd0   : > { %5889 = vst [vmem:[#allocation12_spill] sm:$0xff] %v4392_v10  ;;  %v1388_v14 = vmul.f32 %v3730_v41, %v4370_v12  ;;  %v1497_v28 = vmul.f32 %v3673_v20, %v4370_v12  ;;  %v1201_v50 = vadd.f32 %v1193_v33, %v1185_v57  ;;  %v1321_v17 = vsel %vm537_vm1, %v1305_v62, %v1309_v43  ;;  %v4418_v10 = vld [vmem:[%s3629_s19 + $0xb8] sm:$0xff] }
  0xd1   : > { %v1092_v13 = vadd.f32 %v1084_v55, %v1076_v59  ;;  %v1372_v27 = vmul.f32 %v1269_v38, %v3726_v40  ;;  %v4412_v2 = vmul.f32 %v1269_v38, %v3694_v29  ;;  %v1331_v30 = vadd.f32 %v4312_v63, %v1295_v11 }
  0xd2   : > { %v1424_v8 = vmul.f32 %v3751_v52, %v1321_v17  ;;  %v1481_v21 = vmul.f32 %v1269_v38, %v3670_v19  ;;  %v1254_v55 = vrot.slane %v4406_v46, 7  ;;  %v1280_v33 = vadd.f32 %v4331_v48, %v4222_v26 }
  0xd3   : > { %v1128_v18 = vadd.f32 %v1120_v51, %v1092_v13  ;;  %v1288_v57 = vmul.f32 %v3812_v49, %v4283_v42  ;;  %v1380_v62 = vadd.f32 %v1372_v27, %v1331_v30  ;;  %v1306_v63 = vrot.slane %v4406_v46, 1 }
  0xd4   : > { %v1489_v59 = vadd.f32 %v1481_v21, %v3680_v23  ;;  %v1310_v11 = vrot.slane %v4418_v10, 1  ;;  %v4429_v38 = vadd.f32 %v1229_v53, %v1201_v50  ;;  %v4432_v51 = vmul.f32 %v1321_v17, %v3722_v39 }
  0xd5   : > { %3153 = vst [vmem:[%s3871_s24 + $0x78] sm:$0xff] %v1128_v18  ;;  %v1270_v26 = vsel %vm468_vm0, %v3646_v6, %v1254_v55  ;;  %v1296_v48 = vadd.f32 %v1288_v57, %v1280_v33  ;;  %v1396_v13 = vadd.f32 %v1388_v14, %v1380_v62  ;;  %v1533_v27 = vmul.f32 %v1321_v17, %v3678_v22 }
  0xd6   : > { %5890 = vst [vmem:[#allocation16_spill] sm:$0xff] %v4429_v38  ;;  %v1505_v42 = vadd.f32 %v1497_v28, %v1489_v59  ;;  %v1389_v30 = vmul.f32 %v3856_v37, %v4406_v46  ;;  %v1322_v53 = vsel %vm537_vm1, %v1306_v63, %v1310_v11  ;;  %v1373_v21 = vmul.f32 %v1270_v26, %v3837_v34 }
  0xd7   : > { %v1332_v50 = vadd.f32 %v4344_v31, %v1296_v48  ;;  %v1498_v18 = vmul.f32 %v3777_v5, %v4406_v46  ;;  %v1432_v38 = vadd.f32 %v1424_v8, %v1396_v13  ;;  %v4447_v14 = vmul.f32 %v1270_v26, %v3808_v45 }
  0xd8   : > { %v1425_v28 = vmul.f32 %v3847_v35, %v1322_v53  ;;  %v1482_v17 = vmul.f32 %v1270_v26, %v3764_v60  ;;  %v1257_v57 = vrot.slane %v4382_v25, 7  ;;  %v1281_v62 = vadd.f32 %v4353_v47, %v4285_v32 }
  0xd9   : > { %v1381_v33 = vadd.f32 %v1373_v21, %v1332_v50  ;;  %v1289_v31 = vmul.f32 %v3716_v36, %v4264_v54  ;;  %3154 = vst [vmem:[%s3871_s24 + $0x80] sm:$0xff] %v1432_v38  ;;  %v4457_v59 = vadd.f32 %v1533_v27, %v1505_v42  ;;  %v4460_v8 = vmul.f32 %v1322_v53, %v3833_v3 }
  0xda   : > { %v1490_v63 = vadd.f32 %v1482_v17, %v3761_v58  ;;  %v1534_v48 = vmul.f32 %v1322_v53, %v3786_v24  ;;  %v1265_v13 = vsel %vm468_vm0, %v1253_v9, %v1257_v57  ;;  %v1317_v54 = vsel %vm537_vm1, %v1309_v43, %v3648_v7 }
  0xdb   : > { %v1397_v26 = vadd.f32 %v1389_v30, %v1381_v33  ;;  %v1297_v50 = vadd.f32 %v1289_v31, %v1281_v62  ;;  %v1374_v47 = vmul.f32 %v1265_v13, %v3726_v40  ;;  %v1390_v38 = vmul.f32 %v3730_v41, %v4382_v25 }
  0xdc   : > { %v1506_v32 = vadd.f32 %v1498_v18, %v1490_v63  ;;  %v1499_v42 = vmul.f32 %v3673_v20, %v4382_v25  ;;  %v4475_v30 = vmul.f32 %v1317_v54, %v3722_v39  ;;  %v1483_v53 = vmul.f32 %v1265_v13, %v3670_v19 }
  0xdd   : > { %v1433_v27 = vadd.f32 %v1425_v28, %v1397_v26  ;;  %v1333_v9 = vadd.f32 %v4356_v16, %v1297_v50  ;;  %v4480_v21 = vmul.f32 %v1265_v13, %v3694_v29  ;;  %v1258_v43 = vrot.slane %v4418_v10, 7  ;;  %v4504_v26 = vld [vmem:[%s3629_s19 + $0xc0] sm:$0xff] }
  0xde   : > { %v1282_v18 = vadd.f32 %v1274_v4, %v4290_v15  ;;  %v1290_v17 = vmul.f32 %v3812_v49, %v4297_v61  ;;  %v1426_v33 = vmul.f32 %v3751_v52, %v1317_v54  ;;  %v1491_v57 = vadd.f32 %v1483_v53, %v3680_v23 }
  0xdf   : > { %3155 = vst [vmem:[%s3871_s24 + $0x88] sm:$0xff] %v1433_v27  ;;  %v1382_v28 = vadd.f32 %v1374_v47, %v1333_v9  ;;  %v1535_v16 = vmul.f32 %v1317_v54, %v3678_v22  ;;  %v4490_v62 = vadd.f32 %v1534_v48, %v1506_v32  ;;  %v1266_v31 = vsel %vm468_vm0, %v1254_v55, %v1258_v43 }
  0xe0   : > { %v1298_v63 = vadd.f32 %v1290_v17, %v1282_v18  ;;  %v1318_v15 = vsel %vm537_vm1, %v1310_v11, %v3648_v7  ;;  %v1375_v52 = vmul.f32 %v1266_v31, %v3837_v34  ;;  %v1391_v48 = vmul.f32 %v3856_v37, %v4418_v10 }
  0xe1   : > { %v1398_v4 = vadd.f32 %v1390_v38, %v1382_v28  ;;  %v4498_v61 = vmul.f32 %v1318_v15, %v3833_v3  ;;  %v1427_v13 = vmul.f32 %v3847_v35, %v1318_v15  ;;  %v1484_v50 = vmul.f32 %v1266_v31, %v3764_v60  ;;  %v4518_v35 = vld [vmem:[%s3629_s19 + $0xd0] sm:$0xff] }
  0xe2   : > { %v1334_v55 = vadd.f32 %v4395_v0, %v1298_v63  ;;  %v1500_v11 = vmul.f32 %v3777_v5, %v4418_v10  ;;  %v1507_v32 = vadd.f32 %v1499_v42, %v1491_v57  ;;  %v1283_v47 = vadd.f32 %v4412_v2, %v4324_v56 }
  0xe3   : > { %v1434_v54 = vadd.f32 %v1426_v33, %v1398_v4  ;;  %v1291_v38 = vmul.f32 %v3716_v36, %v4370_v12  ;;  %v1492_v9 = vadd.f32 %v1484_v50, %v3761_v58  ;;  %v1536_v0 = vmul.f32 %v1318_v15, %v3786_v24  ;;  %v4537_v4 = vld [vmem:[%s3629_s19 + $0xc8] sm:$0xff] }
  0xe4   : > { %v1383_v27 = vadd.f32 %v1375_v52, %v1334_v55  ;;  %v1354_v53 = vrot.slane %v4504_v26, 7  ;;  %v1392_v42 = vmul.f32 %v3730_v41, %v4504_v26  ;;  %v1406_v56 = vrot.slane %v4504_v26, 1 }
  0xe5   : > { %3156 = vst [vmem:[%s3871_s24 + $0x90] sm:$0xff] %v1434_v54  ;;  %v1299_v43 = vadd.f32 %v1291_v38, %v1283_v47  ;;  %v1410_v2 = vrot.slane %v4518_v35, 1  ;;  %v1508_v18 = vadd.f32 %v1500_v11, %v1492_v9  ;;  %v1501_v28 = vmul.f32 %v3673_v20, %v4504_v26  ;;  %v4546_v54 = vld [vmem:[#allocation6 + $0x10] ss:$0 sm:$0xff] }
  0xe6   : > { %v1399_v12 = vadd.f32 %v1391_v48, %v1383_v27  ;;  %v1370_v17 = vsel %vm468_vm0, %v3646_v6, %v1354_v53  ;;  %v4539_v52 = vadd.f32 %v1535_v16, %v1507_v32  ;;  %v1278_v48 = vmul.f32 %v1266_v31, %v3808_v45  ;;  %v4553_v16 = vld [vmem:[%s3629_s19 + $0xd8] sm:$0xff] }
  0xe7   : > { %v1335_v33 = vadd.f32 %v4432_v51, %v1299_v43  ;;  %v1376_v57 = vmul.f32 %v1370_v17, %v3726_v40  ;;  %v1422_v63 = vsel %vm537_vm1, %v1406_v56, %v1410_v2  ;;  %v1485_v15 = vmul.f32 %v1370_v17, %v3670_v19 }
  0xe8   : > { %v1435_v55 = vadd.f32 %v1427_v13, %v1399_v12  ;;  %v1284_v50 = vadd.f32 %v4447_v14, %v4362_v44  ;;  %v4544_v11 = vadd.f32 %v1536_v0, %v1508_v18  ;;  %v1428_v47 = vmul.f32 %v4546_v54, %v1422_v63  ;;  %v5891_v12 = vld [vmem:[#allocation12_spill] sm:$0xff] }
  0xe9   : > { %v1384_v51 = vadd.f32 %v1376_v57, %v1335_v33  ;;  %v1493_v38 = vadd.f32 %v1485_v15, %v3680_v23  ;;  %v1537_v27 = vmul.f32 %v1422_v63, %v3678_v22  ;;  %v1292_v31 = vmul.f32 %v3812_v49, %v4406_v46 }
  0xea   : > { %3157 = vst [vmem:[%s3871_s24 + $0x98] sm:$0xff] %v1435_v55  ;;  %v1355_v13 = vrot.slane %v4537_v4, 7  ;;  %v1407_v44 = vrot.slane %v4537_v4, 1  ;;  %v1582_v9 = vmul.f32 %v1370_v17, %v3694_v29  ;;  %v1411_v0 = vrot.slane %v4553_v16, 1 }
  0xeb   : > { %v1400_v14 = vadd.f32 %v1392_v42, %v1384_v51  ;;  %v1509_v32 = vadd.f32 %v1501_v28, %v1493_v38  ;;  %v1300_v43 = vadd.f32 %v1292_v31, %v1284_v50  ;;  %v1285_v18 = vadd.f32 %v4480_v21, %v5891_v12 }
  0xec   : > { %v1371_v56 = vsel %vm468_vm0, %v3646_v6, %v1355_v13  ;;  %v1293_v46 = vmul.f32 %v3716_v36, %v4382_v25  ;;  %v4569_v42 = vmul.f32 %v1422_v63, %v3722_v39  ;;  %v1423_v17 = vsel %vm537_vm1, %v1407_v44, %v1411_v0  ;;  %v4583_v63 = vld [vmem:[#allocation6 + $0x18] ss:$0 sm:$0xff] }
  0xed   : > { %v1436_v33 = vadd.f32 %v1428_v47, %v1400_v14  ;;  %v1377_v28 = vmul.f32 %v1371_v56, %v3837_v34  ;;  %v1336_v57 = vadd.f32 %v4460_v8, %v1300_v43  ;;  %v1393_v15 = vmul.f32 %v3856_v37, %v4537_v4 }
  0xee   : > { %v1486_v55 = vmul.f32 %v1371_v56, %v3764_v60  ;;  %v1502_v21 = vmul.f32 %v3777_v5, %v4537_v4  ;;  %v4581_v25 = vadd.f32 %v1537_v27, %v1509_v32  ;;  %v1429_v50 = vmul.f32 %v4583_v63, %v1423_v17 }
  0xef   : > { %3158 = vst [vmem:[%s3871_s24 + $0xa0] sm:$0xff] %v1436_v33  ;;  %v1301_v51 = vadd.f32 %v1293_v46, %v1285_v18  ;;  %v1358_v47 = vrot.slane %v4518_v35, 7  ;;  %v1385_v38 = vadd.f32 %v1377_v28, %v1336_v57  ;;  %v1538_v31 = vmul.f32 %v1423_v17, %v3786_v24  ;;  %v5892_v28 = vld [vmem:[#allocation16_spill] sm:$0xff] }
  0xf0   : > { %v1494_v8 = vadd.f32 %v1486_v55, %v3761_v58  ;;  %v4590_v44 = vmul.f32 %v1371_v56, %v3808_v45  ;;  %v1394_v32 = vmul.f32 %v3730_v41, %v4518_v35  ;;  %v1418_v43 = vsel %vm537_vm1, %v1410_v2, %v3648_v7 }
  0xf1   : > { %v1337_v14 = vadd.f32 %v4475_v30, %v1301_v51  ;;  %v1366_v27 = vsel %vm468_vm0, %v1354_v53, %v1358_v47  ;;  %v1401_v12 = vadd.f32 %v1393_v15, %v1385_v38  ;;  %v4603_v33 = vmul.f32 %v1423_v17, %v3833_v3 }
  0xf2   : > { %v1510_v18 = vadd.f32 %v1502_v21, %v1494_v8  ;;  %v1378_v46 = vmul.f32 %v1366_v27, %v3726_v40  ;;  %v1487_v56 = vmul.f32 %v1366_v27, %v3670_v19  ;;  %v1430_v30 = vmul.f32 %v4546_v54, %v1418_v43 }
  0xf3   : > { %v1503_v53 = vmul.f32 %v3673_v20, %v4518_v35  ;;  %v1286_v57 = vadd.f32 %v1278_v48, %v5892_v28  ;;  %v1437_v55 = vadd.f32 %v1429_v50, %v1401_v12  ;;  %v1539_v21 = vmul.f32 %v1418_v43, %v3678_v22 }
  0xf4   : > { %v1386_v2 = vadd.f32 %v1378_v46, %v1337_v14  ;;  %v1495_v15 = vadd.f32 %v1487_v56, %v3680_v23  ;;  %v4612_v51 = vmul.f32 %v1366_v27, %v3694_v29  ;;  %v4615_v17 = vmul.f32 %v1418_v43, %v3722_v39  ;;  %v4629_v27 = vld [vmem:[%s3629_s19 + $0xe0] sm:$0xff] }
  0xf5   : > { %v1294_v47 = vmul.f32 %v3812_v49, %v4418_v10  ;;  %v1359_v38 = vrot.slane %v4553_v16, 7  ;;  %3159 = vst [vmem:[%s3871_s24 + $0xa8] sm:$0xff] %v1437_v55  ;;  %v4621_v48 = vadd.f32 %v1538_v31, %v1510_v18  ;;  %v1395_v8 = vmul.f32 %v3856_v37, %v4553_v16  ;;  %v4641_v55 = vld [vmem:[%s3629_s19 + $0xf0] sm:$0xff] }
  0xf6   : > { %v1402_v50 = vadd.f32 %v1394_v32, %v1386_v2  ;;  %v1419_v14 = vsel %vm537_vm1, %v1411_v0, %v3648_v7  ;;  %v1511_v43 = vadd.f32 %v1503_v53, %v1495_v15  ;;  %v1504_v56 = vmul.f32 %v3777_v5, %v4553_v16 }
  0xf7   : > { %v1302_v12 = vadd.f32 %v1294_v47, %v1286_v57  ;;  %v1367_v10 = vsel %vm468_vm0, %v1355_v13, %v1359_v38  ;;  %v1431_v46 = vmul.f32 %v4583_v63, %v1419_v14  ;;  %v1540_v0 = vmul.f32 %v1419_v14, %v3786_v24 }
  0xf8   : > { %v1438_v31 = vadd.f32 %v1430_v30, %v1402_v50  ;;  %v1379_v32 = vmul.f32 %v1367_v10, %v3837_v34  ;;  %v1488_v18 = vmul.f32 %v1367_v10, %v3764_v60  ;;  %v1564_v53 = vrot.slane %v4629_v27, 7 }
  0xf9   : > { %v1338_v28 = vadd.f32 %v4498_v61, %v1302_v12  ;;  %v1590_v13 = vadd.f32 %v1582_v9, %v4457_v59  ;;  %v1598_v57 = vmul.f32 %v3716_v36, %v4504_v26  ;;  %v1616_v2 = vrot.slane %v4629_v27, 1 }
  0xfa   : > { %3160 = vst [vmem:[%s3871_s24 + $0xb0] sm:$0xff] %v1438_v31  ;;  %v1496_v30 = vadd.f32 %v1488_v18, %v3761_v58  ;;  %v1620_v15 = vrot.slane %v4641_v55, 1  ;;  %v4651_v61 = vadd.f32 %v1539_v21, %v1511_v43  ;;  %v4654_v38 = vmul.f32 %v1419_v14, %v3833_v3  ;;  %v4665_v21 = vld [vmem:[%s3629_s19 + $0xe8] sm:$0xff] }
  0xfb   : > { %v1387_v47 = vadd.f32 %v1379_v32, %v1338_v28  ;;  %v1580_v59 = vsel %vm468_vm0, %v3646_v6, %v1564_v53  ;;  %v1585_v9 = vmul.f32 %v1367_v10, %v3808_v45  ;;  %v1606_v50 = vadd.f32 %v1598_v57, %v1590_v13 }
  0xfc   : > { %5893 = vst [vmem:[#allocation18_spill] sm:$0xff] %v4651_v61  ;;  %v1699_v26 = vmul.f32 %v3730_v41, %v4629_v27  ;;  %v1808_v12 = vmul.f32 %v3673_v20, %v4629_v27  ;;  %v1512_v31 = vadd.f32 %v1504_v56, %v1496_v30  ;;  %v1632_v14 = vsel %vm537_vm1, %v1616_v2, %v1620_v15  ;;  %v4677_v61 = vld [vmem:[%s3629_s19 + $0xf8] sm:$0xff] }
  0xfd   : > { %v1403_v43 = vadd.f32 %v1395_v8, %v1387_v47  ;;  %v1683_v32 = vmul.f32 %v1580_v59, %v3726_v40  ;;  %v4671_v18 = vmul.f32 %v1580_v59, %v3694_v29  ;;  %v1642_v10 = vadd.f32 %v4569_v42, %v1606_v50 }
  0xfe   : > { %v1735_v28 = vmul.f32 %v4546_v54, %v1632_v14  ;;  %v1792_v13 = vmul.f32 %v1580_v59, %v3670_v19  ;;  %v1565_v8 = vrot.slane %v4665_v21, 7  ;;  %v1591_v56 = vadd.f32 %v4590_v44, %v4490_v62 }
  0xff   : > { %v1439_v57 = vadd.f32 %v1431_v46, %v1403_v43  ;;  %v1599_v30 = vmul.f32 %v3812_v49, %v4537_v4  ;;  %v1691_v2 = vadd.f32 %v1683_v32, %v1642_v10  ;;  %v1617_v42 = vrot.slane %v4665_v21, 1 }
 0x100   : > { %v1800_v47 = vadd.f32 %v1792_v13, %v3680_v23  ;;  %v1621_v50 = vrot.slane %v4677_v61, 1  ;;  %v4688_v59 = vadd.f32 %v1540_v0, %v1512_v31  ;;  %v4691_v46 = vmul.f32 %v1632_v14, %v3722_v39 }
 0x101   : > { %3161 = vst [vmem:[%s3871_s24 + $0xb8] sm:$0xff] %v1439_v57  ;;  %v1581_v62 = vsel %vm468_vm0, %v3646_v6, %v1565_v8  ;;  %v1607_v44 = vadd.f32 %v1599_v30, %v1591_v56  ;;  %v1707_v43 = vadd.f32 %v1699_v26, %v1691_v2  ;;  %v1844_v32 = vmul.f32 %v1632_v14, %v3678_v22 }
 0x102   : > { %5894 = vst [vmem:[#allocation13_spill] sm:$0xff] %v4688_v59  ;;  %v1816_v4 = vadd.f32 %v1808_v12, %v1800_v47  ;;  %v1700_v10 = vmul.f32 %v3856_v37, %v4665_v21  ;;  %v1633_v0 = vsel %vm537_vm1, %v1617_v42, %v1621_v50  ;;  %v1684_v13 = vmul.f32 %v1581_v62, %v3837_v34 }
 0x103   : > { %v1643_v31 = vadd.f32 %v4603_v33, %v1607_v44  ;;  %v1809_v57 = vmul.f32 %v3777_v5, %v4665_v21  ;;  %v1743_v59 = vadd.f32 %v1735_v28, %v1707_v43  ;;  %v4706_v26 = vmul.f32 %v1581_v62, %v3808_v45 }
 0x104   : > { %v1736_v12 = vmul.f32 %v4583_v63, %v1633_v0  ;;  %v1793_v14 = vmul.f32 %v1581_v62, %v3764_v60  ;;  %v1568_v30 = vrot.slane %v4641_v55, 7  ;;  %v1592_v2 = vadd.f32 %v4612_v51, %v4539_v52 }
 0x105   : > { %v1692_v56 = vadd.f32 %v1684_v13, %v1643_v31  ;;  %v1600_v33 = vmul.f32 %v3716_v36, %v4518_v35  ;;  %3162 = vst [vmem:[%s3871_s24 + $0xc0] sm:$0xff] %v1743_v59  ;;  %v4716_v47 = vadd.f32 %v1844_v32, %v1816_v4  ;;  %v4719_v28 = vmul.f32 %v1633_v0, %v3833_v3 }
 0x106   : > { %v1801_v42 = vadd.f32 %v1793_v14, %v3761_v58  ;;  %v1845_v44 = vmul.f32 %v1633_v0, %v3786_v24  ;;  %v1576_v43 = vsel %vm468_vm0, %v1564_v53, %v1568_v30  ;;  %v1628_v35 = vsel %vm537_vm1, %v1620_v15, %v3648_v7 }
 0x107   : > { %v1708_v62 = vadd.f32 %v1700_v10, %v1692_v56  ;;  %v1608_v31 = vadd.f32 %v1600_v33, %v1592_v2  ;;  %v1685_v51 = vmul.f32 %v1576_v43, %v3726_v40  ;;  %v1701_v59 = vmul.f32 %v3730_v41, %v4641_v55 }
 0x108   : > { %v1817_v52 = vadd.f32 %v1809_v57, %v1801_v42  ;;  %v1810_v4 = vmul.f32 %v3673_v20, %v4641_v55  ;;  %v4734_v10 = vmul.f32 %v1628_v35, %v3722_v39  ;;  %v1794_v0 = vmul.f32 %v1576_v43, %v3670_v19 }
 0x109   : > { %v1744_v32 = vadd.f32 %v1736_v12, %v1708_v62  ;;  %v1644_v53 = vadd.f32 %v4615_v17, %v1608_v31  ;;  %v4739_v13 = vmul.f32 %v1576_v43, %v3694_v29  ;;  %v1569_v15 = vrot.slane %v4677_v61, 7  ;;  %v4763_v43 = vld [vmem:[%s3629_s19 + $0x100] sm:$0xff] }
 0x10a   : > { %v1593_v57 = vadd.f32 %v1585_v9, %v4544_v11  ;;  %v1601_v14 = vmul.f32 %v3812_v49, %v4553_v16  ;;  %v1737_v56 = vmul.f32 %v4546_v54, %v1628_v35  ;;  %v1802_v30 = vadd.f32 %v1794_v0, %v3680_v23 }
 0x10b   : > { %3163 = vst [vmem:[%s3871_s24 + $0xc8] sm:$0xff] %v1744_v32  ;;  %v1693_v12 = vadd.f32 %v1685_v51, %v1644_v53  ;;  %v1846_v17 = vmul.f32 %v1628_v35, %v3678_v22  ;;  %v4749_v2 = vadd.f32 %v1845_v44, %v1817_v52  ;;  %v1577_v33 = vsel %vm468_vm0, %v1565_v8, %v1569_v15  ;;  %v4777_v15 = vld [vmem:[%s3629_s19 + $0x110] sm:$0xff] }
 0x10c   : > { %v1609_v42 = vadd.f32 %v1601_v14, %v1593_v57  ;;  %v1629_v11 = vsel %vm537_vm1, %v1621_v50, %v3648_v7  ;;  %v1686_v62 = vmul.f32 %v1577_v33, %v3837_v34  ;;  %v1702_v44 = vmul.f32 %v3856_v37, %v4677_v61 }
 0x10d   : > { %v1709_v9 = vadd.f32 %v1701_v59, %v1693_v12  ;;  %v4757_v16 = vmul.f32 %v1629_v11, %v3833_v3  ;;  %v1738_v31 = vmul.f32 %v4583_v63, %v1629_v11  ;;  %v1795_v35 = vmul.f32 %v1577_v33, %v3764_v60 }
 0x10e   : > { %v1645_v8 = vadd.f32 %v4654_v38, %v1609_v42  ;;  %v1811_v50 = vmul.f32 %v3777_v5, %v4677_v61  ;;  %v1818_v51 = vadd.f32 %v1810_v4, %v1802_v30  ;;  %v1594_v59 = vadd.f32 %v4671_v18, %v4581_v25 }
 0x10f   : > { %v1745_v52 = vadd.f32 %v1737_v56, %v1709_v9  ;;  %v1602_v32 = vmul.f32 %v3716_v36, %v4629_v27  ;;  %v1803_v0 = vadd.f32 %v1795_v35, %v3761_v58  ;;  %v1847_v38 = vmul.f32 %v1629_v11, %v3786_v24 }
 0x110   : > { %v1694_v53 = vadd.f32 %v1686_v62, %v1645_v8  ;;  %v1665_v57 = vrot.slane %v4763_v43, 7  ;;  %v1703_v4 = vmul.f32 %v3730_v41, %v4763_v43  ;;  %v1717_v25 = vrot.slane %v4763_v43, 1 }
 0x111   : > { %3164 = vst [vmem:[%s3871_s24 + $0xd0] sm:$0xff] %v1745_v52  ;;  %v1610_v14 = vadd.f32 %v1602_v32, %v1594_v59  ;;  %v1721_v18 = vrot.slane %v4777_v15, 1  ;;  %v1819_v12 = vadd.f32 %v1811_v50, %v1803_v0  ;;  %v1812_v30 = vmul.f32 %v3673_v20, %v4763_v43 }
 0x112   : > { %v1710_v27 = vadd.f32 %v1702_v44, %v1694_v53  ;;  %v1681_v56 = vsel %vm468_vm0, %v3646_v6, %v1665_v57  ;;  %v4796_v44 = vld [vmem:[%s3629_s19 + $0x108] sm:$0xff]  ;;  %v4798_v8 = vadd.f32 %v1846_v17, %v1818_v51  ;;  %v1589_v35 = vmul.f32 %v1577_v33, %v3808_v45 }
 0x113   : > { %v1646_v42 = vadd.f32 %v4691_v46, %v1610_v14  ;;  %v1687_v11 = vmul.f32 %v1681_v56, %v3726_v40  ;;  %v1733_v9 = vsel %vm537_vm1, %v1717_v25, %v1721_v18  ;;  %v1796_v62 = vmul.f32 %v1681_v56, %v3670_v19  ;;  %v4810_v14 = vld [vmem:[%s3629_s19 + $0x118] sm:$0xff] }
 0x114   : > { %v1746_v50 = vadd.f32 %v1738_v31, %v1710_v27  ;;  %v1595_v52 = vadd.f32 %v4706_v26, %v4621_v48  ;;  %v4803_v59 = vadd.f32 %v1847_v38, %v1819_v12  ;;  %v1739_v32 = vmul.f32 %v4546_v54, %v1733_v9  ;;  %v5895_v12 = vld [vmem:[#allocation18_spill] sm:$0xff] }
 0x115   : > { %v1695_v46 = vadd.f32 %v1687_v11, %v1646_v42  ;;  %v1804_v53 = vadd.f32 %v1796_v62, %v3680_v23  ;;  %v1848_v0 = vmul.f32 %v1733_v9, %v3678_v22  ;;  %v1603_v17 = vmul.f32 %v3812_v49, %v4665_v21 }
 0x116   : > { %3165 = vst [vmem:[%s3871_s24 + $0xd8] sm:$0xff] %v1746_v50  ;;  %v1666_v33 = vrot.slane %v4796_v44, 7  ;;  %v1718_v31 = vrot.slane %v4796_v44, 1  ;;  %v1893_v51 = vmul.f32 %v1681_v56, %v3694_v29  ;;  %v1722_v38 = vrot.slane %v4810_v14, 1 }
 0x117   : > { %v1711_v48 = vadd.f32 %v1703_v4, %v1695_v46  ;;  %v1820_v26 = vadd.f32 %v1812_v30, %v1804_v53  ;;  %v1611_v25 = vadd.f32 %v1603_v17, %v1595_v52  ;;  %v1596_v42 = vadd.f32 %v4739_v13, %v5895_v12 }
 0x118   : > { %v1682_v27 = vsel %vm468_vm0, %v3646_v6, %v1666_v33  ;;  %v1604_v21 = vmul.f32 %v3716_v36, %v4641_v55  ;;  %v4826_v4 = vmul.f32 %v1733_v9, %v3722_v39  ;;  %v1734_v56 = vsel %vm537_vm1, %v1718_v31, %v1722_v38 }
 0x119   : > { %v1747_v11 = vadd.f32 %v1739_v32, %v1711_v48  ;;  %v1688_v30 = vmul.f32 %v1682_v27, %v3837_v34  ;;  %v1647_v62 = vadd.f32 %v4719_v28, %v1611_v25  ;;  %v1704_v50 = vmul.f32 %v3856_v37, %v4796_v44 }
 0x11a   : > { %v1797_v52 = vmul.f32 %v1682_v27, %v3764_v60  ;;  %v1813_v13 = vmul.f32 %v3777_v5, %v4796_v44  ;;  %v4838_v55 = vadd.f32 %v1848_v0, %v1820_v26  ;;  %v1740_v9 = vmul.f32 %v4583_v63, %v1734_v56 }
 0x11b   : > { %3166 = vst [vmem:[%s3871_s24 + $0xe0] sm:$0xff] %v1747_v11  ;;  %v1612_v46 = vadd.f32 %v1604_v21, %v1596_v42  ;;  %v1669_v32 = vrot.slane %v4777_v15, 7  ;;  %v1696_v53 = vadd.f32 %v1688_v30, %v1647_v62  ;;  %v1849_v28 = vmul.f32 %v1734_v56, %v3786_v24  ;;  %v5896_v30 = vld [vmem:[#allocation13_spill] sm:$0xff] }
 0x11c   : > { %v1805_v17 = vadd.f32 %v1797_v52, %v3761_v58  ;;  %v4845_v31 = vmul.f32 %v1682_v27, %v3808_v45  ;;  %v1705_v0 = vmul.f32 %v3730_v41, %v4777_v15  ;;  %v1729_v26 = vsel %vm537_vm1, %v1721_v18, %v3648_v7 }
 0x11d   : > { %v1648_v48 = vadd.f32 %v4734_v10, %v1612_v46  ;;  %v1677_v25 = vsel %vm468_vm0, %v1665_v57, %v1669_v32  ;;  %v1712_v12 = vadd.f32 %v1704_v50, %v1696_v53  ;;  %v4858_v11 = vmul.f32 %v1734_v56, %v3833_v3 }
 0x11e   : > { %v1821_v42 = vadd.f32 %v1813_v13, %v1805_v17  ;;  %v1689_v21 = vmul.f32 %v1677_v25, %v3726_v40  ;;  %v1798_v27 = vmul.f32 %v1677_v25, %v3670_v19  ;;  %v1741_v10 = vmul.f32 %v4546_v54, %v1729_v26 }
 0x11f   : > { %v1814_v57 = vmul.f32 %v3673_v20, %v4777_v15  ;;  %v1597_v62 = vadd.f32 %v1589_v35, %v5896_v30  ;;  %v1748_v52 = vadd.f32 %v1740_v9, %v1712_v12  ;;  %v1850_v13 = vmul.f32 %v1729_v26, %v3678_v22 }
 0x120   : > { %v1697_v18 = vadd.f32 %v1689_v21, %v1648_v48  ;;  %v1806_v50 = vadd.f32 %v1798_v27, %v3680_v23  ;;  %v4867_v46 = vmul.f32 %v1677_v25, %v3694_v29  ;;  %v4870_v56 = vmul.f32 %v1729_v26, %v3722_v39  ;;  %v4884_v25 = vld [vmem:[%s3629_s19 + $0x120] sm:$0xff] }
 0x121   : > { %v1605_v32 = vmul.f32 %v3812_v49, %v4677_v61  ;;  %v1670_v53 = vrot.slane %v4810_v14, 7  ;;  %3167 = vst [vmem:[%s3871_s24 + $0xe8] sm:$0xff] %v1748_v52  ;;  %v4876_v35 = vadd.f32 %v1849_v28, %v1821_v42  ;;  %v1706_v17 = vmul.f32 %v3856_v37, %v4810_v14  ;;  %v4896_v52 = vld [vmem:[%s3629_s19 + $0x130] sm:$0xff] }
 0x122   : > { %v1713_v9 = vadd.f32 %v1705_v0, %v1697_v18  ;;  %v1730_v48 = vsel %vm537_vm1, %v1722_v38, %v3648_v7  ;;  %v1822_v26 = vadd.f32 %v1814_v57, %v1806_v50  ;;  %v1815_v27 = vmul.f32 %v3777_v5, %v4810_v14 }
 0x123   : > { %v1613_v12 = vadd.f32 %v1605_v32, %v1597_v62  ;;  %v1678_v61 = vsel %vm468_vm0, %v1666_v33, %v1670_v53  ;;  %v1742_v21 = vmul.f32 %v4583_v63, %v1730_v48  ;;  %v1851_v38 = vmul.f32 %v1730_v48, %v3786_v24 }
 0x124   : > { %v1749_v28 = vadd.f32 %v1741_v10, %v1713_v9  ;;  %v1690_v0 = vmul.f32 %v1678_v61, %v3837_v34  ;;  %v1799_v42 = vmul.f32 %v1678_v61, %v3764_v60  ;;  %v1875_v57 = vrot.slane %v4884_v25, 7 }
 0x125   : > { %v1649_v30 = vadd.f32 %v4757_v16, %v1613_v12  ;;  %v1901_v33 = vadd.f32 %v1893_v51, %v4716_v47  ;;  %v1909_v62 = vmul.f32 %v3716_v36, %v4763_v43  ;;  %v1927_v18 = vrot.slane %v4884_v25, 1 }
 0x126   : > { %3168 = vst [vmem:[%s3871_s24 + $0xf0] sm:$0xff] %v1749_v28  ;;  %v1807_v10 = vadd.f32 %v1799_v42, %v3761_v58  ;;  %v1931_v50 = vrot.slane %v4896_v52, 1  ;;  %v4906_v16 = vadd.f32 %v1850_v13, %v1822_v26  ;;  %v4909_v53 = vmul.f32 %v1730_v48, %v3833_v3  ;;  %v4920_v13 = vld [vmem:[%s3629_s19 + $0x128] sm:$0xff] }
 0x127   : > { %v1698_v32 = vadd.f32 %v1690_v0, %v1649_v30  ;;  %v1891_v47 = vsel %vm468_vm0, %v3646_v6, %v1875_v57  ;;  %v1896_v51 = vmul.f32 %v1678_v61, %v3808_v45  ;;  %v1917_v9 = vadd.f32 %v1909_v62, %v1901_v33 }
 0x128   : > { %5897 = vst [vmem:[#allocation17_spill] sm:$0xff] %v4906_v16  ;;  %v2010_v43 = vmul.f32 %v3730_v41, %v4884_v25  ;;  %v2119_v12 = vmul.f32 %v3673_v20, %v4884_v25  ;;  %v1823_v28 = vadd.f32 %v1815_v27, %v1807_v10  ;;  %v1943_v48 = vsel %vm537_vm1, %v1927_v18, %v1931_v50  ;;  %v4932_v16 = vld [vmem:[%s3629_s19 + $0x138] sm:$0xff] }
 0x129   : > { %v1714_v26 = vadd.f32 %v1706_v17, %v1698_v32  ;;  %v1994_v0 = vmul.f32 %v1891_v47, %v3726_v40  ;;  %v4926_v42 = vmul.f32 %v1891_v47, %v3694_v29  ;;  %v1953_v61 = vadd.f32 %v4826_v4, %v1917_v9 }
 0x12a   : > { %v2046_v30 = vmul.f32 %v4546_v54, %v1943_v48  ;;  %v2103_v33 = vmul.f32 %v1891_v47, %v3670_v19  ;;  %v1876_v17 = vrot.slane %v4920_v13, 7  ;;  %v1902_v27 = vadd.f32 %v4845_v31, %v4749_v2 }
 0x12b   : > { %v1750_v62 = vadd.f32 %v1742_v21, %v1714_v26  ;;  %v1910_v10 = vmul.f32 %v3812_v49, %v4796_v44  ;;  %v2002_v18 = vadd.f32 %v1994_v0, %v1953_v61  ;;  %v1928_v4 = vrot.slane %v4920_v13, 1 }
 0x12c   : > { %v2111_v32 = vadd.f32 %v2103_v33, %v3680_v23  ;;  %v1932_v9 = vrot.slane %v4932_v16, 1  ;;  %v4943_v47 = vadd.f32 %v1851_v38, %v1823_v28  ;;  %v4946_v21 = vmul.f32 %v1943_v48, %v3722_v39 }
 0x12d   : > { %3169 = vst [vmem:[%s3871_s24 + $0xf8] sm:$0xff] %v1750_v62  ;;  %v1892_v2 = vsel %vm468_vm0, %v3646_v6, %v1876_v17  ;;  %v1918_v31 = vadd.f32 %v1910_v10, %v1902_v27  ;;  %v2018_v26 = vadd.f32 %v2010_v43, %v2002_v18  ;;  %v2155_v0 = vmul.f32 %v1943_v48, %v3678_v22 }
 0x12e   : > { %5898 = vst [vmem:[#allocation19_spill] sm:$0xff] %v4943_v47  ;;  %v2127_v44 = vadd.f32 %v2119_v12, %v2111_v32  ;;  %v2011_v61 = vmul.f32 %v3856_v37, %v4920_v13  ;;  %v1944_v38 = vsel %vm537_vm1, %v1928_v4, %v1932_v9  ;;  %v1995_v33 = vmul.f32 %v1892_v2, %v3837_v34 }
 0x12f   : > { %v1954_v28 = vadd.f32 %v4858_v11, %v1918_v31  ;;  %v2120_v62 = vmul.f32 %v3777_v5, %v4920_v13  ;;  %v2054_v47 = vadd.f32 %v2046_v30, %v2018_v26  ;;  %v4961_v43 = vmul.f32 %v1892_v2, %v3808_v45 }
 0x130   : > { %v2047_v12 = vmul.f32 %v4583_v63, %v1944_v38  ;;  %v2104_v48 = vmul.f32 %v1892_v2, %v3764_v60  ;;  %v1879_v10 = vrot.slane %v4896_v52, 7  ;;  %v1903_v18 = vadd.f32 %v4867_v46, %v4798_v8 }
 0x131   : > { %v2003_v27 = vadd.f32 %v1995_v33, %v1954_v28  ;;  %v1911_v11 = vmul.f32 %v3716_v36, %v4777_v15  ;;  %3170 = vst [vmem:[%s3871_s24 + $0x100] sm:$0xff] %v2054_v47  ;;  %v4971_v32 = vadd.f32 %v2155_v0, %v2127_v44  ;;  %v4974_v30 = vmul.f32 %v1944_v38, %v3833_v3 }
 0x132   : > { %v2112_v4 = vadd.f32 %v2104_v48, %v3761_v58  ;;  %v2156_v31 = vmul.f32 %v1944_v38, %v3786_v24  ;;  %v1887_v26 = vsel %vm468_vm0, %v1875_v57, %v1879_v10  ;;  %v1939_v15 = vsel %vm537_vm1, %v1931_v50, %v3648_v7 }
 0x133   : > { %v2019_v2 = vadd.f32 %v2011_v61, %v2003_v27  ;;  %v1919_v28 = vadd.f32 %v1911_v11, %v1903_v18  ;;  %v1996_v46 = vmul.f32 %v1887_v26, %v3726_v40  ;;  %v2012_v47 = vmul.f32 %v3730_v41, %v4896_v52 }
 0x134   : > { %v2128_v8 = vadd.f32 %v2120_v62, %v2112_v4  ;;  %v2121_v44 = vmul.f32 %v3673_v20, %v4896_v52  ;;  %v4989_v61 = vmul.f32 %v1939_v15, %v3722_v39  ;;  %v2105_v38 = vmul.f32 %v1887_v26, %v3670_v19 }
 0x135   : > { %v2055_v0 = vadd.f32 %v2047_v12, %v2019_v2  ;;  %v1955_v57 = vadd.f32 %v4870_v56, %v1919_v28  ;;  %v4994_v33 = vmul.f32 %v1887_v26, %v3694_v29  ;;  %v1880_v50 = vrot.slane %v4932_v16, 7  ;;  %v5018_v26 = vld [vmem:[%s3629_s19 + $0x140] sm:$0xff] }
 0x136   : > { %v1904_v62 = vadd.f32 %v1896_v51, %v4803_v59  ;;  %v1912_v48 = vmul.f32 %v3812_v49, %v4810_v14  ;;  %v2048_v27 = vmul.f32 %v4546_v54, %v1939_v15  ;;  %v2113_v10 = vadd.f32 %v2105_v38, %v3680_v23 }
 0x137   : > { %3171 = vst [vmem:[%s3871_s24 + $0x108] sm:$0xff] %v2055_v0  ;;  %v2004_v12 = vadd.f32 %v1996_v46, %v1955_v57  ;;  %v2157_v56 = vmul.f32 %v1939_v15, %v3678_v22  ;;  %v5004_v18 = vadd.f32 %v2156_v31, %v2128_v8  ;;  %v1888_v11 = vsel %vm468_vm0, %v1876_v17, %v1880_v50  ;;  %v5032_v50 = vld [vmem:[%s3629_s19 + $0x150] sm:$0xff] }
 0x138   : > { %v1920_v4 = vadd.f32 %v1912_v48, %v1904_v62  ;;  %v1940_v59 = vsel %vm537_vm1, %v1932_v9, %v3648_v7  ;;  %v1997_v2 = vmul.f32 %v1888_v11, %v3837_v34  ;;  %v2013_v31 = vmul.f32 %v3856_v37, %v4932_v16 }
 0x139   : > { %v2020_v51 = vadd.f32 %v2012_v47, %v2004_v12  ;;  %v5012_v14 = vmul.f32 %v1940_v59, %v3833_v3  ;;  %v2049_v28 = vmul.f32 %v4583_v63, %v1940_v59  ;;  %v2106_v15 = vmul.f32 %v1888_v11, %v3764_v60 }
 0x13a   : > { %v1956_v17 = vadd.f32 %v4909_v53, %v1920_v4  ;;  %v2122_v9 = vmul.f32 %v3777_v5, %v4932_v16  ;;  %v2129_v46 = vadd.f32 %v2121_v44, %v2113_v10  ;;  %v1905_v47 = vadd.f32 %v4926_v42, %v4838_v55 }
 0x13b   : > { %v2056_v8 = vadd.f32 %v2048_v27, %v2020_v51  ;;  %v1913_v0 = vmul.f32 %v3716_v36, %v4884_v25  ;;  %v2114_v38 = vadd.f32 %v2106_v15, %v3761_v58  ;;  %v2158_v53 = vmul.f32 %v1940_v59, %v3786_v24 }
 0x13c   : > { %v2005_v57 = vadd.f32 %v1997_v2, %v1956_v17  ;;  %v1976_v62 = vrot.slane %v5018_v26, 7  ;;  %v2014_v44 = vmul.f32 %v3730_v41, %v5018_v26  ;;  %v2028_v55 = vrot.slane %v5018_v26, 1 }
 0x13d   : > { %3172 = vst [vmem:[%s3871_s24 + $0x110] sm:$0xff] %v2056_v8  ;;  %v1921_v48 = vadd.f32 %v1913_v0, %v1905_v47  ;;  %v2032_v42 = vrot.slane %v5032_v50, 1  ;;  %v2130_v12 = vadd.f32 %v2122_v9, %v2114_v38  ;;  %v2123_v10 = vmul.f32 %v3673_v20, %v5018_v26 }
 0x13e   : > { %v2021_v25 = vadd.f32 %v2013_v31, %v2005_v57  ;;  %v1992_v27 = vsel %vm468_vm0, %v3646_v6, %v1976_v62  ;;  %v5051_v31 = vld [vmem:[%s3629_s19 + $0x148] sm:$0xff]  ;;  %v5053_v17 = vadd.f32 %v2157_v56, %v2129_v46  ;;  %v1900_v15 = vmul.f32 %v1888_v11, %v3808_v45 }
 0x13f   : > { %v1957_v4 = vadd.f32 %v4946_v21, %v1921_v48  ;;  %v1998_v59 = vmul.f32 %v1992_v27, %v3726_v40  ;;  %v2044_v51 = vsel %vm537_vm1, %v2028_v55, %v2032_v42  ;;  %v2107_v2 = vmul.f32 %v1992_v27, %v3670_v19  ;;  %v5065_v48 = vld [vmem:[%s3629_s19 + $0x158] sm:$0xff] }
 0x140   : > { %v2057_v9 = vadd.f32 %v2049_v28, %v2021_v25  ;;  %v1906_v8 = vadd.f32 %v4961_v43, %v4876_v35  ;;  %v5058_v47 = vadd.f32 %v2158_v53, %v2130_v12  ;;  %v2050_v0 = vmul.f32 %v4546_v54, %v2044_v51  ;;  %v5899_v12 = vld [vmem:[#allocation17_spill] sm:$0xff] }
 0x141   : > { %v2006_v21 = vadd.f32 %v1998_v59, %v1957_v4  ;;  %v2115_v57 = vadd.f32 %v2107_v2, %v3680_v23  ;;  %v2159_v38 = vmul.f32 %v2044_v51, %v3678_v22  ;;  %v1914_v56 = vmul.f32 %v3812_v49, %v4920_v13 }
 0x142   : > { %3173 = vst [vmem:[%s3871_s24 + $0x118] sm:$0xff] %v2057_v9  ;;  %v1977_v11 = vrot.slane %v5051_v31, 7  ;;  %v2029_v28 = vrot.slane %v5051_v31, 1  ;;  %v2204_v46 = vmul.f32 %v1992_v27, %v3694_v29  ;;  %v2033_v53 = vrot.slane %v5065_v48, 1 }
 0x143   : > { %v2022_v35 = vadd.f32 %v2014_v44, %v2006_v21  ;;  %v2131_v43 = vadd.f32 %v2123_v10, %v2115_v57  ;;  %v1922_v55 = vadd.f32 %v1914_v56, %v1906_v8  ;;  %v1907_v4 = vadd.f32 %v4994_v33, %v5899_v12 }
 0x144   : > { %v1993_v25 = vsel %vm468_vm0, %v3646_v6, %v1977_v11  ;;  %v1915_v13 = vmul.f32 %v3716_v36, %v4896_v52  ;;  %v5081_v44 = vmul.f32 %v2044_v51, %v3722_v39  ;;  %v2045_v27 = vsel %vm537_vm1, %v2029_v28, %v2033_v53 }
 0x145   : > { %v2058_v59 = vadd.f32 %v2050_v0, %v2022_v35  ;;  %v1999_v10 = vmul.f32 %v1993_v25, %v3837_v34  ;;  %v1958_v2 = vadd.f32 %v4974_v30, %v1922_v55  ;;  %v2015_v9 = vmul.f32 %v3856_v37, %v5051_v31 }
 0x146   : > { %v2108_v8 = vmul.f32 %v1993_v25, %v3764_v60  ;;  %v2124_v33 = vmul.f32 %v3777_v5, %v5051_v31  ;;  %v5093_v52 = vadd.f32 %v2159_v38, %v2131_v43  ;;  %v2051_v51 = vmul.f32 %v4583_v63, %v2045_v27 }
 0x147   : > { %3174 = vst [vmem:[%s3871_s24 + $0x120] sm:$0xff] %v2058_v59  ;;  %v1923_v21 = vadd.f32 %v1915_v13, %v1907_v4  ;;  %v1980_v0 = vrot.slane %v5032_v50, 7  ;;  %v2007_v57 = vadd.f32 %v1999_v10, %v1958_v2  ;;  %v2160_v30 = vmul.f32 %v2045_v27, %v3786_v24  ;;  %v5900_v10 = vld [vmem:[#allocation19_spill] sm:$0xff] }
 0x148   : > { %v2116_v56 = vadd.f32 %v2108_v8, %v3761_v58  ;;  %v5100_v28 = vmul.f32 %v1993_v25, %v3808_v45  ;;  %v2016_v38 = vmul.f32 %v3730_v41, %v5032_v50  ;;  %v2040_v43 = vsel %vm537_vm1, %v2032_v42, %v3648_v7 }
 0x149   : > { %v1959_v35 = vadd.f32 %v4989_v61, %v1923_v21  ;;  %v1988_v55 = vsel %vm468_vm0, %v1976_v62, %v1980_v0  ;;  %v2023_v12 = vadd.f32 %v2015_v9, %v2007_v57  ;;  %v5113_v59 = vmul.f32 %v2045_v27, %v3833_v3 }
 0x14a   : > { %v2132_v4 = vadd.f32 %v2124_v33, %v2116_v56  ;;  %v2000_v13 = vmul.f32 %v1988_v55, %v3726_v40  ;;  %v2109_v25 = vmul.f32 %v1988_v55, %v3670_v19  ;;  %v2052_v61 = vmul.f32 %v4546_v54, %v2040_v43 }
 0x14b   : > { %v2125_v62 = vmul.f32 %v3673_v20, %v5032_v50  ;;  %v1908_v2 = vadd.f32 %v1900_v15, %v5900_v10  ;;  %v2059_v8 = vadd.f32 %v2051_v51, %v2023_v12  ;;  %v2161_v33 = vmul.f32 %v2040_v43, %v3678_v22 }
 0x14c   : > { %v2008_v42 = vadd.f32 %v2000_v13, %v1959_v35  ;;  %v2117_v9 = vadd.f32 %v2109_v25, %v3680_v23  ;;  %v5122_v21 = vmul.f32 %v1988_v55, %v3694_v29  ;;  %v5125_v27 = vmul.f32 %v2040_v43, %v3722_v39  ;;  %v5139_v55 = vld [vmem:[%s3629_s19 + $0x160] sm:$0xff] }
 0x14d   : > { %v1916_v0 = vmul.f32 %v3812_v49, %v4932_v16  ;;  %v1981_v57 = vrot.slane %v5065_v48, 7  ;;  %3175 = vst [vmem:[%s3871_s24 + $0x128] sm:$0xff] %v2059_v8  ;;  %v5131_v15 = vadd.f32 %v2160_v30, %v2132_v4  ;;  %v2017_v56 = vmul.f32 %v3856_v37, %v5065_v48  ;;  %v5151_v8 = vld [vmem:[%s3629_s19 + $0x170] sm:$0xff] }
 0x14e   : > { %v2024_v51 = vadd.f32 %v2016_v38, %v2008_v42  ;;  %v2041_v35 = vsel %vm537_vm1, %v2033_v53, %v3648_v7  ;;  %v2133_v43 = vadd.f32 %v2125_v62, %v2117_v9  ;;  %v2126_v25 = vmul.f32 %v3777_v5, %v5065_v48 }
 0x14f   : > { %v1924_v12 = vadd.f32 %v1916_v0, %v1908_v2  ;;  %v1989_v16 = vsel %vm468_vm0, %v1977_v11, %v1981_v57  ;;  %v2053_v13 = vmul.f32 %v4583_v63, %v2041_v35  ;;  %v2162_v53 = vmul.f32 %v2041_v35, %v3786_v24 }
 0x150   : > { %v2060_v30 = vadd.f32 %v2052_v61, %v2024_v51  ;;  %v2001_v38 = vmul.f32 %v1989_v16, %v3837_v34  ;;  %v2110_v4 = vmul.f32 %v1989_v16, %v3764_v60  ;;  %v2186_v62 = vrot.slane %v5139_v55, 7 }
 0x151   : > { %v1960_v10 = vadd.f32 %v5012_v14, %v1924_v12  ;;  %v2212_v11 = vadd.f32 %v2204_v46, %v4971_v32  ;;  %v2220_v2 = vmul.f32 %v3716_v36, %v5018_v26  ;;  %v2238_v42 = vrot.slane %v5139_v55, 1 }
 0x152   : > { %3176 = vst [vmem:[%s3871_s24 + $0x130] sm:$0xff] %v2060_v30  ;;  %v2118_v61 = vadd.f32 %v2110_v4, %v3761_v58  ;;  %v2242_v9 = vrot.slane %v5151_v8, 1  ;;  %v5161_v14 = vadd.f32 %v2161_v33, %v2133_v43  ;;  %v5164_v57 = vmul.f32 %v2041_v35, %v3833_v3  ;;  %v5175_v33 = vld [vmem:[%s3629_s19 + $0x168] sm:$0xff] }
 0x153   : > { %v2009_v0 = vadd.f32 %v2001_v38, %v1960_v10  ;;  %v2202_v32 = vsel %vm468_vm0, %v3646_v6, %v2186_v62  ;;  %v2207_v46 = vmul.f32 %v1989_v16, %v3808_v45  ;;  %v2228_v51 = vadd.f32 %v2220_v2, %v2212_v11 }
 0x154   : > { %5901 = vst [vmem:[#allocation14_spill] sm:$0xff] %v5161_v14  ;;  %v2321_v26 = vmul.f32 %v3730_v41, %v5139_v55  ;;  %v2430_v12 = vmul.f32 %v3673_v20, %v5139_v55  ;;  %v2134_v30 = vadd.f32 %v2126_v25, %v2118_v61  ;;  %v2254_v35 = vsel %vm537_vm1, %v2238_v42, %v2242_v9  ;;  %v5187_v14 = vld [vmem:[%s3629_s19 + $0x178] sm:$0xff] }
 0x155   : > { %v2025_v43 = vadd.f32 %v2017_v56, %v2009_v0  ;;  %v2305_v38 = vmul.f32 %v2202_v32, %v3726_v40  ;;  %v5181_v4 = vmul.f32 %v2202_v32, %v3694_v29  ;;  %v2264_v16 = vadd.f32 %v5081_v44, %v2228_v51 }
 0x156   : > { %v2357_v10 = vmul.f32 %v4546_v54, %v2254_v35  ;;  %v2414_v11 = vmul.f32 %v2202_v32, %v3670_v19  ;;  %v2187_v56 = vrot.slane %v5175_v33, 7  ;;  %v2213_v25 = vadd.f32 %v5100_v28, %v5004_v18 }
 0x157   : > { %v2061_v2 = vadd.f32 %v2053_v13, %v2025_v43  ;;  %v2221_v61 = vmul.f32 %v3812_v49, %v5051_v31  ;;  %v2313_v42 = vadd.f32 %v2305_v38, %v2264_v16  ;;  %v2239_v44 = vrot.slane %v5175_v33, 1 }
 0x158   : > { %v2422_v0 = vadd.f32 %v2414_v11, %v3680_v23  ;;  %v2243_v54 = vrot.slane %v5187_v14, 1  ;;  %v5198_v32 = vadd.f32 %v2162_v53, %v2134_v30  ;;  %v5201_v13 = vmul.f32 %v2254_v35, %v3722_v39 }
 0x159   : > { %3177 = vst [vmem:[%s3871_s24 + $0x138] sm:$0xff] %v2061_v2  ;;  %v2203_v18 = vsel %vm468_vm0, %v3646_v6, %v2187_v56  ;;  %v2229_v28 = vadd.f32 %v2221_v61, %v2213_v25  ;;  %v2329_v51 = vadd.f32 %v2321_v26, %v2313_v42  ;;  %v2466_v43 = vmul.f32 %v2254_v35, %v3678_v22 }
 0x15a   : > { %v2438_v31 = vadd.f32 %v2430_v12, %v2422_v0  ;;  %v2322_v38 = vmul.f32 %v3856_v37, %v5175_v33  ;;  %v2255_v53 = vsel %vm537_vm1, %v2239_v44, %v2243_v54  ;;  %v2306_v16 = vmul.f32 %v2203_v18, %v3837_v34 }
 0x15b   : > { %v2265_v30 = vadd.f32 %v5113_v59, %v2229_v28  ;;  %v2431_v11 = vmul.f32 %v3777_v5, %v5175_v33  ;;  %v2365_v2 = vadd.f32 %v2357_v10, %v2329_v51  ;;  %v5216_v26 = vmul.f32 %v2203_v18, %v3808_v45 }
 0x15c   : > { %v2358_v12 = vmul.f32 %v4583_v63, %v2255_v53  ;;  %v2415_v35 = vmul.f32 %v2203_v18, %v3764_v60  ;;  %v2190_v61 = vrot.slane %v5151_v8, 7  ;;  %v2214_v42 = vadd.f32 %v5122_v21, %v5053_v17 }
 0x15d   : > { %v2314_v25 = vadd.f32 %v2306_v16, %v2265_v30  ;;  %v2222_v59 = vmul.f32 %v3716_v36, %v5032_v50  ;;  %3178 = vst [vmem:[%s3871_s24 + $0x140] sm:$0xff] %v2365_v2  ;;  %v5226_v0 = vadd.f32 %v2466_v43, %v2438_v31  ;;  %v5229_v10 = vmul.f32 %v2255_v53, %v3833_v3 }
 0x15e   : > { %v2423_v44 = vadd.f32 %v2415_v35, %v3761_v58  ;;  %v2467_v63 = vmul.f32 %v2255_v53, %v3786_v24  ;;  %v2198_v28 = vsel %vm468_vm0, %v2186_v62, %v2190_v61  ;;  %v2250_v50 = vsel %vm537_vm1, %v2242_v9, %v3648_v7  ;;  %v5256_v35 = vld [vmem:[#allocation6 + $0x10] ss:$0 sm:$0xff] }
 0x15f   : > { %v2330_v18 = vadd.f32 %v2322_v38, %v2314_v25  ;;  %v2230_v51 = vadd.f32 %v2222_v59, %v2214_v42  ;;  %v2307_v21 = vmul.f32 %v2198_v28, %v3726_v40  ;;  %v2323_v31 = vmul.f32 %v3730_v41, %v5151_v8 }
 0x160   : > { %v2439_v17 = vadd.f32 %v2431_v11, %v2423_v44  ;;  %v2432_v43 = vmul.f32 %v3673_v20, %v5151_v8  ;;  %v5244_v38 = vmul.f32 %v2250_v50, %v3722_v39  ;;  %v2416_v30 = vmul.f32 %v2198_v28, %v3670_v19 }
 0x161   : > { %v2366_v53 = vadd.f32 %v2358_v12, %v2330_v18  ;;  %v2266_v62 = vadd.f32 %v5125_v27, %v2230_v51  ;;  %v5249_v16 = vmul.f32 %v2198_v28, %v3694_v29  ;;  %v2191_v9 = vrot.slane %v5187_v14, 7  ;;  %v5278_v51 = vld [vmem:[#allocation6 + $0x18] ss:$0 sm:$0xff] }
 0x162   : > { %v2215_v11 = vadd.f32 %v2207_v46, %v5058_v47  ;;  %v2223_v2 = vmul.f32 %v3812_v49, %v5065_v48  ;;  %v2359_v25 = vmul.f32 %v5256_v35, %v2250_v50  ;;  %v2424_v27 = vadd.f32 %v2416_v30, %v3680_v23 }
 0x163   : > { %3179 = vst [vmem:[%s3871_s24 + $0x148] sm:$0xff] %v2366_v53  ;;  %v2315_v12 = vadd.f32 %v2307_v21, %v2266_v62  ;;  %v2468_v61 = vmul.f32 %v2250_v50, %v3678_v22  ;;  %v5261_v42 = vadd.f32 %v2467_v63, %v2439_v17  ;;  %v2199_v59 = vsel %vm468_vm0, %v2187_v56, %v2191_v9  ;;  %v5275_v63 = vld [vmem:[%s3629_s19 + $0x180] sm:$0xff] }
 0x164   : > { %v2231_v47 = vadd.f32 %v2223_v2, %v2215_v11  ;;  %v2251_v48 = vsel %vm537_vm1, %v2243_v54, %v3648_v7  ;;  %v2308_v18 = vmul.f32 %v2199_v59, %v3837_v34  ;;  %v2324_v28 = vmul.f32 %v3856_v37, %v5187_v14  ;;  %v5291_v11 = vld [vmem:[%s3629_s19 + $0x190] sm:$0xff] }
 0x165   : > { %v2331_v46 = vadd.f32 %v2323_v31, %v2315_v12  ;;  %v5269_v44 = vmul.f32 %v2251_v48, %v3833_v3  ;;  %v2360_v50 = vmul.f32 %v5278_v51, %v2251_v48  ;;  %v2417_v54 = vmul.f32 %v2199_v59, %v3764_v60 }
 0x166   : > { %v2267_v56 = vadd.f32 %v5164_v57, %v2231_v47  ;;  %v2433_v17 = vmul.f32 %v3777_v5, %v5187_v14  ;;  %v2440_v31 = vadd.f32 %v2432_v43, %v2424_v27  ;;  %v2216_v53 = vadd.f32 %v5181_v4, %v5093_v52 }
 0x167   : > { %v2367_v21 = vadd.f32 %v2359_v25, %v2331_v46  ;;  %v2224_v62 = vmul.f32 %v3716_v36, %v5139_v55  ;;  %v2425_v57 = vadd.f32 %v2417_v54, %v3761_v58  ;;  %v2469_v9 = vmul.f32 %v2251_v48, %v3786_v24 }
 0x168   : > { %v2316_v30 = vadd.f32 %v2308_v18, %v2267_v56  ;;  %v2287_v2 = vrot.slane %v5275_v63, 7  ;;  %v2325_v43 = vmul.f32 %v3730_v41, %v5275_v63  ;;  %v2339_v52 = vrot.slane %v5275_v63, 1 }
 0x169   : > { %3180 = vst [vmem:[%s3871_s24 + $0x150] sm:$0xff] %v2367_v21  ;;  %v2232_v12 = vadd.f32 %v2224_v62, %v2216_v53  ;;  %v2343_v4 = vrot.slane %v5291_v11, 1  ;;  %v2441_v25 = vadd.f32 %v2433_v17, %v2425_v57  ;;  %v2434_v47 = vmul.f32 %v3673_v20, %v5275_v63 }
 0x16a   : > { %v2332_v55 = vadd.f32 %v2324_v28, %v2316_v30  ;;  %v2303_v27 = vsel %vm468_vm0, %v3646_v6, %v2287_v2  ;;  %v5310_v28 = vld [vmem:[%s3629_s19 + $0x188] sm:$0xff]  ;;  %v5312_v54 = vadd.f32 %v2468_v61, %v2440_v31  ;;  %v2211_v17 = vmul.f32 %v2199_v59, %v3808_v45 }
 0x16b   : > { %v2268_v48 = vadd.f32 %v5201_v13, %v2232_v12  ;;  %v2309_v46 = vmul.f32 %v2303_v27, %v3726_v40  ;;  %v2355_v18 = vsel %vm537_vm1, %v2339_v52, %v2343_v4  ;;  %v2418_v56 = vmul.f32 %v2303_v27, %v3670_v19  ;;  %v5324_v52 = vld [vmem:[%s3629_s19 + $0x198] sm:$0xff] }
 0x16c   : > { %v2368_v21 = vadd.f32 %v2360_v50, %v2332_v55  ;;  %v2217_v53 = vadd.f32 %v5216_v26, %v5131_v15  ;;  %v5317_v62 = vadd.f32 %v2469_v9, %v2441_v25  ;;  %v2361_v30 = vmul.f32 %v5256_v35, %v2355_v18 }
 0x16d   : > { %v2317_v13 = vadd.f32 %v2309_v46, %v2268_v48  ;;  %v2426_v57 = vadd.f32 %v2418_v56, %v3680_v23  ;;  %v2470_v12 = vmul.f32 %v2355_v18, %v3678_v22  ;;  %v2225_v61 = vmul.f32 %v3812_v49, %v5175_v33  ;;  %v5902_v48 = vld [vmem:[#allocation14_spill] sm:$0xff] }
 0x16e   : > { %3181 = vst [vmem:[%s3871_s24 + $0x158] sm:$0xff] %v2368_v21  ;;  %v2288_v59 = vrot.slane %v5310_v28, 7  ;;  %v2340_v50 = vrot.slane %v5310_v28, 1  ;;  %v2515_v31 = vmul.f32 %v2303_v27, %v3694_v29  ;;  %v2344_v9 = vrot.slane %v5324_v52, 1 }
 0x16f   : > { %v2333_v15 = vadd.f32 %v2325_v43, %v2317_v13  ;;  %v2442_v26 = vadd.f32 %v2434_v47, %v2426_v57  ;;  %v2233_v55 = vadd.f32 %v2225_v61, %v2217_v53  ;;  %v2218_v46 = vadd.f32 %v5249_v16, %v5902_v48 }
 0x170   : > { %v2304_v25 = vsel %vm468_vm0, %v3646_v6, %v2288_v59  ;;  %v2226_v33 = vmul.f32 %v3716_v36, %v5151_v8  ;;  %v5340_v43 = vmul.f32 %v2355_v18, %v3722_v39  ;;  %v2356_v27 = vsel %vm537_vm1, %v2340_v50, %v2344_v9 }
 0x171   : > { %v2369_v56 = vadd.f32 %v2361_v30, %v2333_v15  ;;  %v2310_v47 = vmul.f32 %v2304_v25, %v3837_v34  ;;  %v2269_v21 = vadd.f32 %v5229_v10, %v2233_v55  ;;  %v2326_v53 = vmul.f32 %v3856_v37, %v5310_v28 }
 0x172   : > { %v2419_v13 = vmul.f32 %v2304_v25, %v3764_v60  ;;  %v2435_v16 = vmul.f32 %v3777_v5, %v5310_v28  ;;  %v5352_v8 = vadd.f32 %v2470_v12, %v2442_v26  ;;  %v2362_v18 = vmul.f32 %v5278_v51, %v2356_v27 }
 0x173   : > { %3182 = vst [vmem:[%s3871_s24 + $0x160] sm:$0xff] %v2369_v56  ;;  %v2234_v30 = vadd.f32 %v2226_v33, %v2218_v46  ;;  %v2291_v57 = vrot.slane %v5291_v11, 7  ;;  %v2318_v61 = vadd.f32 %v2310_v47, %v2269_v21  ;;  %v2471_v10 = vmul.f32 %v2356_v27, %v3786_v24 }
 0x174   : > { %v2427_v50 = vadd.f32 %v2419_v13, %v3761_v58  ;;  %v5359_v15 = vmul.f32 %v2304_v25, %v3808_v45  ;;  %v2327_v12 = vmul.f32 %v3730_v41, %v5291_v11  ;;  %v2351_v26 = vsel %vm537_vm1, %v2343_v4, %v3648_v7 }
 0x175   : > { %v2270_v55 = vadd.f32 %v5244_v38, %v2234_v30  ;;  %v2299_v48 = vsel %vm468_vm0, %v2287_v2, %v2291_v57  ;;  %v2334_v46 = vadd.f32 %v2326_v53, %v2318_v61  ;;  %v5372_v47 = vmul.f32 %v2356_v27, %v3833_v3 }
 0x176   : > { %v2443_v33 = vadd.f32 %v2435_v16, %v2427_v50  ;;  %v2311_v56 = vmul.f32 %v2299_v48, %v3726_v40  ;;  %v2420_v25 = vmul.f32 %v2299_v48, %v3670_v19  ;;  %v2363_v38 = vmul.f32 %v5256_v35, %v2351_v26 }
 0x177   : > { %v2436_v2 = vmul.f32 %v3673_v20, %v5291_v11  ;;  %v2219_v21 = vadd.f32 %v2211_v17, %v5198_v32  ;;  %v2370_v13 = vadd.f32 %v2362_v18, %v2334_v46  ;;  %v2472_v16 = vmul.f32 %v2351_v26, %v3678_v22 }
 0x178   : > { %v2319_v4 = vadd.f32 %v2311_v56, %v2270_v55  ;;  %v2428_v53 = vadd.f32 %v2420_v25, %v3680_v23  ;;  %v5381_v30 = vmul.f32 %v2299_v48, %v3694_v29  ;;  %v5384_v27 = vmul.f32 %v2351_v26, %v3722_v39  ;;  %v5398_v55 = vld [vmem:[%s3629_s19 + $0x1a0] sm:$0xff] }
 0x179   : > { %v2227_v57 = vmul.f32 %v3812_v49, %v5187_v14  ;;  %v2292_v61 = vrot.slane %v5324_v52, 7  ;;  %3183 = vst [vmem:[%s3871_s24 + $0x168] sm:$0xff] %v2370_v13  ;;  %v5390_v32 = vadd.f32 %v2471_v10, %v2443_v33  ;;  %v2328_v18 = vmul.f32 %v3856_v37, %v5324_v52  ;;  %v5410_v13 = vld [vmem:[%s3629_s19 + $0x1b0] sm:$0xff] }
 0x17a   : > { %v2335_v17 = vadd.f32 %v2327_v12, %v2319_v4  ;;  %v2352_v50 = vsel %vm537_vm1, %v2344_v9, %v3648_v7  ;;  %v2444_v48 = vadd.f32 %v2436_v2, %v2428_v53  ;;  %v2437_v56 = vmul.f32 %v3777_v5, %v5324_v52 }
 0x17b   : > { %v2235_v26 = vadd.f32 %v2227_v57, %v2219_v21  ;;  %v2300_v14 = vsel %vm468_vm0, %v2288_v59, %v2292_v61  ;;  %v2364_v46 = vmul.f32 %v5278_v51, %v2352_v50  ;;  %v2473_v9 = vmul.f32 %v2352_v50, %v3786_v24 }
 0x17c   : > { %v2371_v10 = vadd.f32 %v2363_v38, %v2335_v17  ;;  %v2312_v12 = vmul.f32 %v2300_v14, %v3837_v34  ;;  %v2421_v33 = vmul.f32 %v2300_v14, %v3764_v60  ;;  %v2497_v2 = vrot.slane %v5398_v55, 7 }
 0x17d   : > { %v2271_v25 = vadd.f32 %v5269_v44, %v2235_v26  ;;  %v2523_v59 = vadd.f32 %v2515_v31, %v5226_v0  ;;  %v2531_v21 = vmul.f32 %v3716_v36, %v5275_v63  ;;  %v2549_v4 = vrot.slane %v5398_v55, 1 }
 0x17e   : > { %3184 = vst [vmem:[%s3871_s24 + $0x170] sm:$0xff] %v2371_v10  ;;  %v2429_v38 = vadd.f32 %v2421_v33, %v3761_v58  ;;  %v2553_v53 = vrot.slane %v5410_v13, 1  ;;  %v5420_v44 = vadd.f32 %v2472_v16, %v2444_v48  ;;  %v5423_v61 = vmul.f32 %v2352_v50, %v3833_v3  ;;  %v5434_v16 = vld [vmem:[%s3629_s19 + $0x1a8] sm:$0xff] }
 0x17f   : > { %v2320_v57 = vadd.f32 %v2312_v12, %v2271_v25  ;;  %v2513_v0 = vsel %vm468_vm0, %v3646_v6, %v2497_v2  ;;  %v2518_v31 = vmul.f32 %v2300_v14, %v3808_v45  ;;  %v2539_v17 = vadd.f32 %v2531_v21, %v2523_v59 }
 0x180   : > { %5903 = vst [vmem:[#allocation15_spill] sm:$0xff] %v5420_v44  ;;  %v2632_v63 = vmul.f32 %v3730_v41, %v5398_v55  ;;  %v2741_v26 = vmul.f32 %v3673_v20, %v5398_v55  ;;  %v2445_v10 = vadd.f32 %v2437_v56, %v2429_v38  ;;  %v2565_v50 = vsel %vm537_vm1, %v2549_v4, %v2553_v53  ;;  %v5446_v44 = vld [vmem:[%s3629_s19 + $0x1b8] sm:$0xff] }
 0x181   : > { %v2336_v48 = vadd.f32 %v2328_v18, %v2320_v57  ;;  %v2616_v12 = vmul.f32 %v2513_v0, %v3726_v40  ;;  %v5440_v33 = vmul.f32 %v2513_v0, %v3694_v29  ;;  %v2575_v14 = vadd.f32 %v5340_v43, %v2539_v17 }
 0x182   : > { %v2668_v25 = vmul.f32 %v5256_v35, %v2565_v50  ;;  %v2725_v59 = vmul.f32 %v2513_v0, %v3670_v19  ;;  %v2498_v18 = vrot.slane %v5434_v16, 7  ;;  %v2524_v56 = vadd.f32 %v5359_v15, %v5261_v42 }
 0x183   : > { %v2372_v21 = vadd.f32 %v2364_v46, %v2336_v48  ;;  %v2532_v38 = vmul.f32 %v3812_v49, %v5310_v28  ;;  %v2624_v4 = vadd.f32 %v2616_v12, %v2575_v14  ;;  %v2550_v43 = vrot.slane %v5434_v16, 1 }
 0x184   : > { %v2733_v57 = vadd.f32 %v2725_v59, %v3680_v23  ;;  %v2554_v17 = vrot.slane %v5446_v44, 1  ;;  %v5457_v0 = vadd.f32 %v2473_v9, %v2445_v10  ;;  %v5460_v46 = vmul.f32 %v2565_v50, %v3722_v39 }
 0x185   : > { %3185 = vst [vmem:[%s3871_s24 + $0x178] sm:$0xff] %v2372_v21  ;;  %v2514_v42 = vsel %vm468_vm0, %v3646_v6, %v2498_v18  ;;  %v2540_v15 = vadd.f32 %v2532_v38, %v2524_v56  ;;  %v2640_v48 = vadd.f32 %v2632_v63, %v2624_v4  ;;  %v2777_v12 = vmul.f32 %v2565_v50, %v3678_v22 }
 0x186   : > { %5904 = vst [vmem:[#allocation12_spill] sm:$0xff] %v5457_v0  ;;  %v2749_v28 = vadd.f32 %v2741_v26, %v2733_v57  ;;  %v2633_v14 = vmul.f32 %v3856_v37, %v5434_v16  ;;  %v2566_v9 = vsel %vm537_vm1, %v2550_v43, %v2554_v17  ;;  %v2617_v59 = vmul.f32 %v2514_v42, %v3837_v34 }
 0x187   : > { %v2576_v10 = vadd.f32 %v5372_v47, %v2540_v15  ;;  %v2742_v21 = vmul.f32 %v3777_v5, %v5434_v16  ;;  %v2676_v0 = vadd.f32 %v2668_v25, %v2640_v48  ;;  %v5475_v63 = vmul.f32 %v2514_v42, %v3808_v45 }
 0x188   : > { %v2669_v26 = vmul.f32 %v5278_v51, %v2566_v9  ;;  %v2726_v50 = vmul.f32 %v2514_v42, %v3764_v60  ;;  %v2501_v38 = vrot.slane %v5410_v13, 7  ;;  %v2525_v4 = vadd.f32 %v5381_v30, %v5312_v54 }
 0x189   : > { %v2625_v56 = vadd.f32 %v2617_v59, %v2576_v10  ;;  %v2533_v47 = vmul.f32 %v3716_v36, %v5291_v11  ;;  %3186 = vst [vmem:[%s3871_s24 + $0x180] sm:$0xff] %v2676_v0  ;;  %v5485_v57 = vadd.f32 %v2777_v12, %v2749_v28  ;;  %v5488_v25 = vmul.f32 %v2566_v9, %v3833_v3 }
 0x18a   : > { %v2734_v43 = vadd.f32 %v2726_v50, %v3761_v58  ;;  %v2778_v15 = vmul.f32 %v2566_v9, %v3786_v24  ;;  %v2509_v48 = vsel %vm468_vm0, %v2497_v2, %v2501_v38  ;;  %v2561_v11 = vsel %vm537_vm1, %v2553_v53, %v3648_v7 }
 0x18b   : > { %v2641_v42 = vadd.f32 %v2633_v14, %v2625_v56  ;;  %v2541_v10 = vadd.f32 %v2533_v47, %v2525_v4  ;;  %v2618_v30 = vmul.f32 %v2509_v48, %v3726_v40  ;;  %v2634_v0 = vmul.f32 %v3730_v41, %v5410_v13 }
 0x18c   : > { %v2750_v54 = vadd.f32 %v2742_v21, %v2734_v43  ;;  %v2743_v28 = vmul.f32 %v3673_v20, %v5410_v13  ;;  %v5503_v14 = vmul.f32 %v2561_v11, %v3722_v39  ;;  %v2727_v9 = vmul.f32 %v2509_v48, %v3670_v19 }
 0x18d   : > { %v2677_v12 = vadd.f32 %v2669_v26, %v2641_v42  ;;  %v2577_v2 = vadd.f32 %v5384_v27, %v2541_v10  ;;  %v5508_v59 = vmul.f32 %v2509_v48, %v3694_v29  ;;  %v2502_v53 = vrot.slane %v5446_v44, 7  ;;  %v5532_v48 = vld [vmem:[%s3629_s19 + $0x1c0] sm:$0xff] }
 0x18e   : > { %v2526_v21 = vadd.f32 %v2518_v31, %v5317_v62  ;;  %v2534_v50 = vmul.f32 %v3812_v49, %v5324_v52  ;;  %v2670_v56 = vmul.f32 %v5256_v35, %v2561_v11  ;;  %v2735_v38 = vadd.f32 %v2727_v9, %v3680_v23 }
 0x18f   : > { %3187 = vst [vmem:[%s3871_s24 + $0x188] sm:$0xff] %v2677_v12  ;;  %v2626_v26 = vadd.f32 %v2618_v30, %v2577_v2  ;;  %v2779_v27 = vmul.f32 %v2561_v11, %v3678_v22  ;;  %v5518_v4 = vadd.f32 %v2778_v15, %v2750_v54  ;;  %v2510_v47 = vsel %vm468_vm0, %v2498_v18, %v2502_v53  ;;  %v5546_v53 = vld [vmem:[%s3629_s19 + $0x1d0] sm:$0xff] }
 0x190   : > { %v2542_v43 = vadd.f32 %v2534_v50, %v2526_v21  ;;  %v2562_v62 = vsel %vm537_vm1, %v2554_v17, %v3648_v7  ;;  %v2619_v42 = vmul.f32 %v2510_v47, %v3837_v34  ;;  %v2635_v15 = vmul.f32 %v3856_v37, %v5446_v44 }
 0x191   : > { %v2642_v31 = vadd.f32 %v2634_v0, %v2626_v26  ;;  %v5526_v52 = vmul.f32 %v2562_v62, %v3833_v3  ;;  %v2671_v10 = vmul.f32 %v5278_v51, %v2562_v62  ;;  %v2728_v11 = vmul.f32 %v2510_v47, %v3764_v60 }
 0x192   : > { %v2578_v18 = vadd.f32 %v5423_v61, %v2542_v43  ;;  %v2744_v17 = vmul.f32 %v3777_v5, %v5446_v44  ;;  %v2751_v30 = vadd.f32 %v2743_v28, %v2735_v38  ;;  %v2527_v0 = vadd.f32 %v5440_v33, %v5352_v8 }
 0x193   : > { %v2678_v54 = vadd.f32 %v2670_v56, %v2642_v31  ;;  %v2535_v12 = vmul.f32 %v3716_v36, %v5398_v55  ;;  %v2736_v9 = vadd.f32 %v2728_v11, %v3761_v58  ;;  %v2780_v61 = vmul.f32 %v2562_v62, %v3786_v24 }
 0x194   : > { %v2627_v2 = vadd.f32 %v2619_v42, %v2578_v18  ;;  %v2598_v21 = vrot.slane %v5532_v48, 7  ;;  %v2636_v28 = vmul.f32 %v3730_v41, %v5532_v48  ;;  %v2650_v8 = vrot.slane %v5532_v48, 1 }
 0x195   : > { %3188 = vst [vmem:[%s3871_s24 + $0x190] sm:$0xff] %v2678_v54  ;;  %v2543_v50 = vadd.f32 %v2535_v12, %v2527_v0  ;;  %v2654_v33 = vrot.slane %v5546_v53, 1  ;;  %v2752_v26 = vadd.f32 %v2744_v17, %v2736_v9  ;;  %v2745_v38 = vmul.f32 %v3673_v20, %v5532_v48 }
 0x196   : > { %v2643_v55 = vadd.f32 %v2635_v15, %v2627_v2  ;;  %v2614_v56 = vsel %vm468_vm0, %v3646_v6, %v2598_v21  ;;  %v5565_v15 = vld [vmem:[%s3629_s19 + $0x1c8] sm:$0xff]  ;;  %v5567_v18 = vadd.f32 %v2779_v27, %v2751_v30  ;;  %v2522_v11 = vmul.f32 %v2510_v47, %v3808_v45 }
 0x197   : > { %v2579_v43 = vadd.f32 %v5460_v46, %v2543_v50  ;;  %v2620_v62 = vmul.f32 %v2614_v56, %v3726_v40  ;;  %v2666_v31 = vsel %vm537_vm1, %v2650_v8, %v2654_v33  ;;  %v2729_v42 = vmul.f32 %v2614_v56, %v3670_v19  ;;  %v5579_v50 = vld [vmem:[%s3629_s19 + $0x1d8] sm:$0xff] }
 0x198   : > { %v2679_v17 = vadd.f32 %v2671_v10, %v2643_v55  ;;  %v2528_v54 = vadd.f32 %v5475_v63, %v5390_v32  ;;  %v5572_v0 = vadd.f32 %v2780_v61, %v2752_v26  ;;  %v2672_v12 = vmul.f32 %v5256_v35, %v2666_v31  ;;  %v5905_v26 = vld [vmem:[#allocation15_spill] sm:$0xff] }
 0x199   : > { %v2628_v46 = vadd.f32 %v2620_v62, %v2579_v43  ;;  %v2737_v2 = vadd.f32 %v2729_v42, %v3680_v23  ;;  %v2781_v9 = vmul.f32 %v2666_v31, %v3678_v22  ;;  %v2536_v27 = vmul.f32 %v3812_v49, %v5434_v16 }
 0x19a   : > { %3189 = vst [vmem:[%s3871_s24 + $0x198] sm:$0xff] %v2679_v17  ;;  %v2599_v47 = vrot.slane %v5565_v15, 7  ;;  %v2651_v10 = vrot.slane %v5565_v15, 1  ;;  %v2826_v30 = vmul.f32 %v2614_v56, %v3694_v29  ;;  %v2655_v61 = vrot.slane %v5579_v50, 1 }
 0x19b   : > { %v2644_v32 = vadd.f32 %v2636_v28, %v2628_v46  ;;  %v2753_v63 = vadd.f32 %v2745_v38, %v2737_v2  ;;  %v2544_v8 = vadd.f32 %v2536_v27, %v2528_v54  ;;  %v2529_v43 = vadd.f32 %v5508_v59, %v5905_v26 }
 0x19c   : > { %v2615_v55 = vsel %vm468_vm0, %v3646_v6, %v2599_v47  ;;  %v2537_v16 = vmul.f32 %v3716_v36, %v5410_v13  ;;  %v5595_v28 = vmul.f32 %v2666_v31, %v3722_v39  ;;  %v2667_v56 = vsel %vm537_vm1, %v2651_v10, %v2655_v61 }
 0x19d   : > { %v2680_v62 = vadd.f32 %v2672_v12, %v2644_v32  ;;  %v2621_v38 = vmul.f32 %v2615_v55, %v3837_v34  ;;  %v2580_v42 = vadd.f32 %v5488_v25, %v2544_v8  ;;  %v2637_v17 = vmul.f32 %v3856_v37, %v5565_v15 }
 0x19e   : > { %v2730_v54 = vmul.f32 %v2615_v55, %v3764_v60  ;;  %v2746_v59 = vmul.f32 %v3777_v5, %v5565_v15  ;;  %v5607_v13 = vadd.f32 %v2781_v9, %v2753_v63  ;;  %v2673_v31 = vmul.f32 %v5278_v51, %v2667_v56 }
 0x19f   : > { %3190 = vst [vmem:[%s3871_s24 + $0x1a0] sm:$0xff] %v2680_v62  ;;  %v2545_v46 = vadd.f32 %v2537_v16, %v2529_v43  ;;  %v2602_v12 = vrot.slane %v5546_v53, 7  ;;  %v2629_v2 = vadd.f32 %v2621_v38, %v2580_v42  ;;  %v2782_v25 = vmul.f32 %v2667_v56, %v3786_v24  ;;  %v5906_v38 = vld [vmem:[#allocation12_spill] sm:$0xff] }
 0x1a0   : > { %v2738_v27 = vadd.f32 %v2730_v54, %v3761_v58  ;;  %v2827_v10 = vmul.f32 %v2615_v55, %v3808_v45  ;;  %v2638_v9 = vmul.f32 %v3730_v41, %v5546_v53  ;;  %v2662_v63 = vsel %vm537_vm1, %v2654_v33, %v3648_v7 }
 0x1a1   : > { %v2581_v32 = vadd.f32 %v5503_v14, %v2545_v46  ;;  %v2610_v8 = vsel %vm468_vm0, %v2598_v21, %v2602_v12  ;;  %v2645_v26 = vadd.f32 %v2637_v17, %v2629_v2  ;;  %v5625_v55 = vmul.f32 %v2667_v56, %v3833_v3 }
 0x1a2   : > { %v2754_v43 = vadd.f32 %v2746_v59, %v2738_v27  ;;  %v2622_v16 = vmul.f32 %v2610_v8, %v3726_v40  ;;  %v2731_v62 = vmul.f32 %v2610_v8, %v3670_v19  ;;  %v2674_v14 = vmul.f32 %v5256_v35, %v2662_v63 }
 0x1a3   : > { %v2747_v21 = vmul.f32 %v3673_v20, %v5546_v53  ;;  %v2530_v42 = vadd.f32 %v2522_v11, %v5906_v38  ;;  %v2681_v54 = vadd.f32 %v2673_v31, %v2645_v26  ;;  %v2783_v59 = vmul.f32 %v2662_v63, %v3678_v22  ;;  %v5649_v31 = vld [vmem:[%s3629_s19 + $0x1e0] sm:$0xff]  ;;  %v5659_v26 = vld [vmem:[%s3629_s19 + $0x1e8] sm:$0xff] }
 0x1a4   : > { %v2630_v33 = vadd.f32 %v2622_v16, %v2581_v32  ;;  %v2739_v17 = vadd.f32 %v2731_v62, %v3680_v23  ;;  %v2828_v46 = vmul.f32 %v2610_v8, %v3694_v29  ;;  %v5635_v19 = vmul.f32 %v2662_v63, %v3722_v39  ;;  %v5664_v16 = vld [vmem:[%s3629_s19 + $0x1f0] sm:$0xff] }
 0x1a5   : > { %v2538_v56 = vmul.f32 %v3812_v49, %v5446_v44  ;;  %v2603_v12 = vrot.slane %v5579_v50, 7  ;;  %3191 = vst [vmem:[%s3871_s24 + $0x1a8] sm:$0xff] %v2681_v54  ;;  %v5641_v20 = vadd.f32 %v2782_v25, %v2754_v43  ;;  %v2639_v23 = vmul.f32 %v3856_v37, %v5579_v50 }
 0x1a6   : > { %v2646_v11 = vadd.f32 %v2638_v9, %v2630_v33  ;;  %v2663_v22 = vsel %vm537_vm1, %v2655_v61, %v3648_v7  ;;  %v2755_v2 = vadd.f32 %v2747_v21, %v2739_v17  ;;  %v2748_v63 = vmul.f32 %v3777_v5, %v5579_v50 }
 0x1a7   : > { %v2546_v44 = vadd.f32 %v2538_v56, %v2530_v42  ;;  %v2611_v27 = vsel %vm468_vm0, %v2599_v47, %v2603_v12  ;;  %v2675_v25 = vmul.f32 %v5278_v51, %v2663_v22  ;;  %v2784_v43 = vmul.f32 %v2663_v22, %v3786_v24 }
 0x1a8   : > { %v2682_v32 = vadd.f32 %v2674_v14, %v2646_v11  ;;  %v2623_v8 = vmul.f32 %v2611_v27, %v3837_v34  ;;  %v2732_v9 = vmul.f32 %v2611_v27, %v3764_v60  ;;  %v2808_v47 = vrot.slane %v5649_v31, 7 }
 0x1a9   : > { %v2582_v61 = vadd.f32 %v5526_v52, %v2546_v44  ;;  %v2834_v62 = vadd.f32 %v2826_v30, %v5485_v57  ;;  %v2842_v60 = vmul.f32 %v3716_v36, %v5532_v48  ;;  %v2860_v5 = vrot.slane %v5649_v31, 1  ;;  %v5696_v44 = vld [vmem:[%s3629_s19 + $0x1f8] sm:$0xff] }
 0x1aa   : > { %3192 = vst [vmem:[%s3871_s24 + $0x1b0] sm:$0xff] %v2682_v32  ;;  %v2740_v14 = vadd.f32 %v2732_v9, %v3761_v58  ;;  %v2864_v21 = vrot.slane %v5664_v16, 1  ;;  %v5675_v52 = vmul.f32 %v2663_v22, %v3833_v3  ;;  %v2824_v24 = vsel %vm468_vm0, %v3646_v6, %v2808_v47 }
 0x1ab   : > { %v2631_v38 = vadd.f32 %v2623_v8, %v2582_v61  ;;  %v2809_v57 = vrot.slane %v5659_v26, 7  ;;  %v5681_v30 = vadd.f32 %v2783_v59, %v2755_v2  ;;  %v2829_v58 = vmul.f32 %v2611_v27, %v3808_v45 }
 0x1ac   : > { %v2850_v48 = vadd.f32 %v2842_v60, %v2834_v62  ;;  %v2876_v42 = vsel %vm537_vm1, %v2860_v5, %v2864_v21  ;;  %v2756_v33 = vadd.f32 %v2748_v63, %v2740_v14  ;;  %v2927_v17 = vmul.f32 %v2824_v24, %v3726_v40 }
 0x1ad   : > { %v2647_v54 = vadd.f32 %v2639_v23, %v2631_v38  ;;  %v2943_v56 = vmul.f32 %v3730_v41, %v5649_v31  ;;  %v2830_v12 = vmul.f32 %v2824_v24, %v3694_v29  ;;  %v5691_v11 = vmul.f32 %v2876_v42, %v3722_v39 }
 0x1ae   : > { %v2886_v59 = vadd.f32 %v5595_v28, %v2850_v48  ;;  %v2835_v22 = vadd.f32 %v2827_v10, %v5518_v4  ;;  %v2825_v23 = vsel %vm468_vm0, %v3646_v6, %v2809_v57  ;;  %v2843_v27 = vmul.f32 %v3812_v49, %v5565_v15 }
 0x1af   : > { %v2683_v2 = vadd.f32 %v2675_v25, %v2647_v54  ;;  %v2861_v32 = vrot.slane %v5659_v26, 1  ;;  %v2979_v9 = vmul.f32 %v5256_v35, %v2876_v42  ;;  %v2865_v63 = vrot.slane %v5696_v44, 1 }
 0x1b0   : > { %v2935_v8 = vadd.f32 %v2927_v17, %v2886_v59  ;;  %v2928_v28 = vmul.f32 %v2825_v23, %v3837_v34  ;;  %v2851_v4 = vadd.f32 %v2843_v27, %v2835_v22  ;;  %v2812_v10 = vrot.slane %v5664_v16, 7 }
 0x1b1   : > { %3193 = vst [vmem:[%s3871_s24 + $0x1b8] sm:$0xff] %v2683_v2  ;;  %v2836_v25 = vadd.f32 %v2828_v46, %v5567_v18  ;;  %v2844_v61 = vmul.f32 %v3716_v36, %v5546_v53  ;;  %v2792_v62 = vadd.f32 %v2784_v43, %v2756_v33  ;;  %v2831_v14 = vmul.f32 %v2825_v23, %v3808_v45 }
 0x1b2   : > { %v2951_v15 = vadd.f32 %v2943_v56, %v2935_v8  ;;  %v2877_v60 = vsel %vm537_vm1, %v2861_v32, %v2865_v63  ;;  %v2887_v5 = vadd.f32 %v5625_v55, %v2851_v4  ;;  %v2944_v38 = vmul.f32 %v3856_v37, %v5659_v26 }
 0x1b3   : > { %v2872_v18 = vsel %vm537_vm1, %v2864_v21, %v3648_v7  ;;  %v2945_v53 = vmul.f32 %v3730_v41, %v5664_v16  ;;  %v2883_v43 = vmul.f32 %v2877_v60, %v3833_v3  ;;  %v2820_v24 = vsel %vm468_vm0, %v2808_v47, %v2812_v10 }
 0x1b4   : > { %v2987_v46 = vadd.f32 %v2979_v9, %v2951_v15  ;;  %v2852_v48 = vadd.f32 %v2844_v61, %v2836_v25  ;;  %v2936_v42 = vadd.f32 %v2928_v28, %v2887_v5  ;;  %v2980_v55 = vmul.f32 %v5278_v51, %v2877_v60 }
 0x1b5   : > { %v2929_v54 = vmul.f32 %v2820_v24, %v3726_v40  ;;  %v2813_v33 = vrot.slane %v5696_v44, 7  ;;  %v2837_v17 = vadd.f32 %v2829_v58, %v5572_v0  ;;  %v2845_v56 = vmul.f32 %v3812_v49, %v5579_v50 }
 0x1b6   : > { %3194 = vst [vmem:[%s3871_s24 + $0x1c0] sm:$0xff] %v2987_v46  ;;  %v2888_v21 = vadd.f32 %v5635_v19, %v2852_v48  ;;  %v2873_v47 = vsel %vm537_vm1, %v2865_v63, %v3648_v7  ;;  %v2952_v59 = vadd.f32 %v2944_v38, %v2936_v42  ;;  %v2832_v22 = vmul.f32 %v2820_v24, %v3694_v29 }
 0x1b7   : > { %v2884_v2 = vmul.f32 %v2872_v18, %v3722_v39  ;;  %v2821_v23 = vsel %vm468_vm0, %v2809_v57, %v2813_v33  ;;  %v2981_v19 = vmul.f32 %v5256_v35, %v2872_v18  ;;  %v2853_v0 = vadd.f32 %v2845_v56, %v2837_v17 }
 0x1b8   : > { %v2937_v27 = vadd.f32 %v2929_v54, %v2888_v21  ;;  %v2930_v58 = vmul.f32 %v2821_v23, %v3837_v34  ;;  %v2988_v50 = vadd.f32 %v2980_v55, %v2952_v59  ;;  %v2885_v32 = vmul.f32 %v2873_v47, %v3833_v3 }
 0x1b9   : > { %v2838_v8 = vadd.f32 %v2830_v12, %v5607_v13  ;;  %v2846_v9 = vmul.f32 %v3716_v36, %v5649_v31  ;;  %v2833_v39 = vmul.f32 %v2821_v23, %v3808_v45  ;;  %v2889_v1 = vadd.f32 %v5675_v52, %v2853_v0 }
 0x1ba   : > { %v2953_v29 = vadd.f32 %v2945_v53, %v2937_v27  ;;  %v2946_v57 = vmul.f32 %v3856_v37, %v5696_v44  ;;  %3195 = vst [vmem:[%s3871_s24 + $0x1c8] sm:$0xff] %v2988_v50  ;;  %v2931_v28 = vmul.f32 %v3726_v40, %v3646_v6  ;;  %v2839_v3 = vadd.f32 %v2831_v14, %v5641_v20 }
 0x1bb   : > { %v2854_v63 = vadd.f32 %v2846_v9, %v2838_v8  ;;  %v2847_v13 = vmul.f32 %v3812_v49, %v5659_v26  ;;  %v2938_v12 = vadd.f32 %v2930_v58, %v2889_v1  ;;  %v2982_v45 = vmul.f32 %v5278_v51, %v2873_v47 }
 0x1bc   : > { %v2989_v31 = vadd.f32 %v2981_v19, %v2953_v29  ;;  %v2947_v4 = vmul.f32 0.0, %v3730_v41  ;;  %v2932_v25 = vmul.f32 %v3837_v34, %v3646_v6  ;;  %v2840_v61 = vadd.f32 %v2832_v22, %v5681_v30 }
 0x1bd   : > { %v2890_v52 = vadd.f32 %v5691_v11, %v2854_v63  ;;  %v2855_v10 = vadd.f32 %v2847_v13, %v2839_v3  ;;  %v2954_v40 = vadd.f32 %v2946_v57, %v2938_v12  ;;  %v2848_v20 = vmul.f32 %v3716_v36, %v5664_v16 }
 0x1be   : > { %3196 = vst [vmem:[%s3871_s24 + $0x1d0] sm:$0xff] %v2989_v31  ;;  %v2841_v26 = vadd.f32 %v2833_v39, %v2792_v62  ;;  %v2849_v15 = vmul.f32 %v3812_v49, %v5696_v44  ;;  %v2983_v41 = vmul.f32 %v5256_v35, %v3648_v7  ;;  %v2948_v6 = vmul.f32 0.0, %v3856_v37 }
 0x1bf   : > { %v2939_v14 = vadd.f32 %v2931_v28, %v2890_v52  ;;  %v2891_v11 = vadd.f32 %v2883_v43, %v2855_v10  ;;  %v2990_v34 = vadd.f32 %v2982_v45, %v2954_v40  ;;  %v2856_v30 = vadd.f32 %v2848_v20, %v2840_v61 }
 0x1c0   : > { %v2857_v60 = vadd.f32 %v2849_v15, %v2841_v26  ;;  %v2984_v16 = vmul.f32 %v5278_v51, %v3648_v7 }
 0x1c1   : > { %v2955_v5 = vadd.f32 %v2947_v4, %v2939_v14  ;;  %v2940_v36 = vadd.f32 %v2932_v25, %v2891_v11  ;;  %3197 = vst [vmem:[%s3871_s24 + $0x1d8] sm:$0xff] %v2990_v34  ;;  %v2892_v49 = vadd.f32 %v2884_v2, %v2856_v30 }
 0x1c2   : > { %v2893_v44 = vadd.f32 %v2885_v32, %v2857_v60 }
 0x1c3   : > { %v2991_v35 = vadd.f32 %v2983_v41, %v2955_v5  ;;  %v2956_v62 = vadd.f32 %v2948_v6, %v2940_v36  ;;  %v2941_v38 = vadd.f32 %v2931_v28, %v2892_v49 }
 0x1c4   : > { %v2942_v37 = vadd.f32 %v2932_v25, %v2893_v44 }
 0x1c5   : > { %3198 = vst [vmem:[%s3871_s24 + $0x1e0] sm:$0xff] %v2991_v35  ;;  %v2992_v18 = vadd.f32 %v2984_v16, %v2956_v62  ;;  %v2957_v53 = vadd.f32 %v2947_v4, %v2941_v38 }
 0x1c6   : > { %v2958_v46 = vadd.f32 %v2948_v6, %v2942_v37 }
 0x1c7   : > { %3199 = vst [vmem:[%s3871_s24 + $0x1e8] sm:$0xff] %v2992_v18  ;;  %v2993_v7 = vadd.f32 %v2983_v41, %v2957_v53 }
 0x1c8   : > { %v2994_v51 = vadd.f32 %v2984_v16, %v2958_v46 }
 0x1c9   : > { %3200 = vst [vmem:[%s3871_s24 + $0x1f0] sm:$0xff] %v2993_v7 }
 0x1ca   : > { %3201 = vst [vmem:[%s3871_s24 + $0x1f8] sm:$0xff] %v2994_v51 }
 0x1cb   : > { %3362 = shalt.err (!%p3359_p5)
}
 0x1cc   : > { %s3363_s6 = scalar_lea.hbm %s5781_s25, 8192  ;;  %s3367_s19 = scalar_lea.hbm %s5837_s3, 16384 }
 0x1cd   : > { %p3364_p9 = scmp.ne.s32.totalorder %s5781_s25, %s3363_s6  ;;  %p3368_p3 = scmp.lt.u32.totalorder %s5781_s25, %s5837_s3 }
 0x1ce   : > { %p3369_p7 = scmp.lt.u32.totalorder %s3367_s19, %s3363_s6  ;;  %p3371_p4 = scmp.lt.u32.totalorder %s3363_s6, %s5781_s25 }
 0x1cf   : > { %p3365_p1 = pnand %p3364_p9, %p3564_p10 }
 0x1d0   : > { %p3370_p13 = por %p3369_p7, %p3368_p3 }
 0x1d1   : > { %p3366_p2 = pneg %p3365_p1 }
 0x1d2   : > { %p3372_p6 = por %p3371_p4, %p3370_p13 }
 0x1d4   : > { %p3373_p8 = pnand %p3372_p6, %p3366_p2 }
 0x1d6   : > { %3376 = shalt.err (!%p3373_p8)
}
 0x1d7   : > { %s3443_s24 = smov 256   ;;  %s3444_s10 = smov 16  }
 0x1d8   : > { %3215 = dma.vmem_to_hbm [thread:$0]  (%p3564_p10), %s5783_s11, 8192, %s5781_s25, %s3005_s15, %s3443_s24, %s3443_s24, %s3444_s10  }
 0x1d9 PF: > { %s3035_s9 = sand.u32 1, %s3415_s12   ;;  %p5907_p12 = scmp.ne.s32.totalorder %s5852_s23, 0 }
 0x1da   : > { %p5908_p11 = scmp.ge.s32.totalorder %s3435_s17, 2  ;;  %s3036_s18 = scalar_lea.sflag [#allocation5], %s3035_s9 }
 0x1dc   : > { %p3226_p0 = pnand %p5908_p11, %p5907_p12 }
 0x1de   : > { %3410 = dma.done.wait (!%p3226_p0), %s3036_s18, 8192  }
 0x1df   : > { %3412 = vsyncadd (!%p3226_p0), %s3036_s18, 4294959104  ;;  %s20_s17 = sadd.s32 1, %s3435_s17   ;;  %s5909_s12 = smov %s3419_s13 }
 0x1e0   : > { %p17_p5 = scmp.ge.s32.totalorder %s20_s17, 4   ;;  %s5910_s13 = smov %s3423_s14 }
 0x1e1   : > { %s5911_s14 = smov %s3573_s5  ;;  %s5912_s15 = smov %s3431_s16 }
 0x1e2   : > { %s5913_s16 = smov %s5915_s28  ;;  %19 = sbr.rel (!%p17_p5) target bundleno = 7 (0x7), region = 109 }
 0x1e9   :  { %3041 = vsyncpa [#allocation4], 1 }
 0x1ea   :  { %3043 = vsyncpa [#allocation4 + $0x1], 1 }
 0x1eb   :  { %3044 = vsyncpa [#allocation7], 1 }
 0x1ec   :  { %3045 = vsyncpa [#allocation5], 1 }
 0x1ed   :  { %3047 = vsyncpa [#allocation5 + $0x1], 1 }

</bundles_post_ra>
